<compile_context>
chip_gen: v5e
topology: v5e:2x2
jax: 0.10.0
libtpu: 0.0.40
codegen_flags: <defaults>
</compile_context>

<pallas_src>
import functools
import math

import jax
import jax.numpy as jnp
from jax import lax
from jax.experimental import pallas as pl
from jax.experimental.pallas import tpu as pltpu

# ----------------------------- configuration --------------------------------
TOKEN_LEN = 32          # original module: 288 (scaled down, divisible by nhead)
NHEAD = 8
DIM_FF = TOKEN_LEN * 2  # nn.Transformer(dim_feedforward=token_len*2)
NUM_ENC_LAYERS = 6
NUM_DEC_LAYERS = 6
LN_EPS = 1e-5
MAX_LEN = 5000          # PositionalEncoding max_len

assert TOKEN_LEN % NHEAD == 0


# --------------------------- in-kernel helpers -------------------------------
def _dot(a, b):
    """a @ b with bf16 MXU inputs and f32 accumulation."""
    return lax.dot_general(a.astype(jnp.bfloat16), b.astype(jnp.bfloat16),
                           (((1,), (0,)), ((), ())),
                           preferred_element_type=jnp.float32)


def _dot_nt(a, b):
    """a @ b.T (contract last dims) with bf16 MXU inputs, f32 accumulation."""
    return lax.dot_general(a.astype(jnp.bfloat16), b.astype(jnp.bfloat16),
                           (((1,), (1,)), ((), ())),
                           preferred_element_type=jnp.float32)


def _layernorm(x, g, b, eps=LN_EPS):
    mu = jnp.mean(x, axis=-1, keepdims=True)
    xc = x - mu
    var = jnp.mean(xc * xc, axis=-1, keepdims=True)
    return xc * lax.rsqrt(var + eps) * g + b


def _softmax(s):
    # Exact divide (pl.reciprocal(approx=True) would be slightly off vs torch).
    m = jnp.max(s, axis=-1, keepdims=True)
    p = jnp.exp(s - m)
    return p / jnp.sum(p, axis=-1, keepdims=True)


def _mha(q, k, v, *, H, Dh):
    """Per-batch multi-head attention with head-sliced Dh contraction.

    q: (Tq, E) queries already scaled by 1/sqrt(Dh); k, v: (Tk, E).
    Each head contracts only over its own Dh lanes (static slices), so the
    QK^T / PV matmuls never contract over the full E, and no lane masks or
    cross-batch bias are needed.  Head outputs are re-assembled with a static
    lane concat feeding the out-projection matmul.
    """
    outs = []
    for h in range(H):
        sl = slice(h * Dh, (h + 1) * Dh)
        s = _dot_nt(q[:, sl], k[:, sl])          # (Tq, Tk), depth-Dh contraction
        p = _softmax(s)
        outs.append(_dot(p, v[:, sl]))           # (Tq, Dh)
    return jnp.concatenate(outs, axis=-1)        # (Tq, E)


# ------------------------------ Pallas kernels -------------------------------
def _encoder_stack_kernel(x_ref, pe_ref, ng_ref, nb_ref,
                          wqkv_ref, bqkv_ref, wo_ref, bo_ref,
                          ln1g_ref, ln1b_ref,
                          ff1w_ref, ff1b_ref, ff2w_ref, ff2b_ref,
                          ln2g_ref, ln2b_ref,
                          mem_ref, h_scr, *, E, H, Dh):
    """One grid step = (batch b, encoder layer l).  Activation lives in h_scr."""
    l = pl.program_id(1)

    @pl.when(l == 0)
    def _():
        # PositionalEncoding add fused into the first layer step (dropout = id).
        h_scr[...] = x_ref[0] + pe_ref[...]

    x = h_scr[...]                                         # (S, E) f32
    # Fused QKV in-projection: single lane-dense (E, 3E) matmul.
    qkv = _dot(x, wqkv_ref[0]) + bqkv_ref[0]               # (S, 3E)
    scale = 1.0 / math.sqrt(Dh)
    q = qkv[:, 0 * E:1 * E] * scale
    k = qkv[:, 1 * E:2 * E]
    v = qkv[:, 2 * E:3 * E]
    attn = _mha(q, k, v, H=H, Dh=Dh)
    attn = _dot(attn, wo_ref[0]) + bo_ref[0]
    h1 = _layernorm(x + attn, ln1g_ref[0], ln1b_ref[0])
    ff = jnp.maximum(_dot(h1, ff1w_ref[0]) + ff1b_ref[0], 0.0)
    ff = _dot(ff, ff2w_ref[0]) + ff2b_ref[0]
    h2 = _layernorm(h1 + ff, ln2g_ref[0], ln2b_ref[0])
    h_scr[...] = h2

    @pl.when(l == pl.num_programs(1) - 1)
    def _():
        # nn.Transformer encoder-final LayerNorm fused into the last step.
        mem_ref[0] = _layernorm(h2, ng_ref[...], nb_ref[...]).astype(mem_ref.dtype)


def _decoder_stack_kernel(mem_ref, ng_ref, nb_ref,
                          hw1_ref, hb1_ref, hw2_ref, hb2_ref,
                          sa_wv_ref, sa_bv_ref, sa_wo_ref, sa_bo_ref,
                          ln1g_ref, ln1b_ref,
                          ca_wq_ref, ca_bq_ref, ca_wkv_ref, ca_bkv_ref,
                          ca_wo_ref, ca_bo_ref,
                          ln2g_ref, ln2b_ref,
                          ff1w_ref, ff1b_ref, ff2w_ref, ff2b_ref,
                          ln3g_ref, ln3b_ref,
                          out_ref, y_scr, *, E, H, Dh):
    """One grid step = (batch b, decoder layer l).  Target length == 1.

    The encoder memory block index is constant along the layer axis, so it is
    DMA'd once per batch and reused by all layers.
    """
    l = pl.program_id(1)

    @pl.when(l == 0)
    def _():
        # decoder_input = ones((1, B, E)) -> per-batch (1, E) row of ones.
        y_scr[...] = jnp.ones_like(y_scr)

    y = y_scr[...]                                          # (1, E)
    mem = mem_ref[0]                                        # (S, E)
    # Self-attention with a length-1 target: softmax over a single key is
    # identically 1, so the block collapses to Wo(Wv y + bv) + bo (bit-identical
    # to the full attention path; Q/K projections cannot affect the output).
    # Only valid because this module's decoder input always has length 1.
    sa = _dot(y, sa_wv_ref[0]) + sa_bv_ref[0]
    sa = _dot(sa, sa_wo_ref[0]) + sa_bo_ref[0]
    h1 = _layernorm(y + sa, ln1g_ref[0], ln1b_ref[0])
    # Cross-attention: fused (E, 2E) KV projection + per-batch multi-head attn.
    scale = 1.0 / math.sqrt(Dh)
    q = (_dot(h1, ca_wq_ref[0]) + ca_bq_ref[0]) * scale     # (1, E)
    kv = _dot(mem, ca_wkv_ref[0]) + ca_bkv_ref[0]           # (S, 2E)
    k = kv[:, :E]
    v = kv[:, E:]
    ca = _mha(q, k, v, H=H, Dh=Dh)                          # (1, E)
    ca = _dot(ca, ca_wo_ref[0]) + ca_bo_ref[0]
    h2 = _layernorm(h1 + ca, ln2g_ref[0], ln2b_ref[0])
    ff = jnp.maximum(_dot(h2, ff1w_ref[0]) + ff1b_ref[0], 0.0)
    ff = _dot(ff, ff2w_ref[0]) + ff2b_ref[0]
    h3 = _layernorm(h2 + ff, ln3g_ref[0], ln3b_ref[0])
    y_scr[...] = h3

    @pl.when(l == pl.num_programs(1) - 1)
    def _():
        # Fused decoder-final LayerNorm + Linear(E, E//2) + ReLU + Linear(E//2, 1).
        yn = _layernorm(h3, ng_ref[...], nb_ref[...])
        hh = jnp.maximum(_dot(yn, hw1_ref[...]) + hb1_ref[...], 0.0)   # (1, E//2)
        out = jnp.sum(hh * hw2_ref[...], axis=-1, keepdims=True) + hb2_ref[...]
        out_ref[0] = out.astype(out_ref.dtype)


# --------------------------- pallas_call plumbing ----------------------------
def _batch_spec(shape):
    """(1, *shape) block over a (B, *shape) array, selected by the batch axis."""
    return pl.BlockSpec((1,) + tuple(shape), lambda b, l: (b, 0, 0))


def _layer_spec(shape):
    """(1, *shape) block over an (L, *shape) stacked-weight array, selected by
    the layer axis (double-buffered -> layer l+1 prefetched behind layer l)."""
    return pl.BlockSpec((1,) + tuple(shape), lambda b, l: (l, 0, 0))


def _const_spec(shape):
    """Full-array 2-D block, loaded once and kept resident."""
    return pl.BlockSpec(tuple(shape), lambda b, l: (0, 0))


def _run_encoder(x_bse, pe, norm_g, norm_b, p, *, H):
    B, S, E = x_bse.shape
    L, _, FF = p["ff1_w"].shape
    Dh = E // H
    kernel = functools.partial(_encoder_stack_kernel, E=E, H=H, Dh=Dh)
    cost = pl.CostEstimate(
        flops=B * L * (2 * S * E * 3 * E + 4 * S * S * E + 2 * S * E * E
                       + 4 * S * E * FF),
        transcendentals=B * L * (H * S * S + 2 * S),
        bytes_accessed=2 * B * S * E * 4 + L * (3 * E * E + E * E + 2 * E * FF) * 2)
    return pl.pallas_call(
        kernel,
        out_shape=jax.ShapeDtypeStruct((B, S, E), jnp.float32),
        grid=(B, L),
        in_specs=[
            _batch_spec((S, E)),                      # x (per batch)
            _const_spec((S, E)),                      # positional encoding rows
            _const_spec((1, E)), _const_spec((1, E)),  # encoder final norm
            _layer_spec((E, 3 * E)), _layer_spec((1, 3 * E)),   # qkv proj
            _layer_spec((E, E)), _layer_spec((1, E)),           # out proj
            _layer_spec((1, E)), _layer_spec((1, E)),           # ln1
            _layer_spec((E, FF)), _layer_spec((1, FF)),         # ff1
            _layer_spec((FF, E)), _layer_spec((1, E)),          # ff2
            _layer_spec((1, E)), _layer_spec((1, E)),           # ln2
        ],
        out_specs=_batch_spec((S, E)),
        scratch_shapes=[pltpu.VMEM((S, E), jnp.float32)],       # activation carry
        compiler_params=pltpu.CompilerParams(
            dimension_semantics=("parallel", "arbitrary")),
        cost_estimate=cost,
    )(x_bse, pe, norm_g, norm_b,
      p["w_qkv"], p["b_qkv"], p["w_o"], p["b_o"],
      p["ln1_g"], p["ln1_b"],
      p["ff1_w"], p["ff1_b"], p["ff2_w"], p["ff2_b"],
      p["ln2_g"], p["ln2_b"])


def _run_decoder(memory, norm_g, norm_b, h1w, h1b, h2w, h2b, p, *, H):
    B, S, E = memory.shape
    L, _, FF = p["ff1_w"].shape
    Dh = E // H
    kernel = functools.partial(_decoder_stack_kernel, E=E, H=H, Dh=Dh)
    cost = pl.CostEstimate(
        flops=B * L * (8 * E * E + 4 * S * E * E + 4 * S * E + 4 * E * FF),
        transcendentals=B * L * (H * S + 3),
        bytes_accessed=B * S * E * 4 + B * 4
        + L * (6 * E * E + 2 * E * FF) * 2)
    return pl.pallas_call(
        kernel,
        out_shape=jax.ShapeDtypeStruct((B, 1, 1), jnp.float32),
        grid=(B, L),
        in_specs=[
            _batch_spec((S, E)),                       # memory (resident over layers)
            _const_spec((1, E)), _const_spec((1, E)),  # decoder final norm
            _const_spec((E, E // 2)), _const_spec((1, E // 2)),  # head linear 1
            _const_spec((1, E // 2)), _const_spec((1, 1)),       # head linear 2
            _layer_spec((E, E)), _layer_spec((1, E)),            # sa v proj
            _layer_spec((E, E)), _layer_spec((1, E)),            # sa out proj
            _layer_spec((1, E)), _layer_spec((1, E)),            # ln1
            _layer_spec((E, E)), _layer_spec((1, E)),            # ca q proj
            _layer_spec((E, 2 * E)), _layer_spec((1, 2 * E)),    # ca kv proj
            _layer_spec((E, E)), _layer_spec((1, E)),            # ca out proj
            _layer_spec((1, E)), _layer_spec((1, E)),            # ln2
            _layer_spec((E, FF)), _layer_spec((1, FF)),          # ff1
            _layer_spec((FF, E)), _layer_spec((1, E)),           # ff2
            _layer_spec((1, E)), _layer_spec((1, E)),            # ln3
        ],
        out_specs=pl.BlockSpec((1, 1, 1), lambda b, l: (b, 0, 0)),
        scratch_shapes=[pltpu.VMEM((1, E), jnp.float32)],        # target-row carry
        compiler_params=pltpu.CompilerParams(
            dimension_semantics=("parallel", "arbitrary")),
        cost_estimate=cost,
    )(memory, norm_g, norm_b, h1w, h1b, h2w, h2b,
      p["sa_w_v"], p["sa_b_v"], p["sa_w_o"], p["sa_b_o"],
      p["ln1_g"], p["ln1_b"],
      p["ca_w_q"], p["ca_b_q"], p["ca_w_kv"], p["ca_b_kv"],
      p["ca_w_o"], p["ca_b_o"],
      p["ln2_g"], p["ln2_b"],
      p["ff1_w"], p["ff1_b"], p["ff2_w"], p["ff2_b"],
      p["ln3_g"], p["ln3_b"])


# ------------------------------- forward pass --------------------------------
def value_net_forward(state, params):
    """state: (S, B, E) float32  ->  (1, B, 1) float32."""
    S, B, E = state.shape
    H = NHEAD
    # Batch-major (B, S, E): one small XLA transpose before the first kernel;
    # the PE add itself is fused into the encoder kernel.
    x_bse = jnp.transpose(state, (1, 0, 2))
    pe = params["pe"][:S]                                   # (S, E)

    memory = _run_encoder(x_bse, pe,
                          params["enc_norm_g"], params["enc_norm_b"],
                          params["enc"], H=H)               # (B, S, E)

    out = _run_decoder(memory,
                       params["dec_norm_g"], params["dec_norm_b"],
                       params["head1_w"], params["head1_b"],
                       params["head2_w"], params["head2_b"],
                       params["dec"], H=H)                  # (B, 1, 1)
    return out.reshape(1, B, 1)


# ----------------------------- parameter setup -------------------------------
def make_positional_encoding(max_len, d_model):
    position = jnp.arange(max_len, dtype=jnp.float32)[:, None]
    div_term = jnp.exp(jnp.arange(0, d_model, 2, dtype=jnp.float32)
                       * (-math.log(10000.0) / d_model))
    pe = jnp.zeros((max_len, d_model), jnp.float32)
    pe = pe.at[:, 0::2].set(jnp.sin(position * div_term))
    pe = pe.at[:, 1::2].set(jnp.cos(position * div_term))
    return pe


def init_params(key):
    E, FF = TOKEN_LEN, DIM_FF
    Le, Ld = NUM_ENC_LAYERS, NUM_DEC_LAYERS
    keys = iter(jax.random.split(key, 128))

    def dense(shape_w, shape_b, scale=0.05):
        # Weights stored bf16 (MXU-native, halves weight DMA); biases stay f32.
        w = (scale * jax.random.normal(next(keys), shape_w, jnp.float32)
             ).astype(jnp.bfloat16)
        b = scale * jax.random.normal(next(keys), shape_b, jnp.float32)
        return w, b

    def ln(L):
        return jnp.ones((L, 1, E), jnp.float32), jnp.zeros((L, 1, E), jnp.float32)

    # Encoder: per-layer weights stacked along a leading layer axis.
    enc = {}
    enc["w_qkv"], enc["b_qkv"] = dense((Le, E, 3 * E), (Le, 1, 3 * E))
    enc["w_o"], enc["b_o"] = dense((Le, E, E), (Le, 1, E))
    enc["ff1_w"], enc["ff1_b"] = dense((Le, E, FF), (Le, 1, FF))
    enc["ff2_w"], enc["ff2_b"] = dense((Le, FF, E), (Le, 1, E))
    enc["ln1_g"], enc["ln1_b"] = ln(Le)
    enc["ln2_g"], enc["ln2_b"] = ln(Le)

    # Decoder: self-attention on a length-1 target never uses its q/k
    # projections (softmax over one key == 1), so only v / out are materialized.
    dec = {}
    dec["sa_w_v"], dec["sa_b_v"] = dense((Ld, E, E), (Ld, 1, E))
    dec["sa_w_o"], dec["sa_b_o"] = dense((Ld, E, E), (Ld, 1, E))
    dec["ca_w_q"], dec["ca_b_q"] = dense((Ld, E, E), (Ld, 1, E))
    dec["ca_w_kv"], dec["ca_b_kv"] = dense((Ld, E, 2 * E), (Ld, 1, 2 * E))
    dec["ca_w_o"], dec["ca_b_o"] = dense((Ld, E, E), (Ld, 1, E))
    dec["ff1_w"], dec["ff1_b"] = dense((Ld, E, FF), (Ld, 1, FF))
    dec["ff2_w"], dec["ff2_b"] = dense((Ld, FF, E), (Ld, 1, E))
    dec["ln1_g"], dec["ln1_b"] = ln(Ld)
    dec["ln2_g"], dec["ln2_b"] = ln(Ld)
    dec["ln3_g"], dec["ln3_b"] = ln(Ld)

    h1_w, h1_b = dense((E, E // 2), (1, E // 2))
    # Final Linear(E//2, 1) stored as a (1, E//2) row vector: applied as a VPU
    # row-reduction inside the head (no 1-lane MXU matmul).
    h2_w = 0.05 * jax.random.normal(next(keys), (1, E // 2), jnp.float32)
    h2_b = 0.05 * jax.random.normal(next(keys), (1, 1), jnp.float32)

    return dict(pe=make_positional_encoding(MAX_LEN, E),
                enc=enc, dec=dec,
                enc_norm_g=jnp.ones((1, E), jnp.float32),
                enc_norm_b=jnp.zeros((1, E), jnp.float32),
                dec_norm_g=jnp.ones((1, E), jnp.float32),
                dec_norm_b=jnp.zeros((1, E), jnp.float32),
                head1_w=h1_w, head1_b=h1_b, head2_w=h2_w, head2_b=h2_b)


# ----------------------------------- main ------------------------------------
if __name__ == "__main__":
    key = jax.random.PRNGKey(0)
    pkey, xkey = jax.random.split(key)
    params = init_params(pkey)

    S, B = 8, 2                                   # small seq / batch
    state = jax.random.normal(xkey, (S, B, TOKEN_LEN), jnp.float32)

    fwd = jax.jit(value_net_forward)
    out = jax.block_until_ready(fwd(state, params))

    assert out.shape == (1, B, 1), out.shape
    assert bool(jnp.all(jnp.isfinite(out)))
    print("KERNEL_OK")
</pallas_src>

<mosaic_0001>
module attributes {stable_mosaic.version = 11 : i64} {
  func.func @_encoder_stack_kernel(%arg0: i32, %arg1: i32, %arg2: memref<1x8x32xf32, #tpu.memory_space<vmem>>, %arg3: memref<8x32xf32, #tpu.memory_space<vmem>>, %arg4: memref<1x32xf32, #tpu.memory_space<vmem>>, %arg5: memref<1x32xf32, #tpu.memory_space<vmem>>, %arg6: memref<1x32x96xbf16, #tpu.memory_space<vmem>>, %arg7: memref<1x1x96xf32, #tpu.memory_space<vmem>>, %arg8: memref<1x32x32xbf16, #tpu.memory_space<vmem>>, %arg9: memref<1x1x32xf32, #tpu.memory_space<vmem>>, %arg10: memref<1x1x32xf32, #tpu.memory_space<vmem>>, %arg11: memref<1x1x32xf32, #tpu.memory_space<vmem>>, %arg12: memref<1x32x64xbf16, #tpu.memory_space<vmem>>, %arg13: memref<1x1x64xf32, #tpu.memory_space<vmem>>, %arg14: memref<1x64x32xbf16, #tpu.memory_space<vmem>>, %arg15: memref<1x1x32xf32, #tpu.memory_space<vmem>>, %arg16: memref<1x1x32xf32, #tpu.memory_space<vmem>>, %arg17: memref<1x1x32xf32, #tpu.memory_space<vmem>>, %arg18: memref<1x8x32xf32, #tpu.memory_space<vmem>>, %arg19: memref<8x32xf32, #tpu.memory_space<vmem>>) attributes {dimension_semantics = [#tpu.dimension_semantics<parallel>, #tpu.dimension_semantics<arbitrary>], iteration_bounds = array<i64: 2, 6>, scalar_prefetch = 0 : i64, scratch_operands = 1 : i64, tpu.core_type = #tpu.core_type<tc>, window_params = [{transform_indices = @transform_0, window_bounds = array<i64: 1, 8, 32>}, {pipeline_mode = #tpu.pipeline_mode<synchronous>, transform_indices = @transform_1, window_bounds = array<i64: 8, 32>}, {pipeline_mode = #tpu.pipeline_mode<synchronous>, transform_indices = @transform_2, window_bounds = array<i64: 1, 32>}, {pipeline_mode = #tpu.pipeline_mode<synchronous>, transform_indices = @transform_3, window_bounds = array<i64: 1, 32>}, {transform_indices = @transform_4, window_bounds = array<i64: 1, 32, 96>}, {transform_indices = @transform_5, window_bounds = array<i64: 1, 1, 96>}, {transform_indices = @transform_6, window_bounds = array<i64: 1, 32, 32>}, {transform_indices = @transform_7, window_bounds = array<i64: 1, 1, 32>}, {transform_indices = @transform_8, window_bounds = array<i64: 1, 1, 32>}, {transform_indices = @transform_9, window_bounds = array<i64: 1, 1, 32>}, {transform_indices = @transform_10, window_bounds = array<i64: 1, 32, 64>}, {transform_indices = @transform_11, window_bounds = array<i64: 1, 1, 64>}, {transform_indices = @transform_12, window_bounds = array<i64: 1, 64, 32>}, {transform_indices = @transform_13, window_bounds = array<i64: 1, 1, 32>}, {transform_indices = @transform_14, window_bounds = array<i64: 1, 1, 32>}, {transform_indices = @transform_15, window_bounds = array<i64: 1, 1, 32>}, {transform_indices = @transform_16, window_bounds = array<i64: 1, 8, 32>}]} {
    %c0_i32 = arith.constant 0 : i32
    %0 = arith.cmpi eq, %arg1, %c0_i32 : i32
    %1 = arith.extui %0 : i1 to i32
    %c0_i32_0 = arith.constant 0 : i32
    %2 = arith.cmpi ne, %1, %c0_i32_0 : i32
    scf.if %2 {
      %c0_88 = arith.constant 0 : index
      %c0_89 = arith.constant 0 : index
      %c0_90 = arith.constant 0 : index
      %242 = vector.load %arg2[%c0_88, %c0_89, %c0_90] : memref<1x8x32xf32, #tpu.memory_space<vmem>>, vector<1x8x32xf32>
      %243 = vector.shape_cast %242 : vector<1x8x32xf32> to vector<8x32xf32>
      %c0_91 = arith.constant 0 : index
      %c0_92 = arith.constant 0 : index
      %244 = vector.load %arg3[%c0_91, %c0_92] : memref<8x32xf32, #tpu.memory_space<vmem>>, vector<8x32xf32>
      %245 = arith.addf %243, %244 : vector<8x32xf32>
      %c0_93 = arith.constant 0 : index
      %c0_94 = arith.constant 0 : index
      %246 = vector.load %arg19[%c0_93, %c0_94] : memref<8x32xf32, #tpu.memory_space<vmem>>, vector<8x32xf32>
      tpu.vector_store %arg19[%c0_93, %c0_94], %245 {strides = array<i32>} : memref<8x32xf32, #tpu.memory_space<vmem>>, vector<8x32xf32>,
    } else {
    }
    %c0 = arith.constant 0 : index
    %c0_1 = arith.constant 0 : index
    %3 = vector.load %arg19[%c0, %c0_1] : memref<8x32xf32, #tpu.memory_space<vmem>>, vector<8x32xf32>
    %c0_2 = arith.constant 0 : index
    %c0_3 = arith.constant 0 : index
    %c0_4 = arith.constant 0 : index
    %4 = vector.load %arg6[%c0_2, %c0_3, %c0_4] : memref<1x32x96xbf16, #tpu.memory_space<vmem>>, vector<1x32x96xbf16>
    %5 = vector.shape_cast %4 : vector<1x32x96xbf16> to vector<32x96xbf16>
    %6 = arith.truncf %3 : vector<8x32xf32> to vector<8x32xbf16>
    %cst = arith.constant dense<0.000000e+00> : vector<8x96xf32>
    %7 = tpu.matmul %6, %5, %cst {dimension_numbers = #tpu.dot_dimension_numbers<[1], [0], [0], [1], [0, 0, 1, 1], [], []>} : vector<8x32xbf16>, vector<32x96xbf16>, vector<8x96xf32> -> vector<8x96xf32>
    %c0_5 = arith.constant 0 : index
    %c0_6 = arith.constant 0 : index
    %c0_7 = arith.constant 0 : index
    %8 = vector.load %arg7[%c0_5, %c0_6, %c0_7] : memref<1x1x96xf32, #tpu.memory_space<vmem>>, vector<1x1x96xf32>
    %9 = vector.shape_cast %8 : vector<1x1x96xf32> to vector<1x96xf32>
    %10 = vector.broadcast %9 : vector<1x96xf32> to vector<8x96xf32>
    %11 = arith.addf %7, %10 : vector<8x96xf32>
    %12 = vector.extract_strided_slice %11 {offsets = [0, 0], sizes = [8, 32], strides = [1, 1]} : vector<8x96xf32> to vector<8x32xf32>
    %cst_8 = arith.constant 5.000000e-01 : f32
    %13 = vector.broadcast %cst_8 : f32 to vector<8x32xf32>
    %14 = arith.mulf %12, %13 : vector<8x32xf32>
    %15 = vector.extract_strided_slice %11 {offsets = [0, 32], sizes = [8, 32], strides = [1, 1]} : vector<8x96xf32> to vector<8x32xf32>
    %16 = vector.extract_strided_slice %11 {offsets = [0, 64], sizes = [8, 32], strides = [1, 1]} : vector<8x96xf32> to vector<8x32xf32>
    %17 = vector.extract_strided_slice %14 {offsets = [0, 0], sizes = [8, 4], strides = [1, 1]} : vector<8x32xf32> to vector<8x4xf32>
    %18 = vector.extract_strided_slice %15 {offsets = [0, 0], sizes = [8, 4], strides = [1, 1]} : vector<8x32xf32> to vector<8x4xf32>
    %19 = arith.truncf %17 : vector<8x4xf32> to vector<8x4xbf16>
    %20 = arith.truncf %18 : vector<8x4xf32> to vector<8x4xbf16>
    %cst_9 = arith.constant dense<0.000000e+00> : vector<8x8xf32>
    %21 = tpu.matmul %19, %20, %cst_9 {dimension_numbers = #tpu.dot_dimension_numbers<[1], [1], [0], [0], [0, 0, 1, 0], [], []>} : vector<8x4xbf16>, vector<8x4xbf16>, vector<8x8xf32> -> vector<8x8xf32>
    %cst_10 = arith.constant dense<0xFF800000> : vector<8xf32>
    %22 = vector.multi_reduction <maximumf>, %21, %cst_10 [1] : vector<8x8xf32> to vector<8xf32>
    %23 = vector.shape_cast %22 : vector<8xf32> to vector<8x1xf32>
    %24 = vector.broadcast %23 : vector<8x1xf32> to vector<8x8xf32>
    %25 = arith.subf %21, %24 : vector<8x8xf32>
    %26 = math.exp %25 : vector<8x8xf32>
    %cst_11 = arith.constant dense<0.000000e+00> : vector<8xf32>
    %27 = vector.multi_reduction <add>, %26, %cst_11 [1] : vector<8x8xf32> to vector<8xf32>
    %28 = vector.shape_cast %27 : vector<8xf32> to vector<8x1xf32>
    %29 = vector.broadcast %28 : vector<8x1xf32> to vector<8x8xf32>
    %30 = arith.divf %26, %29 : vector<8x8xf32>
    %31 = vector.extract_strided_slice %16 {offsets = [0, 0], sizes = [8, 4], strides = [1, 1]} : vector<8x32xf32> to vector<8x4xf32>
    %32 = arith.truncf %30 : vector<8x8xf32> to vector<8x8xbf16>
    %33 = arith.truncf %31 : vector<8x4xf32> to vector<8x4xbf16>
    %cst_12 = arith.constant dense<0.000000e+00> : vector<8x4xf32>
    %34 = tpu.matmul %32, %33, %cst_12 {dimension_numbers = #tpu.dot_dimension_numbers<[1], [0], [0], [1], [0, 0, 1, 1], [], []>} : vector<8x8xbf16>, vector<8x4xbf16>, vector<8x4xf32> -> vector<8x4xf32>
    %35 = vector.extract_strided_slice %14 {offsets = [0, 4], sizes = [8, 4], strides = [1, 1]} : vector<8x32xf32> to vector<8x4xf32>
    %36 = vector.extract_strided_slice %15 {offsets = [0, 4], sizes = [8, 4], strides = [1, 1]} : vector<8x32xf32> to vector<8x4xf32>
    %37 = arith.truncf %35 : vector<8x4xf32> to vector<8x4xbf16>
    %38 = arith.truncf %36 : vector<8x4xf32> to vector<8x4xbf16>
    %cst_13 = arith.constant dense<0.000000e+00> : vector<8x8xf32>
    %39 = tpu.matmul %37, %38, %cst_13 {dimension_numbers = #tpu.dot_dimension_numbers<[1], [1], [0], [0], [0, 0, 1, 0], [], []>} : vector<8x4xbf16>, vector<8x4xbf16>, vector<8x8xf32> -> vector<8x8xf32>
    %cst_14 = arith.constant dense<0xFF800000> : vector<8xf32>
    %40 = vector.multi_reduction <maximumf>, %39, %cst_14 [1] : vector<8x8xf32> to vector<8xf32>
    %41 = vector.shape_cast %40 : vector<8xf32> to vector<8x1xf32>
    %42 = vector.broadcast %41 : vector<8x1xf32> to vector<8x8xf32>
    %43 = arith.subf %39, %42 : vector<8x8xf32>
    %44 = math.exp %43 : vector<8x8xf32>
    %cst_15 = arith.constant dense<0.000000e+00> : vector<8xf32>
    %45 = vector.multi_reduction <add>, %44, %cst_15 [1] : vector<8x8xf32> to vector<8xf32>
    %46 = vector.shape_cast %45 : vector<8xf32> to vector<8x1xf32>
    %47 = vector.broadcast %46 : vector<8x1xf32> to vector<8x8xf32>
    %48 = arith.divf %44, %47 : vector<8x8xf32>
    %49 = vector.extract_strided_slice %16 {offsets = [0, 4], sizes = [8, 4], strides = [1, 1]} : vector<8x32xf32> to vector<8x4xf32>
    %50 = arith.truncf %48 : vector<8x8xf32> to vector<8x8xbf16>
    %51 = arith.truncf %49 : vector<8x4xf32> to vector<8x4xbf16>
    %cst_16 = arith.constant dense<0.000000e+00> : vector<8x4xf32>
    %52 = tpu.matmul %50, %51, %cst_16 {dimension_numbers = #tpu.dot_dimension_numbers<[1], [0], [0], [1], [0, 0, 1, 1], [], []>} : vector<8x8xbf16>, vector<8x4xbf16>, vector<8x4xf32> -> vector<8x4xf32>
    %53 = vector.extract_strided_slice %14 {offsets = [0, 8], sizes = [8, 4], strides = [1, 1]} : vector<8x32xf32> to vector<8x4xf32>
    %54 = vector.extract_strided_slice %15 {offsets = [0, 8], sizes = [8, 4], strides = [1, 1]} : vector<8x32xf32> to vector<8x4xf32>
    %55 = arith.truncf %53 : vector<8x4xf32> to vector<8x4xbf16>
    %56 = arith.truncf %54 : vector<8x4xf32> to vector<8x4xbf16>
    %cst_17 = arith.constant dense<0.000000e+00> : vector<8x8xf32>
    %57 = tpu.matmul %55, %56, %cst_17 {dimension_numbers = #tpu.dot_dimension_numbers<[1], [1], [0], [0], [0, 0, 1, 0], [], []>} : vector<8x4xbf16>, vector<8x4xbf16>, vector<8x8xf32> -> vector<8x8xf32>
    %cst_18 = arith.constant dense<0xFF800000> : vector<8xf32>
    %58 = vector.multi_reduction <maximumf>, %57, %cst_18 [1] : vector<8x8xf32> to vector<8xf32>
    %59 = vector.shape_cast %58 : vector<8xf32> to vector<8x1xf32>
    %60 = vector.broadcast %59 : vector<8x1xf32> to vector<8x8xf32>
    %61 = arith.subf %57, %60 : vector<8x8xf32>
    %62 = math.exp %61 : vector<8x8xf32>
    %cst_19 = arith.constant dense<0.000000e+00> : vector<8xf32>
    %63 = vector.multi_reduction <add>, %62, %cst_19 [1] : vector<8x8xf32> to vector<8xf32>
    %64 = vector.shape_cast %63 : vector<8xf32> to vector<8x1xf32>
    %65 = vector.broadcast %64 : vector<8x1xf32> to vector<8x8xf32>
    %66 = arith.divf %62, %65 : vector<8x8xf32>
    %67 = vector.extract_strided_slice %16 {offsets = [0, 8], sizes = [8, 4], strides = [1, 1]} : vector<8x32xf32> to vector<8x4xf32>
    %68 = arith.truncf %66 : vector<8x8xf32> to vector<8x8xbf16>
    %69 = arith.truncf %67 : vector<8x4xf32> to vector<8x4xbf16>
    %cst_20 = arith.constant dense<0.000000e+00> : vector<8x4xf32>
    %70 = tpu.matmul %68, %69, %cst_20 {dimension_numbers = #tpu.dot_dimension_numbers<[1], [0], [0], [1], [0, 0, 1, 1], [], []>} : vector<8x8xbf16>, vector<8x4xbf16>, vector<8x4xf32> -> vector<8x4xf32>
    %71 = vector.extract_strided_slice %14 {offsets = [0, 12], sizes = [8, 4], strides = [1, 1]} : vector<8x32xf32> to vector<8x4xf32>
    %72 = vector.extract_strided_slice %15 {offsets = [0, 12], sizes = [8, 4], strides = [1, 1]} : vector<8x32xf32> to vector<8x4xf32>
    %73 = arith.truncf %71 : vector<8x4xf32> to vector<8x4xbf16>
    %74 = arith.truncf %72 : vector<8x4xf32> to vector<8x4xbf16>
    %cst_21 = arith.constant dense<0.000000e+00> : vector<8x8xf32>
    %75 = tpu.matmul %73, %74, %cst_21 {dimension_numbers = #tpu.dot_dimension_numbers<[1], [1], [0], [0], [0, 0, 1, 0], [], []>} : vector<8x4xbf16>, vector<8x4xbf16>, vector<8x8xf32> -> vector<8x8xf32>
    %cst_22 = arith.constant dense<0xFF800000> : vector<8xf32>
    %76 = vector.multi_reduction <maximumf>, %75, %cst_22 [1] : vector<8x8xf32> to vector<8xf32>
    %77 = vector.shape_cast %76 : vector<8xf32> to vector<8x1xf32>
    %78 = vector.broadcast %77 : vector<8x1xf32> to vector<8x8xf32>
    %79 = arith.subf %75, %78 : vector<8x8xf32>
    %80 = math.exp %79 : vector<8x8xf32>
    %cst_23 = arith.constant dense<0.000000e+00> : vector<8xf32>
    %81 = vector.multi_reduction <add>, %80, %cst_23 [1] : vector<8x8xf32> to vector<8xf32>
    %82 = vector.shape_cast %81 : vector<8xf32> to vector<8x1xf32>
    %83 = vector.broadcast %82 : vector<8x1xf32> to vector<8x8xf32>
    %84 = arith.divf %80, %83 : vector<8x8xf32>
    %85 = vector.extract_strided_slice %16 {offsets = [0, 12], sizes = [8, 4], strides = [1, 1]} : vector<8x32xf32> to vector<8x4xf32>
    %86 = arith.truncf %84 : vector<8x8xf32> to vector<8x8xbf16>
    %87 = arith.truncf %85 : vector<8x4xf32> to vector<8x4xbf16>
    %cst_24 = arith.constant dense<0.000000e+00> : vector<8x4xf32>
    %88 = tpu.matmul %86, %87, %cst_24 {dimension_numbers = #tpu.dot_dimension_numbers<[1], [0], [0], [1], [0, 0, 1, 1], [], []>} : vector<8x8xbf16>, vector<8x4xbf16>, vector<8x4xf32> -> vector<8x4xf32>
    %89 = vector.extract_strided_slice %14 {offsets = [0, 16], sizes = [8, 4], strides = [1, 1]} : vector<8x32xf32> to vector<8x4xf32>
    %90 = vector.extract_strided_slice %15 {offsets = [0, 16], sizes = [8, 4], strides = [1, 1]} : vector<8x32xf32> to vector<8x4xf32>
    %91 = arith.truncf %89 : vector<8x4xf32> to vector<8x4xbf16>
    %92 = arith.truncf %90 : vector<8x4xf32> to vector<8x4xbf16>
    %cst_25 = arith.constant dense<0.000000e+00> : vector<8x8xf32>
    %93 = tpu.matmul %91, %92, %cst_25 {dimension_numbers = #tpu.dot_dimension_numbers<[1], [1], [0], [0], [0, 0, 1, 0], [], []>} : vector<8x4xbf16>, vector<8x4xbf16>, vector<8x8xf32> -> vector<8x8xf32>
    %cst_26 = arith.constant dense<0xFF800000> : vector<8xf32>
    %94 = vector.multi_reduction <maximumf>, %93, %cst_26 [1] : vector<8x8xf32> to vector<8xf32>
    %95 = vector.shape_cast %94 : vector<8xf32> to vector<8x1xf32>
    %96 = vector.broadcast %95 : vector<8x1xf32> to vector<8x8xf32>
    %97 = arith.subf %93, %96 : vector<8x8xf32>
    %98 = math.exp %97 : vector<8x8xf32>
    %cst_27 = arith.constant dense<0.000000e+00> : vector<8xf32>
    %99 = vector.multi_reduction <add>, %98, %cst_27 [1] : vector<8x8xf32> to vector<8xf32>
    %100 = vector.shape_cast %99 : vector<8xf32> to vector<8x1xf32>
    %101 = vector.broadcast %100 : vector<8x1xf32> to vector<8x8xf32>
    %102 = arith.divf %98, %101 : vector<8x8xf32>
    %103 = vector.extract_strided_slice %16 {offsets = [0, 16], sizes = [8, 4], strides = [1, 1]} : vector<8x32xf32> to vector<8x4xf32>
    %104 = arith.truncf %102 : vector<8x8xf32> to vector<8x8xbf16>
    %105 = arith.truncf %103 : vector<8x4xf32> to vector<8x4xbf16>
    %cst_28 = arith.constant dense<0.000000e+00> : vector<8x4xf32>
    %106 = tpu.matmul %104, %105, %cst_28 {dimension_numbers = #tpu.dot_dimension_numbers<[1], [0], [0], [1], [0, 0, 1, 1], [], []>} : vector<8x8xbf16>, vector<8x4xbf16>, vector<8x4xf32> -> vector<8x4xf32>
    %107 = vector.extract_strided_slice %14 {offsets = [0, 20], sizes = [8, 4], strides = [1, 1]} : vector<8x32xf32> to vector<8x4xf32>
    %108 = vector.extract_strided_slice %15 {offsets = [0, 20], sizes = [8, 4], strides = [1, 1]} : vector<8x32xf32> to vector<8x4xf32>
    %109 = arith.truncf %107 : vector<8x4xf32> to vector<8x4xbf16>
    %110 = arith.truncf %108 : vector<8x4xf32> to vector<8x4xbf16>
    %cst_29 = arith.constant dense<0.000000e+00> : vector<8x8xf32>
    %111 = tpu.matmul %109, %110, %cst_29 {dimension_numbers = #tpu.dot_dimension_numbers<[1], [1], [0], [0], [0, 0, 1, 0], [], []>} : vector<8x4xbf16>, vector<8x4xbf16>, vector<8x8xf32> -> vector<8x8xf32>
    %cst_30 = arith.constant dense<0xFF800000> : vector<8xf32>
    %112 = vector.multi_reduction <maximumf>, %111, %cst_30 [1] : vector<8x8xf32> to vector<8xf32>
    %113 = vector.shape_cast %112 : vector<8xf32> to vector<8x1xf32>
    %114 = vector.broadcast %113 : vector<8x1xf32> to vector<8x8xf32>
    %115 = arith.subf %111, %114 : vector<8x8xf32>
    %116 = math.exp %115 : vector<8x8xf32>
    %cst_31 = arith.constant dense<0.000000e+00> : vector<8xf32>
    %117 = vector.multi_reduction <add>, %116, %cst_31 [1] : vector<8x8xf32> to vector<8xf32>
    %118 = vector.shape_cast %117 : vector<8xf32> to vector<8x1xf32>
    %119 = vector.broadcast %118 : vector<8x1xf32> to vector<8x8xf32>
    %120 = arith.divf %116, %119 : vector<8x8xf32>
    %121 = vector.extract_strided_slice %16 {offsets = [0, 20], sizes = [8, 4], strides = [1, 1]} : vector<8x32xf32> to vector<8x4xf32>
    %122 = arith.truncf %120 : vector<8x8xf32> to vector<8x8xbf16>
    %123 = arith.truncf %121 : vector<8x4xf32> to vector<8x4xbf16>
    %cst_32 = arith.constant dense<0.000000e+00> : vector<8x4xf32>
    %124 = tpu.matmul %122, %123, %cst_32 {dimension_numbers = #tpu.dot_dimension_numbers<[1], [0], [0], [1], [0, 0, 1, 1], [], []>} : vector<8x8xbf16>, vector<8x4xbf16>, vector<8x4xf32> -> vector<8x4xf32>
    %125 = vector.extract_strided_slice %14 {offsets = [0, 24], sizes = [8, 4], strides = [1, 1]} : vector<8x32xf32> to vector<8x4xf32>
    %126 = vector.extract_strided_slice %15 {offsets = [0, 24], sizes = [8, 4], strides = [1, 1]} : vector<8x32xf32> to vector<8x4xf32>
    %127 = arith.truncf %125 : vector<8x4xf32> to vector<8x4xbf16>
    %128 = arith.truncf %126 : vector<8x4xf32> to vector<8x4xbf16>
    %cst_33 = arith.constant dense<0.000000e+00> : vector<8x8xf32>
    %129 = tpu.matmul %127, %128, %cst_33 {dimension_numbers = #tpu.dot_dimension_numbers<[1], [1], [0], [0], [0, 0, 1, 0], [], []>} : vector<8x4xbf16>, vector<8x4xbf16>, vector<8x8xf32> -> vector<8x8xf32>
    %cst_34 = arith.constant dense<0xFF800000> : vector<8xf32>
    %130 = vector.multi_reduction <maximumf>, %129, %cst_34 [1] : vector<8x8xf32> to vector<8xf32>
    %131 = vector.shape_cast %130 : vector<8xf32> to vector<8x1xf32>
    %132 = vector.broadcast %131 : vector<8x1xf32> to vector<8x8xf32>
    %133 = arith.subf %129, %132 : vector<8x8xf32>
    %134 = math.exp %133 : vector<8x8xf32>
    %cst_35 = arith.constant dense<0.000000e+00> : vector<8xf32>
    %135 = vector.multi_reduction <add>, %134, %cst_35 [1] : vector<8x8xf32> to vector<8xf32>
    %136 = vector.shape_cast %135 : vector<8xf32> to vector<8x1xf32>
    %137 = vector.broadcast %136 : vector<8x1xf32> to vector<8x8xf32>
    %138 = arith.divf %134, %137 : vector<8x8xf32>
    %139 = vector.extract_strided_slice %16 {offsets = [0, 24], sizes = [8, 4], strides = [1, 1]} : vector<8x32xf32> to vector<8x4xf32>
    %140 = arith.truncf %138 : vector<8x8xf32> to vector<8x8xbf16>
    %141 = arith.truncf %139 : vector<8x4xf32> to vector<8x4xbf16>
    %cst_36 = arith.constant dense<0.000000e+00> : vector<8x4xf32>
    %142 = tpu.matmul %140, %141, %cst_36 {dimension_numbers = #tpu.dot_dimension_numbers<[1], [0], [0], [1], [0, 0, 1, 1], [], []>} : vector<8x8xbf16>, vector<8x4xbf16>, vector<8x4xf32> -> vector<8x4xf32>
    %143 = vector.extract_strided_slice %14 {offsets = [0, 28], sizes = [8, 4], strides = [1, 1]} : vector<8x32xf32> to vector<8x4xf32>
    %144 = vector.extract_strided_slice %15 {offsets = [0, 28], sizes = [8, 4], strides = [1, 1]} : vector<8x32xf32> to vector<8x4xf32>
    %145 = arith.truncf %143 : vector<8x4xf32> to vector<8x4xbf16>
    %146 = arith.truncf %144 : vector<8x4xf32> to vector<8x4xbf16>
    %cst_37 = arith.constant dense<0.000000e+00> : vector<8x8xf32>
    %147 = tpu.matmul %145, %146, %cst_37 {dimension_numbers = #tpu.dot_dimension_numbers<[1], [1], [0], [0], [0, 0, 1, 0], [], []>} : vector<8x4xbf16>, vector<8x4xbf16>, vector<8x8xf32> -> vector<8x8xf32>
    %cst_38 = arith.constant dense<0xFF800000> : vector<8xf32>
    %148 = vector.multi_reduction <maximumf>, %147, %cst_38 [1] : vector<8x8xf32> to vector<8xf32>
    %149 = vector.shape_cast %148 : vector<8xf32> to vector<8x1xf32>
    %150 = vector.broadcast %149 : vector<8x1xf32> to vector<8x8xf32>
    %151 = arith.subf %147, %150 : vector<8x8xf32>
    %152 = math.exp %151 : vector<8x8xf32>
    %cst_39 = arith.constant dense<0.000000e+00> : vector<8xf32>
    %153 = vector.multi_reduction <add>, %152, %cst_39 [1] : vector<8x8xf32> to vector<8xf32>
    %154 = vector.shape_cast %153 : vector<8xf32> to vector<8x1xf32>
    %155 = vector.broadcast %154 : vector<8x1xf32> to vector<8x8xf32>
    %156 = arith.divf %152, %155 : vector<8x8xf32>
    %157 = vector.extract_strided_slice %16 {offsets = [0, 28], sizes = [8, 4], strides = [1, 1]} : vector<8x32xf32> to vector<8x4xf32>
    %158 = arith.truncf %156 : vector<8x8xf32> to vector<8x8xbf16>
    %159 = arith.truncf %157 : vector<8x4xf32> to vector<8x4xbf16>
    %cst_40 = arith.constant dense<0.000000e+00> : vector<8x4xf32>
    %160 = tpu.matmul %158, %159, %cst_40 {dimension_numbers = #tpu.dot_dimension_numbers<[1], [0], [0], [1], [0, 0, 1, 1], [], []>} : vector<8x8xbf16>, vector<8x4xbf16>, vector<8x4xf32> -> vector<8x4xf32>
    %161 = tpu.concatenate %34, %52, %70, %88, %106, %124, %142, %160 in 1 : vector<8x4xf32>, vector<8x4xf32>, vector<8x4xf32>, vector<8x4xf32>, vector<8x4xf32>, vector<8x4xf32>, vector<8x4xf32>, vector<8x4xf32> -> vector<8x32xf32>
    %c0_41 = arith.constant 0 : index
    %c0_42 = arith.constant 0 : index
    %c0_43 = arith.constant 0 : index
    %162 = vector.load %arg8[%c0_41, %c0_42, %c0_43] : memref<1x32x32xbf16, #tpu.memory_space<vmem>>, vector<1x32x32xbf16>
    %163 = vector.shape_cast %162 : vector<1x32x32xbf16> to vector<32x32xbf16>
    %164 = arith.truncf %161 : vector<8x32xf32> to vector<8x32xbf16>
    %cst_44 = arith.constant dense<0.000000e+00> : vector<8x32xf32>
    %165 = tpu.matmul %164, %163, %cst_44 {dimension_numbers = #tpu.dot_dimension_numbers<[1], [0], [0], [1], [0, 0, 1, 1], [], []>} : vector<8x32xbf16>, vector<32x32xbf16>, vector<8x32xf32> -> vector<8x32xf32>
    %c0_45 = arith.constant 0 : index
    %c0_46 = arith.constant 0 : index
    %c0_47 = arith.constant 0 : index
    %166 = vector.load %arg9[%c0_45, %c0_46, %c0_47] : memref<1x1x32xf32, #tpu.memory_space<vmem>>, vector<1x1x32xf32>
    %167 = vector.shape_cast %166 : vector<1x1x32xf32> to vector<1x32xf32>
    %168 = vector.broadcast %167 : vector<1x32xf32> to vector<8x32xf32>
    %169 = arith.addf %165, %168 : vector<8x32xf32>
    %170 = arith.addf %3, %169 : vector<8x32xf32>
    %c0_48 = arith.constant 0 : index
    %c0_49 = arith.constant 0 : index
    %c0_50 = arith.constant 0 : index
    %171 = vector.load %arg10[%c0_48, %c0_49, %c0_50] : memref<1x1x32xf32, #tpu.memory_space<vmem>>, vector<1x1x32xf32>
    %172 = vector.shape_cast %171 : vector<1x1x32xf32> to vector<1x32xf32>
    %c0_51 = arith.constant 0 : index
    %c0_52 = arith.constant 0 : index
    %c0_53 = arith.constant 0 : index
    %173 = vector.load %arg11[%c0_51, %c0_52, %c0_53] : memref<1x1x32xf32, #tpu.memory_space<vmem>>, vector<1x1x32xf32>
    %174 = vector.shape_cast %173 : vector<1x1x32xf32> to vector<1x32xf32>
    %cst_54 = arith.constant dense<0.000000e+00> : vector<8xf32>
    %175 = vector.multi_reduction <add>, %170, %cst_54 [1] : vector<8x32xf32> to vector<8xf32>
    %176 = vector.shape_cast %175 : vector<8xf32> to vector<8x1xf32>
    %cst_55 = arith.constant 3.200000e+01 : f32
    %177 = vector.broadcast %cst_55 : f32 to vector<8x1xf32>
    %178 = arith.divf %176, %177 : vector<8x1xf32>
    %179 = vector.broadcast %178 : vector<8x1xf32> to vector<8x32xf32>
    %180 = arith.subf %170, %179 : vector<8x32xf32>
    %181 = arith.mulf %180, %180 : vector<8x32xf32>
    %cst_56 = arith.constant dense<0.000000e+00> : vector<8xf32>
    %182 = vector.multi_reduction <add>, %181, %cst_56 [1] : vector<8x32xf32> to vector<8xf32>
    %183 = vector.shape_cast %182 : vector<8xf32> to vector<8x1xf32>
    %cst_57 = arith.constant 3.200000e+01 : f32
    %184 = vector.broadcast %cst_57 : f32 to vector<8x1xf32>
    %185 = arith.divf %183, %184 : vector<8x1xf32>
    %cst_58 = arith.constant 9.99999974E-6 : f32
    %186 = vector.broadcast %cst_58 : f32 to vector<8x1xf32>
    %187 = arith.addf %185, %186 : vector<8x1xf32>
    %188 = math.rsqrt %187 : vector<8x1xf32>
    %189 = vector.broadcast %188 : vector<8x1xf32> to vector<8x32xf32>
    %190 = arith.mulf %180, %189 : vector<8x32xf32>
    %191 = vector.broadcast %172 : vector<1x32xf32> to vector<8x32xf32>
    %192 = arith.mulf %190, %191 : vector<8x32xf32>
    %193 = vector.broadcast %174 : vector<1x32xf32> to vector<8x32xf32>
    %194 = arith.addf %192, %193 : vector<8x32xf32>
    %c0_59 = arith.constant 0 : index
    %c0_60 = arith.constant 0 : index
    %c0_61 = arith.constant 0 : index
    %195 = vector.load %arg12[%c0_59, %c0_60, %c0_61] : memref<1x32x64xbf16, #tpu.memory_space<vmem>>, vector<1x32x64xbf16>
    %196 = vector.shape_cast %195 : vector<1x32x64xbf16> to vector<32x64xbf16>
    %197 = arith.truncf %194 : vector<8x32xf32> to vector<8x32xbf16>
    %cst_62 = arith.constant dense<0.000000e+00> : vector<8x64xf32>
    %198 = tpu.matmul %197, %196, %cst_62 {dimension_numbers = #tpu.dot_dimension_numbers<[1], [0], [0], [1], [0, 0, 1, 1], [], []>} : vector<8x32xbf16>, vector<32x64xbf16>, vector<8x64xf32> -> vector<8x64xf32>
    %c0_63 = arith.constant 0 : index
    %c0_64 = arith.constant 0 : index
    %c0_65 = arith.constant 0 : index
    %199 = vector.load %arg13[%c0_63, %c0_64, %c0_65] : memref<1x1x64xf32, #tpu.memory_space<vmem>>, vector<1x1x64xf32>
    %200 = vector.shape_cast %199 : vector<1x1x64xf32> to vector<1x64xf32>
    %201 = vector.broadcast %200 : vector<1x64xf32> to vector<8x64xf32>
    %202 = arith.addf %198, %201 : vector<8x64xf32>
    %cst_66 = arith.constant 0.000000e+00 : f32
    %203 = vector.broadcast %cst_66 : f32 to vector<8x64xf32>
    %204 = arith.maximumf %202, %203 : vector<8x64xf32>
    %c0_67 = arith.constant 0 : index
    %c0_68 = arith.constant 0 : index
    %c0_69 = arith.constant 0 : index
    %205 = vector.load %arg14[%c0_67, %c0_68, %c0_69] : memref<1x64x32xbf16, #tpu.memory_space<vmem>>, vector<1x64x32xbf16>
    %206 = vector.shape_cast %205 : vector<1x64x32xbf16> to vector<64x32xbf16>
    %207 = arith.truncf %204 : vector<8x64xf32> to vector<8x64xbf16>
    %cst_70 = arith.constant dense<0.000000e+00> : vector<8x32xf32>
    %208 = tpu.matmul %207, %206, %cst_70 {dimension_numbers = #tpu.dot_dimension_numbers<[1], [0], [0], [1], [0, 0, 1, 1], [], []>} : vector<8x64xbf16>, vector<64x32xbf16>, vector<8x32xf32> -> vector<8x32xf32>
    %c0_71 = arith.constant 0 : index
    %c0_72 = arith.constant 0 : index
    %c0_73 = arith.constant 0 : index
    %209 = vector.load %arg15[%c0_71, %c0_72, %c0_73] : memref<1x1x32xf32, #tpu.memory_space<vmem>>, vector<1x1x32xf32>
    %210 = vector.shape_cast %209 : vector<1x1x32xf32> to vector<1x32xf32>
    %211 = vector.broadcast %210 : vector<1x32xf32> to vector<8x32xf32>
    %212 = arith.addf %208, %211 : vector<8x32xf32>
    %213 = arith.addf %194, %212 : vector<8x32xf32>
    %c0_74 = arith.constant 0 : index
    %c0_75 = arith.constant 0 : index
    %c0_76 = arith.constant 0 : index
    %214 = vector.load %arg16[%c0_74, %c0_75, %c0_76] : memref<1x1x32xf32, #tpu.memory_space<vmem>>, vector<1x1x32xf32>
    %215 = vector.shape_cast %214 : vector<1x1x32xf32> to vector<1x32xf32>
    %c0_77 = arith.constant 0 : index
    %c0_78 = arith.constant 0 : index
    %c0_79 = arith.constant 0 : index
    %216 = vector.load %arg17[%c0_77, %c0_78, %c0_79] : memref<1x1x32xf32, #tpu.memory_space<vmem>>, vector<1x1x32xf32>
    %217 = vector.shape_cast %216 : vector<1x1x32xf32> to vector<1x32xf32>
    %cst_80 = arith.constant dense<0.000000e+00> : vector<8xf32>
    %218 = vector.multi_reduction <add>, %213, %cst_80 [1] : vector<8x32xf32> to vector<8xf32>
    %219 = vector.shape_cast %218 : vector<8xf32> to vector<8x1xf32>
    %cst_81 = arith.constant 3.200000e+01 : f32
    %220 = vector.broadcast %cst_81 : f32 to vector<8x1xf32>
    %221 = arith.divf %219, %220 : vector<8x1xf32>
    %222 = vector.broadcast %221 : vector<8x1xf32> to vector<8x32xf32>
    %223 = arith.subf %213, %222 : vector<8x32xf32>
    %224 = arith.mulf %223, %223 : vector<8x32xf32>
    %cst_82 = arith.constant dense<0.000000e+00> : vector<8xf32>
    %225 = vector.multi_reduction <add>, %224, %cst_82 [1] : vector<8x32xf32> to vector<8xf32>
    %226 = vector.shape_cast %225 : vector<8xf32> to vector<8x1xf32>
    %cst_83 = arith.constant 3.200000e+01 : f32
    %227 = vector.broadcast %cst_83 : f32 to vector<8x1xf32>
    %228 = arith.divf %226, %227 : vector<8x1xf32>
    %cst_84 = arith.constant 9.99999974E-6 : f32
    %229 = vector.broadcast %cst_84 : f32 to vector<8x1xf32>
    %230 = arith.addf %228, %229 : vector<8x1xf32>
    %231 = math.rsqrt %230 : vector<8x1xf32>
    %232 = vector.broadcast %231 : vector<8x1xf32> to vector<8x32xf32>
    %233 = arith.mulf %223, %232 : vector<8x32xf32>
    %234 = vector.broadcast %215 : vector<1x32xf32> to vector<8x32xf32>
    %235 = arith.mulf %233, %234 : vector<8x32xf32>
    %236 = vector.broadcast %217 : vector<1x32xf32> to vector<8x32xf32>
    %237 = arith.addf %235, %236 : vector<8x32xf32>
    %c0_85 = arith.constant 0 : index
    %c0_86 = arith.constant 0 : index
    %238 = vector.load %arg19[%c0_85, %c0_86] : memref<8x32xf32, #tpu.memory_space<vmem>>, vector<8x32xf32>
    tpu.vector_store %arg19[%c0_85, %c0_86], %237 {strides = array<i32>} : memref<8x32xf32, #tpu.memory_space<vmem>>, vector<8x32xf32>,
    %c5_i32 = arith.constant 5 : i32
    %239 = arith.cmpi eq, %arg1, %c5_i32 : i32
    %240 = arith.extui %239 : i1 to i32
    %c0_i32_87 = arith.constant 0 : i32
    %241 = arith.cmpi ne, %240, %c0_i32_87 : i32
    scf.if %241 {
      %c0_88 = arith.constant 0 : index
      %c0_89 = arith.constant 0 : index
      %242 = vector.load %arg4[%c0_88, %c0_89] : memref<1x32xf32, #tpu.memory_space<vmem>>, vector<1x32xf32>
      %c0_90 = arith.constant 0 : index
      %c0_91 = arith.constant 0 : index
      %243 = vector.load %arg5[%c0_90, %c0_91] : memref<1x32xf32, #tpu.memory_space<vmem>>, vector<1x32xf32>
      %cst_92 = arith.constant dense<0.000000e+00> : vector<8xf32>
      %244 = vector.multi_reduction <add>, %237, %cst_92 [1] : vector<8x32xf32> to vector<8xf32>
      %245 = vector.shape_cast %244 : vector<8xf32> to vector<8x1xf32>
      %cst_93 = arith.constant 3.200000e+01 : f32
      %246 = vector.broadcast %cst_93 : f32 to vector<8x1xf32>
      %247 = arith.divf %245, %246 : vector<8x1xf32>
      %248 = vector.broadcast %247 : vector<8x1xf32> to vector<8x32xf32>
      %249 = arith.subf %237, %248 : vector<8x32xf32>
      %250 = arith.mulf %249, %249 : vector<8x32xf32>
      %cst_94 = arith.constant dense<0.000000e+00> : vector<8xf32>
      %251 = vector.multi_reduction <add>, %250, %cst_94 [1] : vector<8x32xf32> to vector<8xf32>
      %252 = vector.shape_cast %251 : vector<8xf32> to vector<8x1xf32>
      %cst_95 = arith.constant 3.200000e+01 : f32
      %253 = vector.broadcast %cst_95 : f32 to vector<8x1xf32>
      %254 = arith.divf %252, %253 : vector<8x1xf32>
      %cst_96 = arith.constant 9.99999974E-6 : f32
      %255 = vector.broadcast %cst_96 : f32 to vector<8x1xf32>
      %256 = arith.addf %254, %255 : vector<8x1xf32>
      %257 = math.rsqrt %256 : vector<8x1xf32>
      %258 = vector.broadcast %257 : vector<8x1xf32> to vector<8x32xf32>
      %259 = arith.mulf %249, %258 : vector<8x32xf32>
      %260 = vector.broadcast %242 : vector<1x32xf32> to vector<8x32xf32>
      %261 = arith.mulf %259, %260 : vector<8x32xf32>
      %262 = vector.broadcast %243 : vector<1x32xf32> to vector<8x32xf32>
      %263 = arith.addf %261, %262 : vector<8x32xf32>
      %c0_97 = arith.constant 0 : index
      %c0_98 = arith.constant 0 : index
      %c0_99 = arith.constant 0 : index
      %264 = vector.load %arg18[%c0_97, %c0_98, %c0_99] : memref<1x8x32xf32, #tpu.memory_space<vmem>>, vector<1x8x32xf32>
      %265 = vector.shape_cast %264 : vector<1x8x32xf32> to vector<8x32xf32>
      %266 = vector.shape_cast %263 : vector<8x32xf32> to vector<1x8x32xf32>
      tpu.vector_store %arg18[%c0_97, %c0_98, %c0_99], %266 {strides = array<i32>} : memref<1x8x32xf32, #tpu.memory_space<vmem>>, vector<1x8x32xf32>,
    } else {
    }
    return
  }
  func.func @transform_0(%arg0: i32, %arg1: i32) -> (i32, i32, i32) {
    %c0_i32 = arith.constant 0 : i32
    %c0_i32_0 = arith.constant 0 : i32
    %c0_i32_1 = arith.constant 0 : i32
    return %arg0, %c0_i32, %c0_i32_0 : i32, i32, i32
  }
  func.func @transform_1(%arg0: i32, %arg1: i32) -> (i32, i32) {
    %c0_i32 = arith.constant 0 : i32
    %c0_i32_0 = arith.constant 0 : i32
    %c0_i32_1 = arith.constant 0 : i32
    return %c0_i32, %c0_i32_0 : i32, i32
  }
  func.func @transform_2(%arg0: i32, %arg1: i32) -> (i32, i32) {
    %c0_i32 = arith.constant 0 : i32
    %c0_i32_0 = arith.constant 0 : i32
    %c0_i32_1 = arith.constant 0 : i32
    return %c0_i32, %c0_i32_0 : i32, i32
  }
  func.func @transform_3(%arg0: i32, %arg1: i32) -> (i32, i32) {
    %c0_i32 = arith.constant 0 : i32
    %c0_i32_0 = arith.constant 0 : i32
    %c0_i32_1 = arith.constant 0 : i32
    return %c0_i32, %c0_i32_0 : i32, i32
  }
  func.func @transform_4(%arg0: i32, %arg1: i32) -> (i32, i32, i32) {
    %c0_i32 = arith.constant 0 : i32
    %c0_i32_0 = arith.constant 0 : i32
    %c0_i32_1 = arith.constant 0 : i32
    return %arg1, %c0_i32, %c0_i32_0 : i32, i32, i32
  }
  func.func @transform_5(%arg0: i32, %arg1: i32) -> (i32, i32, i32) {
    %c0_i32 = arith.constant 0 : i32
    %c0_i32_0 = arith.constant 0 : i32
    %c0_i32_1 = arith.constant 0 : i32
    return %arg1, %c0_i32, %c0_i32_0 : i32, i32, i32
  }
  func.func @transform_6(%arg0: i32, %arg1: i32) -> (i32, i32, i32) {
    %c0_i32 = arith.constant 0 : i32
    %c0_i32_0 = arith.constant 0 : i32
    %c0_i32_1 = arith.constant 0 : i32
    return %arg1, %c0_i32, %c0_i32_0 : i32, i32, i32
  }
  func.func @transform_7(%arg0: i32, %arg1: i32) -> (i32, i32, i32) {
    %c0_i32 = arith.constant 0 : i32
    %c0_i32_0 = arith.constant 0 : i32
    %c0_i32_1 = arith.constant 0 : i32
    return %arg1, %c0_i32, %c0_i32_0 : i32, i32, i32
  }
  func.func @transform_8(%arg0: i32, %arg1: i32) -> (i32, i32, i32) {
    %c0_i32 = arith.constant 0 : i32
    %c0_i32_0 = arith.constant 0 : i32
    %c0_i32_1 = arith.constant 0 : i32
    return %arg1, %c0_i32, %c0_i32_0 : i32, i32, i32
  }
  func.func @transform_9(%arg0: i32, %arg1: i32) -> (i32, i32, i32) {
    %c0_i32 = arith.constant 0 : i32
    %c0_i32_0 = arith.constant 0 : i32
    %c0_i32_1 = arith.constant 0 : i32
    return %arg1, %c0_i32, %c0_i32_0 : i32, i32, i32
  }
  func.func @transform_10(%arg0: i32, %arg1: i32) -> (i32, i32, i32) {
    %c0_i32 = arith.constant 0 : i32
    %c0_i32_0 = arith.constant 0 : i32
    %c0_i32_1 = arith.constant 0 : i32
    return %arg1, %c0_i32, %c0_i32_0 : i32, i32, i32
  }
  func.func @transform_11(%arg0: i32, %arg1: i32) -> (i32, i32, i32) {
    %c0_i32 = arith.constant 0 : i32
    %c0_i32_0 = arith.constant 0 : i32
    %c0_i32_1 = arith.constant 0 : i32
    return %arg1, %c0_i32, %c0_i32_0 : i32, i32, i32
  }
  func.func @transform_12(%arg0: i32, %arg1: i32) -> (i32, i32, i32) {
    %c0_i32 = arith.constant 0 : i32
    %c0_i32_0 = arith.constant 0 : i32
    %c0_i32_1 = arith.constant 0 : i32
    return %arg1, %c0_i32, %c0_i32_0 : i32, i32, i32
  }
  func.func @transform_13(%arg0: i32, %arg1: i32) -> (i32, i32, i32) {
    %c0_i32 = arith.constant 0 : i32
    %c0_i32_0 = arith.constant 0 : i32
    %c0_i32_1 = arith.constant 0 : i32
    return %arg1, %c0_i32, %c0_i32_0 : i32, i32, i32
  }
  func.func @transform_14(%arg0: i32, %arg1: i32) -> (i32, i32, i32) {
    %c0_i32 = arith.constant 0 : i32
    %c0_i32_0 = arith.constant 0 : i32
    %c0_i32_1 = arith.constant 0 : i32
    return %arg1, %c0_i32, %c0_i32_0 : i32, i32, i32
  }
  func.func @transform_15(%arg0: i32, %arg1: i32) -> (i32, i32, i32) {
    %c0_i32 = arith.constant 0 : i32
    %c0_i32_0 = arith.constant 0 : i32
    %c0_i32_1 = arith.constant 0 : i32
    return %arg1, %c0_i32, %c0_i32_0 : i32, i32, i32
  }
  func.func @transform_16(%arg0: i32, %arg1: i32) -> (i32, i32, i32) {
    %c0_i32 = arith.constant 0 : i32
    %c0_i32_0 = arith.constant 0 : i32
    %c0_i32_1 = arith.constant 0 : i32
    return %arg0, %c0_i32, %c0_i32_0 : i32, i32, i32
  }
}

module attributes {stable_mosaic.version = 11 : i64} {
  func.func @_decoder_stack_kernel(%arg0: i32, %arg1: i32, %arg2: memref<1x8x32xf32, #tpu.memory_space<vmem>>, %arg3: memref<1x32xf32, #tpu.memory_space<vmem>>, %arg4: memref<1x32xf32, #tpu.memory_space<vmem>>, %arg5: memref<32x16xbf16, #tpu.memory_space<vmem>>, %arg6: memref<1x16xf32, #tpu.memory_space<vmem>>, %arg7: memref<1x16xf32, #tpu.memory_space<vmem>>, %arg8: memref<1x1xf32, #tpu.memory_space<vmem>>, %arg9: memref<1x32x32xbf16, #tpu.memory_space<vmem>>, %arg10: memref<1x1x32xf32, #tpu.memory_space<vmem>>, %arg11: memref<1x32x32xbf16, #tpu.memory_space<vmem>>, %arg12: memref<1x1x32xf32, #tpu.memory_space<vmem>>, %arg13: memref<1x1x32xf32, #tpu.memory_space<vmem>>, %arg14: memref<1x1x32xf32, #tpu.memory_space<vmem>>, %arg15: memref<1x32x32xbf16, #tpu.memory_space<vmem>>, %arg16: memref<1x1x32xf32, #tpu.memory_space<vmem>>, %arg17: memref<1x32x64xbf16, #tpu.memory_space<vmem>>, %arg18: memref<1x1x64xf32, #tpu.memory_space<vmem>>, %arg19: memref<1x32x32xbf16, #tpu.memory_space<vmem>>, %arg20: memref<1x1x32xf32, #tpu.memory_space<vmem>>, %arg21: memref<1x1x32xf32, #tpu.memory_space<vmem>>, %arg22: memref<1x1x32xf32, #tpu.memory_space<vmem>>, %arg23: memref<1x32x64xbf16, #tpu.memory_space<vmem>>, %arg24: memref<1x1x64xf32, #tpu.memory_space<vmem>>, %arg25: memref<1x64x32xbf16, #tpu.memory_space<vmem>>, %arg26: memref<1x1x32xf32, #tpu.memory_space<vmem>>, %arg27: memref<1x1x32xf32, #tpu.memory_space<vmem>>, %arg28: memref<1x1x32xf32, #tpu.memory_space<vmem>>, %arg29: memref<1x1x1xf32, #tpu.memory_space<vmem>>, %arg30: memref<1x32xf32, #tpu.memory_space<vmem>>) attributes {dimension_semantics = [#tpu.dimension_semantics<parallel>, #tpu.dimension_semantics<arbitrary>], iteration_bounds = array<i64: 2, 6>, scalar_prefetch = 0 : i64, scratch_operands = 1 : i64, tpu.core_type = #tpu.core_type<tc>, window_params = [{transform_indices = @transform_0, window_bounds = array<i64: 1, 8, 32>}, {pipeline_mode = #tpu.pipeline_mode<synchronous>, transform_indices = @transform_1, window_bounds = array<i64: 1, 32>}, {pipeline_mode = #tpu.pipeline_mode<synchronous>, transform_indices = @transform_2, window_bounds = array<i64: 1, 32>}, {pipeline_mode = #tpu.pipeline_mode<synchronous>, transform_indices = @transform_3, window_bounds = array<i64: 32, 16>}, {pipeline_mode = #tpu.pipeline_mode<synchronous>, transform_indices = @transform_4, window_bounds = array<i64: 1, 16>}, {pipeline_mode = #tpu.pipeline_mode<synchronous>, transform_indices = @transform_5, window_bounds = array<i64: 1, 16>}, {pipeline_mode = #tpu.pipeline_mode<synchronous>, transform_indices = @transform_6, window_bounds = array<i64: 1, 1>}, {transform_indices = @transform_7, window_bounds = array<i64: 1, 32, 32>}, {transform_indices = @transform_8, window_bounds = array<i64: 1, 1, 32>}, {transform_indices = @transform_9, window_bounds = array<i64: 1, 32, 32>}, {transform_indices = @transform_10, window_bounds = array<i64: 1, 1, 32>}, {transform_indices = @transform_11, window_bounds = array<i64: 1, 1, 32>}, {transform_indices = @transform_12, window_bounds = array<i64: 1, 1, 32>}, {transform_indices = @transform_13, window_bounds = array<i64: 1, 32, 32>}, {transform_indices = @transform_14, window_bounds = array<i64: 1, 1, 32>}, {transform_indices = @transform_15, window_bounds = array<i64: 1, 32, 64>}, {transform_indices = @transform_16, window_bounds = array<i64: 1, 1, 64>}, {transform_indices = @transform_17, window_bounds = array<i64: 1, 32, 32>}, {transform_indices = @transform_18, window_bounds = array<i64: 1, 1, 32>}, {transform_indices = @transform_19, window_bounds = array<i64: 1, 1, 32>}, {transform_indices = @transform_20, window_bounds = array<i64: 1, 1, 32>}, {transform_indices = @transform_21, window_bounds = array<i64: 1, 32, 64>}, {transform_indices = @transform_22, window_bounds = array<i64: 1, 1, 64>}, {transform_indices = @transform_23, window_bounds = array<i64: 1, 64, 32>}, {transform_indices = @transform_24, window_bounds = array<i64: 1, 1, 32>}, {transform_indices = @transform_25, window_bounds = array<i64: 1, 1, 32>}, {transform_indices = @transform_26, window_bounds = array<i64: 1, 1, 32>}, {transform_indices = @transform_27, window_bounds = array<i64: 1, 1, 1>}]} {
    %c0_i32 = arith.constant 0 : i32
    %0 = arith.cmpi eq, %arg1, %c0_i32 : i32
    %1 = arith.extui %0 : i1 to i32
    %c0_i32_0 = arith.constant 0 : i32
    %2 = arith.cmpi ne, %1, %c0_i32_0 : i32
    scf.if %2 {
      %cst_123 = arith.constant 1.000000e+00 : f32
      %280 = vector.broadcast %cst_123 : f32 to vector<1x32xf32>
      %c0_124 = arith.constant 0 : index
      %c0_125 = arith.constant 0 : index
      %281 = vector.load %arg30[%c0_124, %c0_125] : memref<1x32xf32, #tpu.memory_space<vmem>>, vector<1x32xf32>
      tpu.vector_store %arg30[%c0_124, %c0_125], %280 {strides = array<i32>} : memref<1x32xf32, #tpu.memory_space<vmem>>, vector<1x32xf32>,
    } else {
    }
    %c0 = arith.constant 0 : index
    %c0_1 = arith.constant 0 : index
    %3 = vector.load %arg30[%c0, %c0_1] : memref<1x32xf32, #tpu.memory_space<vmem>>, vector<1x32xf32>
    %c0_2 = arith.constant 0 : index
    %c0_3 = arith.constant 0 : index
    %c0_4 = arith.constant 0 : index
    %4 = vector.load %arg2[%c0_2, %c0_3, %c0_4] : memref<1x8x32xf32, #tpu.memory_space<vmem>>, vector<1x8x32xf32>
    %5 = vector.shape_cast %4 : vector<1x8x32xf32> to vector<8x32xf32>
    %c0_5 = arith.constant 0 : index
    %c0_6 = arith.constant 0 : index
    %c0_7 = arith.constant 0 : index
    %6 = vector.load %arg9[%c0_5, %c0_6, %c0_7] : memref<1x32x32xbf16, #tpu.memory_space<vmem>>, vector<1x32x32xbf16>
    %7 = vector.shape_cast %6 : vector<1x32x32xbf16> to vector<32x32xbf16>
    %8 = arith.truncf %3 : vector<1x32xf32> to vector<1x32xbf16>
    %cst = arith.constant dense<0.000000e+00> : vector<1x32xf32>
    %9 = tpu.matmul %8, %7, %cst {dimension_numbers = #tpu.dot_dimension_numbers<[1], [0], [0], [1], [0, 0, 1, 1], [], []>} : vector<1x32xbf16>, vector<32x32xbf16>, vector<1x32xf32> -> vector<1x32xf32>
    %c0_8 = arith.constant 0 : index
    %c0_9 = arith.constant 0 : index
    %c0_10 = arith.constant 0 : index
    %10 = vector.load %arg10[%c0_8, %c0_9, %c0_10] : memref<1x1x32xf32, #tpu.memory_space<vmem>>, vector<1x1x32xf32>
    %11 = vector.shape_cast %10 : vector<1x1x32xf32> to vector<1x32xf32>
    %12 = arith.addf %9, %11 : vector<1x32xf32>
    %c0_11 = arith.constant 0 : index
    %c0_12 = arith.constant 0 : index
    %c0_13 = arith.constant 0 : index
    %13 = vector.load %arg11[%c0_11, %c0_12, %c0_13] : memref<1x32x32xbf16, #tpu.memory_space<vmem>>, vector<1x32x32xbf16>
    %14 = vector.shape_cast %13 : vector<1x32x32xbf16> to vector<32x32xbf16>
    %15 = arith.truncf %12 : vector<1x32xf32> to vector<1x32xbf16>
    %cst_14 = arith.constant dense<0.000000e+00> : vector<1x32xf32>
    %16 = tpu.matmul %15, %14, %cst_14 {dimension_numbers = #tpu.dot_dimension_numbers<[1], [0], [0], [1], [0, 0, 1, 1], [], []>} : vector<1x32xbf16>, vector<32x32xbf16>, vector<1x32xf32> -> vector<1x32xf32>
    %c0_15 = arith.constant 0 : index
    %c0_16 = arith.constant 0 : index
    %c0_17 = arith.constant 0 : index
    %17 = vector.load %arg12[%c0_15, %c0_16, %c0_17] : memref<1x1x32xf32, #tpu.memory_space<vmem>>, vector<1x1x32xf32>
    %18 = vector.shape_cast %17 : vector<1x1x32xf32> to vector<1x32xf32>
    %19 = arith.addf %16, %18 : vector<1x32xf32>
    %20 = arith.addf %3, %19 : vector<1x32xf32>
    %c0_18 = arith.constant 0 : index
    %c0_19 = arith.constant 0 : index
    %c0_20 = arith.constant 0 : index
    %21 = vector.load %arg13[%c0_18, %c0_19, %c0_20] : memref<1x1x32xf32, #tpu.memory_space<vmem>>, vector<1x1x32xf32>
    %22 = vector.shape_cast %21 : vector<1x1x32xf32> to vector<1x32xf32>
    %c0_21 = arith.constant 0 : index
    %c0_22 = arith.constant 0 : index
    %c0_23 = arith.constant 0 : index
    %23 = vector.load %arg14[%c0_21, %c0_22, %c0_23] : memref<1x1x32xf32, #tpu.memory_space<vmem>>, vector<1x1x32xf32>
    %24 = vector.shape_cast %23 : vector<1x1x32xf32> to vector<1x32xf32>
    %cst_24 = arith.constant dense<0.000000e+00> : vector<1xf32>
    %25 = vector.multi_reduction <add>, %20, %cst_24 [1] : vector<1x32xf32> to vector<1xf32>
    %26 = vector.shape_cast %25 : vector<1xf32> to vector<1x1xf32>
    %cst_25 = arith.constant 3.200000e+01 : f32
    %27 = vector.broadcast %cst_25 : f32 to vector<1x1xf32>
    %28 = arith.divf %26, %27 : vector<1x1xf32>
    %29 = vector.broadcast %28 : vector<1x1xf32> to vector<1x32xf32>
    %30 = arith.subf %20, %29 : vector<1x32xf32>
    %31 = arith.mulf %30, %30 : vector<1x32xf32>
    %cst_26 = arith.constant dense<0.000000e+00> : vector<1xf32>
    %32 = vector.multi_reduction <add>, %31, %cst_26 [1] : vector<1x32xf32> to vector<1xf32>
    %33 = vector.shape_cast %32 : vector<1xf32> to vector<1x1xf32>
    %cst_27 = arith.constant 3.200000e+01 : f32
    %34 = vector.broadcast %cst_27 : f32 to vector<1x1xf32>
    %35 = arith.divf %33, %34 : vector<1x1xf32>
    %cst_28 = arith.constant 9.99999974E-6 : f32
    %36 = vector.broadcast %cst_28 : f32 to vector<1x1xf32>
    %37 = arith.addf %35, %36 : vector<1x1xf32>
    %38 = math.rsqrt %37 : vector<1x1xf32>
    %39 = vector.broadcast %38 : vector<1x1xf32> to vector<1x32xf32>
    %40 = arith.mulf %30, %39 : vector<1x32xf32>
    %41 = arith.mulf %40, %22 : vector<1x32xf32>
    %42 = arith.addf %41, %24 : vector<1x32xf32>
    %c0_29 = arith.constant 0 : index
    %c0_30 = arith.constant 0 : index
    %c0_31 = arith.constant 0 : index
    %43 = vector.load %arg15[%c0_29, %c0_30, %c0_31] : memref<1x32x32xbf16, #tpu.memory_space<vmem>>, vector<1x32x32xbf16>
    %44 = vector.shape_cast %43 : vector<1x32x32xbf16> to vector<32x32xbf16>
    %45 = arith.truncf %42 : vector<1x32xf32> to vector<1x32xbf16>
    %cst_32 = arith.constant dense<0.000000e+00> : vector<1x32xf32>
    %46 = tpu.matmul %45, %44, %cst_32 {dimension_numbers = #tpu.dot_dimension_numbers<[1], [0], [0], [1], [0, 0, 1, 1], [], []>} : vector<1x32xbf16>, vector<32x32xbf16>, vector<1x32xf32> -> vector<1x32xf32>
    %c0_33 = arith.constant 0 : index
    %c0_34 = arith.constant 0 : index
    %c0_35 = arith.constant 0 : index
    %47 = vector.load %arg16[%c0_33, %c0_34, %c0_35] : memref<1x1x32xf32, #tpu.memory_space<vmem>>, vector<1x1x32xf32>
    %48 = vector.shape_cast %47 : vector<1x1x32xf32> to vector<1x32xf32>
    %49 = arith.addf %46, %48 : vector<1x32xf32>
    %cst_36 = arith.constant 5.000000e-01 : f32
    %50 = vector.broadcast %cst_36 : f32 to vector<1x32xf32>
    %51 = arith.mulf %49, %50 : vector<1x32xf32>
    %c0_37 = arith.constant 0 : index
    %c0_38 = arith.constant 0 : index
    %c0_39 = arith.constant 0 : index
    %52 = vector.load %arg17[%c0_37, %c0_38, %c0_39] : memref<1x32x64xbf16, #tpu.memory_space<vmem>>, vector<1x32x64xbf16>
    %53 = vector.shape_cast %52 : vector<1x32x64xbf16> to vector<32x64xbf16>
    %54 = arith.truncf %5 : vector<8x32xf32> to vector<8x32xbf16>
    %cst_40 = arith.constant dense<0.000000e+00> : vector<8x64xf32>
    %55 = tpu.matmul %54, %53, %cst_40 {dimension_numbers = #tpu.dot_dimension_numbers<[1], [0], [0], [1], [0, 0, 1, 1], [], []>} : vector<8x32xbf16>, vector<32x64xbf16>, vector<8x64xf32> -> vector<8x64xf32>
    %c0_41 = arith.constant 0 : index
    %c0_42 = arith.constant 0 : index
    %c0_43 = arith.constant 0 : index
    %56 = vector.load %arg18[%c0_41, %c0_42, %c0_43] : memref<1x1x64xf32, #tpu.memory_space<vmem>>, vector<1x1x64xf32>
    %57 = vector.shape_cast %56 : vector<1x1x64xf32> to vector<1x64xf32>
    %58 = vector.broadcast %57 : vector<1x64xf32> to vector<8x64xf32>
    %59 = arith.addf %55, %58 : vector<8x64xf32>
    %60 = vector.extract_strided_slice %59 {offsets = [0, 0], sizes = [8, 32], strides = [1, 1]} : vector<8x64xf32> to vector<8x32xf32>
    %61 = vector.extract_strided_slice %59 {offsets = [0, 32], sizes = [8, 32], strides = [1, 1]} : vector<8x64xf32> to vector<8x32xf32>
    %62 = vector.extract_strided_slice %51 {offsets = [0, 0], sizes = [1, 4], strides = [1, 1]} : vector<1x32xf32> to vector<1x4xf32>
    %63 = vector.extract_strided_slice %60 {offsets = [0, 0], sizes = [8, 4], strides = [1, 1]} : vector<8x32xf32> to vector<8x4xf32>
    %64 = arith.truncf %62 : vector<1x4xf32> to vector<1x4xbf16>
    %65 = arith.truncf %63 : vector<8x4xf32> to vector<8x4xbf16>
    %cst_44 = arith.constant dense<0.000000e+00> : vector<1x8xf32>
    %66 = tpu.matmul %64, %65, %cst_44 {dimension_numbers = #tpu.dot_dimension_numbers<[1], [1], [0], [0], [0, 0, 1, 0], [], []>} : vector<1x4xbf16>, vector<8x4xbf16>, vector<1x8xf32> -> vector<1x8xf32>
    %cst_45 = arith.constant dense<0xFF800000> : vector<1xf32>
    %67 = vector.multi_reduction <maximumf>, %66, %cst_45 [1] : vector<1x8xf32> to vector<1xf32>
    %68 = vector.shape_cast %67 : vector<1xf32> to vector<1x1xf32>
    %69 = vector.broadcast %68 : vector<1x1xf32> to vector<1x8xf32>
    %70 = arith.subf %66, %69 : vector<1x8xf32>
    %71 = math.exp %70 : vector<1x8xf32>
    %cst_46 = arith.constant dense<0.000000e+00> : vector<1xf32>
    %72 = vector.multi_reduction <add>, %71, %cst_46 [1] : vector<1x8xf32> to vector<1xf32>
    %73 = vector.shape_cast %72 : vector<1xf32> to vector<1x1xf32>
    %74 = vector.broadcast %73 : vector<1x1xf32> to vector<1x8xf32>
    %75 = arith.divf %71, %74 : vector<1x8xf32>
    %76 = vector.extract_strided_slice %61 {offsets = [0, 0], sizes = [8, 4], strides = [1, 1]} : vector<8x32xf32> to vector<8x4xf32>
    %77 = arith.truncf %75 : vector<1x8xf32> to vector<1x8xbf16>
    %78 = arith.truncf %76 : vector<8x4xf32> to vector<8x4xbf16>
    %cst_47 = arith.constant dense<0.000000e+00> : vector<1x4xf32>
    %79 = tpu.matmul %77, %78, %cst_47 {dimension_numbers = #tpu.dot_dimension_numbers<[1], [0], [0], [1], [0, 0, 1, 1], [], []>} : vector<1x8xbf16>, vector<8x4xbf16>, vector<1x4xf32> -> vector<1x4xf32>
    %80 = vector.extract_strided_slice %51 {offsets = [0, 4], sizes = [1, 4], strides = [1, 1]} : vector<1x32xf32> to vector<1x4xf32>
    %81 = vector.extract_strided_slice %60 {offsets = [0, 4], sizes = [8, 4], strides = [1, 1]} : vector<8x32xf32> to vector<8x4xf32>
    %82 = arith.truncf %80 : vector<1x4xf32> to vector<1x4xbf16>
    %83 = arith.truncf %81 : vector<8x4xf32> to vector<8x4xbf16>
    %cst_48 = arith.constant dense<0.000000e+00> : vector<1x8xf32>
    %84 = tpu.matmul %82, %83, %cst_48 {dimension_numbers = #tpu.dot_dimension_numbers<[1], [1], [0], [0], [0, 0, 1, 0], [], []>} : vector<1x4xbf16>, vector<8x4xbf16>, vector<1x8xf32> -> vector<1x8xf32>
    %cst_49 = arith.constant dense<0xFF800000> : vector<1xf32>
    %85 = vector.multi_reduction <maximumf>, %84, %cst_49 [1] : vector<1x8xf32> to vector<1xf32>
    %86 = vector.shape_cast %85 : vector<1xf32> to vector<1x1xf32>
    %87 = vector.broadcast %86 : vector<1x1xf32> to vector<1x8xf32>
    %88 = arith.subf %84, %87 : vector<1x8xf32>
    %89 = math.exp %88 : vector<1x8xf32>
    %cst_50 = arith.constant dense<0.000000e+00> : vector<1xf32>
    %90 = vector.multi_reduction <add>, %89, %cst_50 [1] : vector<1x8xf32> to vector<1xf32>
    %91 = vector.shape_cast %90 : vector<1xf32> to vector<1x1xf32>
    %92 = vector.broadcast %91 : vector<1x1xf32> to vector<1x8xf32>
    %93 = arith.divf %89, %92 : vector<1x8xf32>
    %94 = vector.extract_strided_slice %61 {offsets = [0, 4], sizes = [8, 4], strides = [1, 1]} : vector<8x32xf32> to vector<8x4xf32>
    %95 = arith.truncf %93 : vector<1x8xf32> to vector<1x8xbf16>
    %96 = arith.truncf %94 : vector<8x4xf32> to vector<8x4xbf16>
    %cst_51 = arith.constant dense<0.000000e+00> : vector<1x4xf32>
    %97 = tpu.matmul %95, %96, %cst_51 {dimension_numbers = #tpu.dot_dimension_numbers<[1], [0], [0], [1], [0, 0, 1, 1], [], []>} : vector<1x8xbf16>, vector<8x4xbf16>, vector<1x4xf32> -> vector<1x4xf32>
    %98 = vector.extract_strided_slice %51 {offsets = [0, 8], sizes = [1, 4], strides = [1, 1]} : vector<1x32xf32> to vector<1x4xf32>
    %99 = vector.extract_strided_slice %60 {offsets = [0, 8], sizes = [8, 4], strides = [1, 1]} : vector<8x32xf32> to vector<8x4xf32>
    %100 = arith.truncf %98 : vector<1x4xf32> to vector<1x4xbf16>
    %101 = arith.truncf %99 : vector<8x4xf32> to vector<8x4xbf16>
    %cst_52 = arith.constant dense<0.000000e+00> : vector<1x8xf32>
    %102 = tpu.matmul %100, %101, %cst_52 {dimension_numbers = #tpu.dot_dimension_numbers<[1], [1], [0], [0], [0, 0, 1, 0], [], []>} : vector<1x4xbf16>, vector<8x4xbf16>, vector<1x8xf32> -> vector<1x8xf32>
    %cst_53 = arith.constant dense<0xFF800000> : vector<1xf32>
    %103 = vector.multi_reduction <maximumf>, %102, %cst_53 [1] : vector<1x8xf32> to vector<1xf32>
    %104 = vector.shape_cast %103 : vector<1xf32> to vector<1x1xf32>
    %105 = vector.broadcast %104 : vector<1x1xf32> to vector<1x8xf32>
    %106 = arith.subf %102, %105 : vector<1x8xf32>
    %107 = math.exp %106 : vector<1x8xf32>
    %cst_54 = arith.constant dense<0.000000e+00> : vector<1xf32>
    %108 = vector.multi_reduction <add>, %107, %cst_54 [1] : vector<1x8xf32> to vector<1xf32>
    %109 = vector.shape_cast %108 : vector<1xf32> to vector<1x1xf32>
    %110 = vector.broadcast %109 : vector<1x1xf32> to vector<1x8xf32>
    %111 = arith.divf %107, %110 : vector<1x8xf32>
    %112 = vector.extract_strided_slice %61 {offsets = [0, 8], sizes = [8, 4], strides = [1, 1]} : vector<8x32xf32> to vector<8x4xf32>
    %113 = arith.truncf %111 : vector<1x8xf32> to vector<1x8xbf16>
    %114 = arith.truncf %112 : vector<8x4xf32> to vector<8x4xbf16>
    %cst_55 = arith.constant dense<0.000000e+00> : vector<1x4xf32>
    %115 = tpu.matmul %113, %114, %cst_55 {dimension_numbers = #tpu.dot_dimension_numbers<[1], [0], [0], [1], [0, 0, 1, 1], [], []>} : vector<1x8xbf16>, vector<8x4xbf16>, vector<1x4xf32> -> vector<1x4xf32>
    %116 = vector.extract_strided_slice %51 {offsets = [0, 12], sizes = [1, 4], strides = [1, 1]} : vector<1x32xf32> to vector<1x4xf32>
    %117 = vector.extract_strided_slice %60 {offsets = [0, 12], sizes = [8, 4], strides = [1, 1]} : vector<8x32xf32> to vector<8x4xf32>
    %118 = arith.truncf %116 : vector<1x4xf32> to vector<1x4xbf16>
    %119 = arith.truncf %117 : vector<8x4xf32> to vector<8x4xbf16>
    %cst_56 = arith.constant dense<0.000000e+00> : vector<1x8xf32>
    %120 = tpu.matmul %118, %119, %cst_56 {dimension_numbers = #tpu.dot_dimension_numbers<[1], [1], [0], [0], [0, 0, 1, 0], [], []>} : vector<1x4xbf16>, vector<8x4xbf16>, vector<1x8xf32> -> vector<1x8xf32>
    %cst_57 = arith.constant dense<0xFF800000> : vector<1xf32>
    %121 = vector.multi_reduction <maximumf>, %120, %cst_57 [1] : vector<1x8xf32> to vector<1xf32>
    %122 = vector.shape_cast %121 : vector<1xf32> to vector<1x1xf32>
    %123 = vector.broadcast %122 : vector<1x1xf32> to vector<1x8xf32>
    %124 = arith.subf %120, %123 : vector<1x8xf32>
    %125 = math.exp %124 : vector<1x8xf32>
    %cst_58 = arith.constant dense<0.000000e+00> : vector<1xf32>
    %126 = vector.multi_reduction <add>, %125, %cst_58 [1] : vector<1x8xf32> to vector<1xf32>
    %127 = vector.shape_cast %126 : vector<1xf32> to vector<1x1xf32>
    %128 = vector.broadcast %127 : vector<1x1xf32> to vector<1x8xf32>
    %129 = arith.divf %125, %128 : vector<1x8xf32>
    %130 = vector.extract_strided_slice %61 {offsets = [0, 12], sizes = [8, 4], strides = [1, 1]} : vector<8x32xf32> to vector<8x4xf32>
    %131 = arith.truncf %129 : vector<1x8xf32> to vector<1x8xbf16>
    %132 = arith.truncf %130 : vector<8x4xf32> to vector<8x4xbf16>
    %cst_59 = arith.constant dense<0.000000e+00> : vector<1x4xf32>
    %133 = tpu.matmul %131, %132, %cst_59 {dimension_numbers = #tpu.dot_dimension_numbers<[1], [0], [0], [1], [0, 0, 1, 1], [], []>} : vector<1x8xbf16>, vector<8x4xbf16>, vector<1x4xf32> -> vector<1x4xf32>
    %134 = vector.extract_strided_slice %51 {offsets = [0, 16], sizes = [1, 4], strides = [1, 1]} : vector<1x32xf32> to vector<1x4xf32>
    %135 = vector.extract_strided_slice %60 {offsets = [0, 16], sizes = [8, 4], strides = [1, 1]} : vector<8x32xf32> to vector<8x4xf32>
    %136 = arith.truncf %134 : vector<1x4xf32> to vector<1x4xbf16>
    %137 = arith.truncf %135 : vector<8x4xf32> to vector<8x4xbf16>
    %cst_60 = arith.constant dense<0.000000e+00> : vector<1x8xf32>
    %138 = tpu.matmul %136, %137, %cst_60 {dimension_numbers = #tpu.dot_dimension_numbers<[1], [1], [0], [0], [0, 0, 1, 0], [], []>} : vector<1x4xbf16>, vector<8x4xbf16>, vector<1x8xf32> -> vector<1x8xf32>
    %cst_61 = arith.constant dense<0xFF800000> : vector<1xf32>
    %139 = vector.multi_reduction <maximumf>, %138, %cst_61 [1] : vector<1x8xf32> to vector<1xf32>
    %140 = vector.shape_cast %139 : vector<1xf32> to vector<1x1xf32>
    %141 = vector.broadcast %140 : vector<1x1xf32> to vector<1x8xf32>
    %142 = arith.subf %138, %141 : vector<1x8xf32>
    %143 = math.exp %142 : vector<1x8xf32>
    %cst_62 = arith.constant dense<0.000000e+00> : vector<1xf32>
    %144 = vector.multi_reduction <add>, %143, %cst_62 [1] : vector<1x8xf32> to vector<1xf32>
    %145 = vector.shape_cast %144 : vector<1xf32> to vector<1x1xf32>
    %146 = vector.broadcast %145 : vector<1x1xf32> to vector<1x8xf32>
    %147 = arith.divf %143, %146 : vector<1x8xf32>
    %148 = vector.extract_strided_slice %61 {offsets = [0, 16], sizes = [8, 4], strides = [1, 1]} : vector<8x32xf32> to vector<8x4xf32>
    %149 = arith.truncf %147 : vector<1x8xf32> to vector<1x8xbf16>
    %150 = arith.truncf %148 : vector<8x4xf32> to vector<8x4xbf16>
    %cst_63 = arith.constant dense<0.000000e+00> : vector<1x4xf32>
    %151 = tpu.matmul %149, %150, %cst_63 {dimension_numbers = #tpu.dot_dimension_numbers<[1], [0], [0], [1], [0, 0, 1, 1], [], []>} : vector<1x8xbf16>, vector<8x4xbf16>, vector<1x4xf32> -> vector<1x4xf32>
    %152 = vector.extract_strided_slice %51 {offsets = [0, 20], sizes = [1, 4], strides = [1, 1]} : vector<1x32xf32> to vector<1x4xf32>
    %153 = vector.extract_strided_slice %60 {offsets = [0, 20], sizes = [8, 4], strides = [1, 1]} : vector<8x32xf32> to vector<8x4xf32>
    %154 = arith.truncf %152 : vector<1x4xf32> to vector<1x4xbf16>
    %155 = arith.truncf %153 : vector<8x4xf32> to vector<8x4xbf16>
    %cst_64 = arith.constant dense<0.000000e+00> : vector<1x8xf32>
    %156 = tpu.matmul %154, %155, %cst_64 {dimension_numbers = #tpu.dot_dimension_numbers<[1], [1], [0], [0], [0, 0, 1, 0], [], []>} : vector<1x4xbf16>, vector<8x4xbf16>, vector<1x8xf32> -> vector<1x8xf32>
    %cst_65 = arith.constant dense<0xFF800000> : vector<1xf32>
    %157 = vector.multi_reduction <maximumf>, %156, %cst_65 [1] : vector<1x8xf32> to vector<1xf32>
    %158 = vector.shape_cast %157 : vector<1xf32> to vector<1x1xf32>
    %159 = vector.broadcast %158 : vector<1x1xf32> to vector<1x8xf32>
    %160 = arith.subf %156, %159 : vector<1x8xf32>
    %161 = math.exp %160 : vector<1x8xf32>
    %cst_66 = arith.constant dense<0.000000e+00> : vector<1xf32>
    %162 = vector.multi_reduction <add>, %161, %cst_66 [1] : vector<1x8xf32> to vector<1xf32>
    %163 = vector.shape_cast %162 : vector<1xf32> to vector<1x1xf32>
    %164 = vector.broadcast %163 : vector<1x1xf32> to vector<1x8xf32>
    %165 = arith.divf %161, %164 : vector<1x8xf32>
    %166 = vector.extract_strided_slice %61 {offsets = [0, 20], sizes = [8, 4], strides = [1, 1]} : vector<8x32xf32> to vector<8x4xf32>
    %167 = arith.truncf %165 : vector<1x8xf32> to vector<1x8xbf16>
    %168 = arith.truncf %166 : vector<8x4xf32> to vector<8x4xbf16>
    %cst_67 = arith.constant dense<0.000000e+00> : vector<1x4xf32>
    %169 = tpu.matmul %167, %168, %cst_67 {dimension_numbers = #tpu.dot_dimension_numbers<[1], [0], [0], [1], [0, 0, 1, 1], [], []>} : vector<1x8xbf16>, vector<8x4xbf16>, vector<1x4xf32> -> vector<1x4xf32>
    %170 = vector.extract_strided_slice %51 {offsets = [0, 24], sizes = [1, 4], strides = [1, 1]} : vector<1x32xf32> to vector<1x4xf32>
    %171 = vector.extract_strided_slice %60 {offsets = [0, 24], sizes = [8, 4], strides = [1, 1]} : vector<8x32xf32> to vector<8x4xf32>
    %172 = arith.truncf %170 : vector<1x4xf32> to vector<1x4xbf16>
    %173 = arith.truncf %171 : vector<8x4xf32> to vector<8x4xbf16>
    %cst_68 = arith.constant dense<0.000000e+00> : vector<1x8xf32>
    %174 = tpu.matmul %172, %173, %cst_68 {dimension_numbers = #tpu.dot_dimension_numbers<[1], [1], [0], [0], [0, 0, 1, 0], [], []>} : vector<1x4xbf16>, vector<8x4xbf16>, vector<1x8xf32> -> vector<1x8xf32>
    %cst_69 = arith.constant dense<0xFF800000> : vector<1xf32>
    %175 = vector.multi_reduction <maximumf>, %174, %cst_69 [1] : vector<1x8xf32> to vector<1xf32>
    %176 = vector.shape_cast %175 : vector<1xf32> to vector<1x1xf32>
    %177 = vector.broadcast %176 : vector<1x1xf32> to vector<1x8xf32>
    %178 = arith.subf %174, %177 : vector<1x8xf32>
    %179 = math.exp %178 : vector<1x8xf32>
    %cst_70 = arith.constant dense<0.000000e+00> : vector<1xf32>
    %180 = vector.multi_reduction <add>, %179, %cst_70 [1] : vector<1x8xf32> to vector<1xf32>
    %181 = vector.shape_cast %180 : vector<1xf32> to vector<1x1xf32>
    %182 = vector.broadcast %181 : vector<1x1xf32> to vector<1x8xf32>
    %183 = arith.divf %179, %182 : vector<1x8xf32>
    %184 = vector.extract_strided_slice %61 {offsets = [0, 24], sizes = [8, 4], strides = [1, 1]} : vector<8x32xf32> to vector<8x4xf32>
    %185 = arith.truncf %183 : vector<1x8xf32> to vector<1x8xbf16>
    %186 = arith.truncf %184 : vector<8x4xf32> to vector<8x4xbf16>
    %cst_71 = arith.constant dense<0.000000e+00> : vector<1x4xf32>
    %187 = tpu.matmul %185, %186, %cst_71 {dimension_numbers = #tpu.dot_dimension_numbers<[1], [0], [0], [1], [0, 0, 1, 1], [], []>} : vector<1x8xbf16>, vector<8x4xbf16>, vector<1x4xf32> -> vector<1x4xf32>
    %188 = vector.extract_strided_slice %51 {offsets = [0, 28], sizes = [1, 4], strides = [1, 1]} : vector<1x32xf32> to vector<1x4xf32>
    %189 = vector.extract_strided_slice %60 {offsets = [0, 28], sizes = [8, 4], strides = [1, 1]} : vector<8x32xf32> to vector<8x4xf32>
    %190 = arith.truncf %188 : vector<1x4xf32> to vector<1x4xbf16>
    %191 = arith.truncf %189 : vector<8x4xf32> to vector<8x4xbf16>
    %cst_72 = arith.constant dense<0.000000e+00> : vector<1x8xf32>
    %192 = tpu.matmul %190, %191, %cst_72 {dimension_numbers = #tpu.dot_dimension_numbers<[1], [1], [0], [0], [0, 0, 1, 0], [], []>} : vector<1x4xbf16>, vector<8x4xbf16>, vector<1x8xf32> -> vector<1x8xf32>
    %cst_73 = arith.constant dense<0xFF800000> : vector<1xf32>
    %193 = vector.multi_reduction <maximumf>, %192, %cst_73 [1] : vector<1x8xf32> to vector<1xf32>
    %194 = vector.shape_cast %193 : vector<1xf32> to vector<1x1xf32>
    %195 = vector.broadcast %194 : vector<1x1xf32> to vector<1x8xf32>
    %196 = arith.subf %192, %195 : vector<1x8xf32>
    %197 = math.exp %196 : vector<1x8xf32>
    %cst_74 = arith.constant dense<0.000000e+00> : vector<1xf32>
    %198 = vector.multi_reduction <add>, %197, %cst_74 [1] : vector<1x8xf32> to vector<1xf32>
    %199 = vector.shape_cast %198 : vector<1xf32> to vector<1x1xf32>
    %200 = vector.broadcast %199 : vector<1x1xf32> to vector<1x8xf32>
    %201 = arith.divf %197, %200 : vector<1x8xf32>
    %202 = vector.extract_strided_slice %61 {offsets = [0, 28], sizes = [8, 4], strides = [1, 1]} : vector<8x32xf32> to vector<8x4xf32>
    %203 = arith.truncf %201 : vector<1x8xf32> to vector<1x8xbf16>
    %204 = arith.truncf %202 : vector<8x4xf32> to vector<8x4xbf16>
    %cst_75 = arith.constant dense<0.000000e+00> : vector<1x4xf32>
    %205 = tpu.matmul %203, %204, %cst_75 {dimension_numbers = #tpu.dot_dimension_numbers<[1], [0], [0], [1], [0, 0, 1, 1], [], []>} : vector<1x8xbf16>, vector<8x4xbf16>, vector<1x4xf32> -> vector<1x4xf32>
    %206 = tpu.concatenate %79, %97, %115, %133, %151, %169, %187, %205 in 1 : vector<1x4xf32>, vector<1x4xf32>, vector<1x4xf32>, vector<1x4xf32>, vector<1x4xf32>, vector<1x4xf32>, vector<1x4xf32>, vector<1x4xf32> -> vector<1x32xf32>
    %c0_76 = arith.constant 0 : index
    %c0_77 = arith.constant 0 : index
    %c0_78 = arith.constant 0 : index
    %207 = vector.load %arg19[%c0_76, %c0_77, %c0_78] : memref<1x32x32xbf16, #tpu.memory_space<vmem>>, vector<1x32x32xbf16>
    %208 = vector.shape_cast %207 : vector<1x32x32xbf16> to vector<32x32xbf16>
    %209 = arith.truncf %206 : vector<1x32xf32> to vector<1x32xbf16>
    %cst_79 = arith.constant dense<0.000000e+00> : vector<1x32xf32>
    %210 = tpu.matmul %209, %208, %cst_79 {dimension_numbers = #tpu.dot_dimension_numbers<[1], [0], [0], [1], [0, 0, 1, 1], [], []>} : vector<1x32xbf16>, vector<32x32xbf16>, vector<1x32xf32> -> vector<1x32xf32>
    %c0_80 = arith.constant 0 : index
    %c0_81 = arith.constant 0 : index
    %c0_82 = arith.constant 0 : index
    %211 = vector.load %arg20[%c0_80, %c0_81, %c0_82] : memref<1x1x32xf32, #tpu.memory_space<vmem>>, vector<1x1x32xf32>
    %212 = vector.shape_cast %211 : vector<1x1x32xf32> to vector<1x32xf32>
    %213 = arith.addf %210, %212 : vector<1x32xf32>
    %214 = arith.addf %42, %213 : vector<1x32xf32>
    %c0_83 = arith.constant 0 : index
    %c0_84 = arith.constant 0 : index
    %c0_85 = arith.constant 0 : index
    %215 = vector.load %arg21[%c0_83, %c0_84, %c0_85] : memref<1x1x32xf32, #tpu.memory_space<vmem>>, vector<1x1x32xf32>
    %216 = vector.shape_cast %215 : vector<1x1x32xf32> to vector<1x32xf32>
    %c0_86 = arith.constant 0 : index
    %c0_87 = arith.constant 0 : index
    %c0_88 = arith.constant 0 : index
    %217 = vector.load %arg22[%c0_86, %c0_87, %c0_88] : memref<1x1x32xf32, #tpu.memory_space<vmem>>, vector<1x1x32xf32>
    %218 = vector.shape_cast %217 : vector<1x1x32xf32> to vector<1x32xf32>
    %cst_89 = arith.constant dense<0.000000e+00> : vector<1xf32>
    %219 = vector.multi_reduction <add>, %214, %cst_89 [1] : vector<1x32xf32> to vector<1xf32>
    %220 = vector.shape_cast %219 : vector<1xf32> to vector<1x1xf32>
    %cst_90 = arith.constant 3.200000e+01 : f32
    %221 = vector.broadcast %cst_90 : f32 to vector<1x1xf32>
    %222 = arith.divf %220, %221 : vector<1x1xf32>
    %223 = vector.broadcast %222 : vector<1x1xf32> to vector<1x32xf32>
    %224 = arith.subf %214, %223 : vector<1x32xf32>
    %225 = arith.mulf %224, %224 : vector<1x32xf32>
    %cst_91 = arith.constant dense<0.000000e+00> : vector<1xf32>
    %226 = vector.multi_reduction <add>, %225, %cst_91 [1] : vector<1x32xf32> to vector<1xf32>
    %227 = vector.shape_cast %226 : vector<1xf32> to vector<1x1xf32>
    %cst_92 = arith.constant 3.200000e+01 : f32
    %228 = vector.broadcast %cst_92 : f32 to vector<1x1xf32>
    %229 = arith.divf %227, %228 : vector<1x1xf32>
    %cst_93 = arith.constant 9.99999974E-6 : f32
    %230 = vector.broadcast %cst_93 : f32 to vector<1x1xf32>
    %231 = arith.addf %229, %230 : vector<1x1xf32>
    %232 = math.rsqrt %231 : vector<1x1xf32>
    %233 = vector.broadcast %232 : vector<1x1xf32> to vector<1x32xf32>
    %234 = arith.mulf %224, %233 : vector<1x32xf32>
    %235 = arith.mulf %234, %216 : vector<1x32xf32>
    %236 = arith.addf %235, %218 : vector<1x32xf32>
    %c0_94 = arith.constant 0 : index
    %c0_95 = arith.constant 0 : index
    %c0_96 = arith.constant 0 : index
    %237 = vector.load %arg23[%c0_94, %c0_95, %c0_96] : memref<1x32x64xbf16, #tpu.memory_space<vmem>>, vector<1x32x64xbf16>
    %238 = vector.shape_cast %237 : vector<1x32x64xbf16> to vector<32x64xbf16>
    %239 = arith.truncf %236 : vector<1x32xf32> to vector<1x32xbf16>
    %cst_97 = arith.constant dense<0.000000e+00> : vector<1x64xf32>
    %240 = tpu.matmul %239, %238, %cst_97 {dimension_numbers = #tpu.dot_dimension_numbers<[1], [0], [0], [1], [0, 0, 1, 1], [], []>} : vector<1x32xbf16>, vector<32x64xbf16>, vector<1x64xf32> -> vector<1x64xf32>
    %c0_98 = arith.constant 0 : index
    %c0_99 = arith.constant 0 : index
    %c0_100 = arith.constant 0 : index
    %241 = vector.load %arg24[%c0_98, %c0_99, %c0_100] : memref<1x1x64xf32, #tpu.memory_space<vmem>>, vector<1x1x64xf32>
    %242 = vector.shape_cast %241 : vector<1x1x64xf32> to vector<1x64xf32>
    %243 = arith.addf %240, %242 : vector<1x64xf32>
    %cst_101 = arith.constant 0.000000e+00 : f32
    %244 = vector.broadcast %cst_101 : f32 to vector<1x64xf32>
    %245 = arith.maximumf %243, %244 : vector<1x64xf32>
    %c0_102 = arith.constant 0 : index
    %c0_103 = arith.constant 0 : index
    %c0_104 = arith.constant 0 : index
    %246 = vector.load %arg25[%c0_102, %c0_103, %c0_104] : memref<1x64x32xbf16, #tpu.memory_space<vmem>>, vector<1x64x32xbf16>
    %247 = vector.shape_cast %246 : vector<1x64x32xbf16> to vector<64x32xbf16>
    %248 = arith.truncf %245 : vector<1x64xf32> to vector<1x64xbf16>
    %cst_105 = arith.constant dense<0.000000e+00> : vector<1x32xf32>
    %249 = tpu.matmul %248, %247, %cst_105 {dimension_numbers = #tpu.dot_dimension_numbers<[1], [0], [0], [1], [0, 0, 1, 1], [], []>} : vector<1x64xbf16>, vector<64x32xbf16>, vector<1x32xf32> -> vector<1x32xf32>
    %c0_106 = arith.constant 0 : index
    %c0_107 = arith.constant 0 : index
    %c0_108 = arith.constant 0 : index
    %250 = vector.load %arg26[%c0_106, %c0_107, %c0_108] : memref<1x1x32xf32, #tpu.memory_space<vmem>>, vector<1x1x32xf32>
    %251 = vector.shape_cast %250 : vector<1x1x32xf32> to vector<1x32xf32>
    %252 = arith.addf %249, %251 : vector<1x32xf32>
    %253 = arith.addf %236, %252 : vector<1x32xf32>
    %c0_109 = arith.constant 0 : index
    %c0_110 = arith.constant 0 : index
    %c0_111 = arith.constant 0 : index
    %254 = vector.load %arg27[%c0_109, %c0_110, %c0_111] : memref<1x1x32xf32, #tpu.memory_space<vmem>>, vector<1x1x32xf32>
    %255 = vector.shape_cast %254 : vector<1x1x32xf32> to vector<1x32xf32>
    %c0_112 = arith.constant 0 : index
    %c0_113 = arith.constant 0 : index
    %c0_114 = arith.constant 0 : index
    %256 = vector.load %arg28[%c0_112, %c0_113, %c0_114] : memref<1x1x32xf32, #tpu.memory_space<vmem>>, vector<1x1x32xf32>
    %257 = vector.shape_cast %256 : vector<1x1x32xf32> to vector<1x32xf32>
    %cst_115 = arith.constant dense<0.000000e+00> : vector<1xf32>
    %258 = vector.multi_reduction <add>, %253, %cst_115 [1] : vector<1x32xf32> to vector<1xf32>
    %259 = vector.shape_cast %258 : vector<1xf32> to vector<1x1xf32>
    %cst_116 = arith.constant 3.200000e+01 : f32
    %260 = vector.broadcast %cst_116 : f32 to vector<1x1xf32>
    %261 = arith.divf %259, %260 : vector<1x1xf32>
    %262 = vector.broadcast %261 : vector<1x1xf32> to vector<1x32xf32>
    %263 = arith.subf %253, %262 : vector<1x32xf32>
    %264 = arith.mulf %263, %263 : vector<1x32xf32>
    %cst_117 = arith.constant dense<0.000000e+00> : vector<1xf32>
    %265 = vector.multi_reduction <add>, %264, %cst_117 [1] : vector<1x32xf32> to vector<1xf32>
    %266 = vector.shape_cast %265 : vector<1xf32> to vector<1x1xf32>
    %cst_118 = arith.constant 3.200000e+01 : f32
    %267 = vector.broadcast %cst_118 : f32 to vector<1x1xf32>
    %268 = arith.divf %266, %267 : vector<1x1xf32>
    %cst_119 = arith.constant 9.99999974E-6 : f32
    %269 = vector.broadcast %cst_119 : f32 to vector<1x1xf32>
    %270 = arith.addf %268, %269 : vector<1x1xf32>
    %271 = math.rsqrt %270 : vector<1x1xf32>
    %272 = vector.broadcast %271 : vector<1x1xf32> to vector<1x32xf32>
    %273 = arith.mulf %263, %272 : vector<1x32xf32>
    %274 = arith.mulf %273, %255 : vector<1x32xf32>
    %275 = arith.addf %274, %257 : vector<1x32xf32>
    %c0_120 = arith.constant 0 : index
    %c0_121 = arith.constant 0 : index
    %276 = vector.load %arg30[%c0_120, %c0_121] : memref<1x32xf32, #tpu.memory_space<vmem>>, vector<1x32xf32>
    tpu.vector_store %arg30[%c0_120, %c0_121], %275 {strides = array<i32>} : memref<1x32xf32, #tpu.memory_space<vmem>>, vector<1x32xf32>,
    %c5_i32 = arith.constant 5 : i32
    %277 = arith.cmpi eq, %arg1, %c5_i32 : i32
    %278 = arith.extui %277 : i1 to i32
    %c0_i32_122 = arith.constant 0 : i32
    %279 = arith.cmpi ne, %278, %c0_i32_122 : i32
    scf.if %279 {
      %c0_123 = arith.constant 0 : index
      %c0_124 = arith.constant 0 : index
      %280 = vector.load %arg3[%c0_123, %c0_124] : memref<1x32xf32, #tpu.memory_space<vmem>>, vector<1x32xf32>
      %c0_125 = arith.constant 0 : index
      %c0_126 = arith.constant 0 : index
      %281 = vector.load %arg4[%c0_125, %c0_126] : memref<1x32xf32, #tpu.memory_space<vmem>>, vector<1x32xf32>
      %cst_127 = arith.constant dense<0.000000e+00> : vector<1xf32>
      %282 = vector.multi_reduction <add>, %275, %cst_127 [1] : vector<1x32xf32> to vector<1xf32>
      %283 = vector.shape_cast %282 : vector<1xf32> to vector<1x1xf32>
      %cst_128 = arith.constant 3.200000e+01 : f32
      %284 = vector.broadcast %cst_128 : f32 to vector<1x1xf32>
      %285 = arith.divf %283, %284 : vector<1x1xf32>
      %286 = vector.broadcast %285 : vector<1x1xf32> to vector<1x32xf32>
      %287 = arith.subf %275, %286 : vector<1x32xf32>
      %288 = arith.mulf %287, %287 : vector<1x32xf32>
      %cst_129 = arith.constant dense<0.000000e+00> : vector<1xf32>
      %289 = vector.multi_reduction <add>, %288, %cst_129 [1] : vector<1x32xf32> to vector<1xf32>
      %290 = vector.shape_cast %289 : vector<1xf32> to vector<1x1xf32>
      %cst_130 = arith.constant 3.200000e+01 : f32
      %291 = vector.broadcast %cst_130 : f32 to vector<1x1xf32>
      %292 = arith.divf %290, %291 : vector<1x1xf32>
      %cst_131 = arith.constant 9.99999974E-6 : f32
      %293 = vector.broadcast %cst_131 : f32 to vector<1x1xf32>
      %294 = arith.addf %292, %293 : vector<1x1xf32>
      %295 = math.rsqrt %294 : vector<1x1xf32>
      %296 = vector.broadcast %295 : vector<1x1xf32> to vector<1x32xf32>
      %297 = arith.mulf %287, %296 : vector<1x32xf32>
      %298 = arith.mulf %297, %280 : vector<1x32xf32>
      %299 = arith.addf %298, %281 : vector<1x32xf32>
      %c0_132 = arith.constant 0 : index
      %c0_133 = arith.constant 0 : index
      %300 = vector.load %arg5[%c0_132, %c0_133] : memref<32x16xbf16, #tpu.memory_space<vmem>>, vector<32x16xbf16>
      %301 = arith.truncf %299 : vector<1x32xf32> to vector<1x32xbf16>
      %cst_134 = arith.constant dense<0.000000e+00> : vector<1x16xf32>
      %302 = tpu.matmul %301, %300, %cst_134 {dimension_numbers = #tpu.dot_dimension_numbers<[1], [0], [0], [1], [0, 0, 1, 1], [], []>} : vector<1x32xbf16>, vector<32x16xbf16>, vector<1x16xf32> -> vector<1x16xf32>
      %c0_135 = arith.constant 0 : index
      %c0_136 = arith.constant 0 : index
      %303 = vector.load %arg6[%c0_135, %c0_136] : memref<1x16xf32, #tpu.memory_space<vmem>>, vector<1x16xf32>
      %304 = arith.addf %302, %303 : vector<1x16xf32>
      %cst_137 = arith.constant 0.000000e+00 : f32
      %305 = vector.broadcast %cst_137 : f32 to vector<1x16xf32>
      %306 = arith.maximumf %304, %305 : vector<1x16xf32>
      %c0_138 = arith.constant 0 : index
      %c0_139 = arith.constant 0 : index
      %307 = vector.load %arg7[%c0_138, %c0_139] : memref<1x16xf32, #tpu.memory_space<vmem>>, vector<1x16xf32>
      %308 = arith.mulf %306, %307 : vector<1x16xf32>
      %cst_140 = arith.constant dense<0.000000e+00> : vector<1xf32>
      %309 = vector.multi_reduction <add>, %308, %cst_140 [1] : vector<1x16xf32> to vector<1xf32>
      %310 = vector.shape_cast %309 : vector<1xf32> to vector<1x1xf32>
      %c0_141 = arith.constant 0 : index
      %c0_142 = arith.constant 0 : index
      %311 = vector.load %arg8[%c0_141, %c0_142] : memref<1x1xf32, #tpu.memory_space<vmem>>, vector<1x1xf32>
      %312 = arith.addf %310, %311 : vector<1x1xf32>
      %c0_143 = arith.constant 0 : index
      %c0_144 = arith.constant 0 : index
      %c0_145 = arith.constant 0 : index
      %313 = vector.load %arg29[%c0_143, %c0_144, %c0_145] : memref<1x1x1xf32, #tpu.memory_space<vmem>>, vector<1x1x1xf32>
      %314 = vector.shape_cast %313 : vector<1x1x1xf32> to vector<1x1xf32>
      %315 = vector.shape_cast %312 : vector<1x1xf32> to vector<1x1x1xf32>
      tpu.vector_store %arg29[%c0_143, %c0_144, %c0_145], %315 {strides = array<i32>} : memref<1x1x1xf32, #tpu.memory_space<vmem>>, vector<1x1x1xf32>,
    } else {
    }
    return
  }
  func.func @transform_0(%arg0: i32, %arg1: i32) -> (i32, i32, i32) {
    %c0_i32 = arith.constant 0 : i32
    %c0_i32_0 = arith.constant 0 : i32
    %c0_i32_1 = arith.constant 0 : i32
    return %arg0, %c0_i32, %c0_i32_0 : i32, i32, i32
  }
  func.func @transform_1(%arg0: i32, %arg1: i32) -> (i32, i32) {
    %c0_i32 = arith.constant 0 : i32
    %c0_i32_0 = arith.constant 0 : i32
    %c0_i32_1 = arith.constant 0 : i32
    return %c0_i32, %c0_i32_0 : i32, i32
  }
  func.func @transform_2(%arg0: i32, %arg1: i32) -> (i32, i32) {
    %c0_i32 = arith.constant 0 : i32
    %c0_i32_0 = arith.constant 0 : i32
    %c0_i32_1 = arith.constant 0 : i32
    return %c0_i32, %c0_i32_0 : i32, i32
  }
  func.func @transform_3(%arg0: i32, %arg1: i32) -> (i32, i32) {
    %c0_i32 = arith.constant 0 : i32
    %c0_i32_0 = arith.constant 0 : i32
    %c0_i32_1 = arith.constant 0 : i32
    return %c0_i32, %c0_i32_0 : i32, i32
  }
  func.func @transform_4(%arg0: i32, %arg1: i32) -> (i32, i32) {
    %c0_i32 = arith.constant 0 : i32
    %c0_i32_0 = arith.constant 0 : i32
    %c0_i32_1 = arith.constant 0 : i32
    return %c0_i32, %c0_i32_0 : i32, i32
  }
  func.func @transform_5(%arg0: i32, %arg1: i32) -> (i32, i32) {
    %c0_i32 = arith.constant 0 : i32
    %c0_i32_0 = arith.constant 0 : i32
    %c0_i32_1 = arith.constant 0 : i32
    return %c0_i32, %c0_i32_0 : i32, i32
  }
  func.func @transform_6(%arg0: i32, %arg1: i32) -> (i32, i32) {
    %c0_i32 = arith.constant 0 : i32
    %c0_i32_0 = arith.constant 0 : i32
    %c0_i32_1 = arith.constant 0 : i32
    return %c0_i32, %c0_i32_0 : i32, i32
  }
  func.func @transform_7(%arg0: i32, %arg1: i32) -> (i32, i32, i32) {
    %c0_i32 = arith.constant 0 : i32
    %c0_i32_0 = arith.constant 0 : i32
    %c0_i32_1 = arith.constant 0 : i32
    return %arg1, %c0_i32, %c0_i32_0 : i32, i32, i32
  }
  func.func @transform_8(%arg0: i32, %arg1: i32) -> (i32, i32, i32) {
    %c0_i32 = arith.constant 0 : i32
    %c0_i32_0 = arith.constant 0 : i32
    %c0_i32_1 = arith.constant 0 : i32
    return %arg1, %c0_i32, %c0_i32_0 : i32, i32, i32
  }
  func.func @transform_9(%arg0: i32, %arg1: i32) -> (i32, i32, i32) {
    %c0_i32 = arith.constant 0 : i32
    %c0_i32_0 = arith.constant 0 : i32
    %c0_i32_1 = arith.constant 0 : i32
    return %arg1, %c0_i32, %c0_i32_0 : i32, i32, i32
  }
  func.func @transform_10(%arg0: i32, %arg1: i32) -> (i32, i32, i32) {
    %c0_i32 = arith.constant 0 : i32
    %c0_i32_0 = arith.constant 0 : i32
    %c0_i32_1 = arith.constant 0 : i32
    return %arg1, %c0_i32, %c0_i32_0 : i32, i32, i32
  }
  func.func @transform_11(%arg0: i32, %arg1: i32) -> (i32, i32, i32) {
    %c0_i32 = arith.constant 0 : i32
    %c0_i32_0 = arith.constant 0 : i32
    %c0_i32_1 = arith.constant 0 : i32
    return %arg1, %c0_i32, %c0_i32_0 : i32, i32, i32
  }
  func.func @transform_12(%arg0: i32, %arg1: i32) -> (i32, i32, i32) {
    %c0_i32 = arith.constant 0 : i32
    %c0_i32_0 = arith.constant 0 : i32
    %c0_i32_1 = arith.constant 0 : i32
    return %arg1, %c0_i32, %c0_i32_0 : i32, i32, i32
  }
  func.func @transform_13(%arg0: i32, %arg1: i32) -> (i32, i32, i32) {
    %c0_i32 = arith.constant 0 : i32
    %c0_i32_0 = arith.constant 0 : i32
    %c0_i32_1 = arith.constant 0 : i32
    return %arg1, %c0_i32, %c0_i32_0 : i32, i32, i32
  }
  func.func @transform_14(%arg0: i32, %arg1: i32) -> (i32, i32, i32) {
    %c0_i32 = arith.constant 0 : i32
    %c0_i32_0 = arith.constant 0 : i32
    %c0_i32_1 = arith.constant 0 : i32
    return %arg1, %c0_i32, %c0_i32_0 : i32, i32, i32
  }
  func.func @transform_15(%arg0: i32, %arg1: i32) -> (i32, i32, i32) {
    %c0_i32 = arith.constant 0 : i32
    %c0_i32_0 = arith.constant 0 : i32
    %c0_i32_1 = arith.constant 0 : i32
    return %arg1, %c0_i32, %c0_i32_0 : i32, i32, i32
  }
  func.func @transform_16(%arg0: i32, %arg1: i32) -> (i32, i32, i32) {
    %c0_i32 = arith.constant 0 : i32
    %c0_i32_0 = arith.constant 0 : i32
    %c0_i32_1 = arith.constant 0 : i32
    return %arg1, %c0_i32, %c0_i32_0 : i32, i32, i32
  }
  func.func @transform_17(%arg0: i32, %arg1: i32) -> (i32, i32, i32) {
    %c0_i32 = arith.constant 0 : i32
    %c0_i32_0 = arith.constant 0 : i32
    %c0_i32_1 = arith.constant 0 : i32
    return %arg1, %c0_i32, %c0_i32_0 : i32, i32, i32
  }
  func.func @transform_18(%arg0: i32, %arg1: i32) -> (i32, i32, i32) {
    %c0_i32 = arith.constant 0 : i32
    %c0_i32_0 = arith.constant 0 : i32
    %c0_i32_1 = arith.constant 0 : i32
    return %arg1, %c0_i32, %c0_i32_0 : i32, i32, i32
  }
  func.func @transform_19(%arg0: i32, %arg1: i32) -> (i32, i32, i32) {
    %c0_i32 = arith.constant 0 : i32
    %c0_i32_0 = arith.constant 0 : i32
    %c0_i32_1 = arith.constant 0 : i32
    return %arg1, %c0_i32, %c0_i32_0 : i32, i32, i32
  }
  func.func @transform_20(%arg0: i32, %arg1: i32) -> (i32, i32, i32) {
    %c0_i32 = arith.constant 0 : i32
    %c0_i32_0 = arith.constant 0 : i32
    %c0_i32_1 = arith.constant 0 : i32
    return %arg1, %c0_i32, %c0_i32_0 : i32, i32, i32
  }
  func.func @transform_21(%arg0: i32, %arg1: i32) -> (i32, i32, i32) {
    %c0_i32 = arith.constant 0 : i32
    %c0_i32_0 = arith.constant 0 : i32
    %c0_i32_1 = arith.constant 0 : i32
    return %arg1, %c0_i32, %c0_i32_0 : i32, i32, i32
  }
  func.func @transform_22(%arg0: i32, %arg1: i32) -> (i32, i32, i32) {
    %c0_i32 = arith.constant 0 : i32
    %c0_i32_0 = arith.constant 0 : i32
    %c0_i32_1 = arith.constant 0 : i32
    return %arg1, %c0_i32, %c0_i32_0 : i32, i32, i32
  }
  func.func @transform_23(%arg0: i32, %arg1: i32) -> (i32, i32, i32) {
    %c0_i32 = arith.constant 0 : i32
    %c0_i32_0 = arith.constant 0 : i32
    %c0_i32_1 = arith.constant 0 : i32
    return %arg1, %c0_i32, %c0_i32_0 : i32, i32, i32
  }
  func.func @transform_24(%arg0: i32, %arg1: i32) -> (i32, i32, i32) {
    %c0_i32 = arith.constant 0 : i32
    %c0_i32_0 = arith.constant 0 : i32
    %c0_i32_1 = arith.constant 0 : i32
    return %arg1, %c0_i32, %c0_i32_0 : i32, i32, i32
  }
  func.func @transform_25(%arg0: i32, %arg1: i32) -> (i32, i32, i32) {
    %c0_i32 = arith.constant 0 : i32
    %c0_i32_0 = arith.constant 0 : i32
    %c0_i32_1 = arith.constant 0 : i32
    return %arg1, %c0_i32, %c0_i32_0 : i32, i32, i32
  }
  func.func @transform_26(%arg0: i32, %arg1: i32) -> (i32, i32, i32) {
    %c0_i32 = arith.constant 0 : i32
    %c0_i32_0 = arith.constant 0 : i32
    %c0_i32_1 = arith.constant 0 : i32
    return %arg1, %c0_i32, %c0_i32_0 : i32, i32, i32
  }
  func.func @transform_27(%arg0: i32, %arg1: i32) -> (i32, i32, i32) {
    %c0_i32 = arith.constant 0 : i32
    %c0_i32_0 = arith.constant 0 : i32
    %c0_i32_1 = arith.constant 0 : i32
    return %arg0, %c0_i32, %c0_i32_0 : i32, i32, i32
  }
}

</mosaic_0001>

<bundles_post_ra>
// kernel: value_net_forward.2
= control target key start
LH: loop header
LB: loop body
LE: loop exit
PB: predicated region body
PF: predicated region fallthrough
CT: control target
= control target key end

     0   :  { %s2955_s0 = inlined_call_operand.vmem [shape: f32[2,8,32], index: 0, kind: input, shape index: {}]   ;;  %s2956_s1 = inlined_call_operand.vmem [shape: f32[8,32], index: 1, kind: input, shape index: {}]   ;;  %s2957_s2 = inlined_call_operand.vmem [shape: f32[1,32], index: 2, kind: input, shape index: {}]   ;;  %s2958_s3 = inlined_call_operand.hbm [shape: f32[1,32], index: 3, kind: input, shape index: {}]   ;;  %s2959_s4 = inlined_call_operand.vmem [shape: bf16[6,32,96], index: 4, kind: input, shape index: {}]   ;;  %s2960_s5 = inlined_call_operand.vmem [shape: f32[6,1,96], index: 5, kind: input, shape index: {}]   ;;  %s2961_s6 = inlined_call_operand.vmem [shape: bf16[6,32,32], index: 6, kind: input, shape index: {}]   ;;  %s2962_s7 = inlined_call_operand.vmem [shape: f32[6,1,32], index: 7, kind: input, shape index: {}]   ;;  %s2963_s8 = inlined_call_operand.vmem [shape: f32[6,1,32], index: 8, kind: input, shape index: {}]   ;;  %s2964_s9 = inlined_call_operand.hbm [shape: f32[6,1,32], index: 9, kind: input, shape index: {}]   ;;  %s2965_s10 = inlined_call_operand.vmem [shape: bf16[6,32,64], index: 10, kind: input, shape index: {}]   ;;  %s2966_s11 = inlined_call_operand.vmem [shape: f32[6,1,64], index: 11, kind: input, shape index: {}]   ;;  %s2967_s12 = inlined_call_operand.vmem [shape: bf16[6,64,32], index: 12, kind: input, shape index: {}]   ;;  %s2968_s13 = inlined_call_operand.hbm [shape: f32[6,1,32], index: 13, kind: input, shape index: {}]   ;;  %s2969_s14 = inlined_call_operand.hbm [shape: f32[6,1,32], index: 14, kind: input, shape index: {}]   ;;  %s2970_s15 = inlined_call_operand.hbm [shape: f32[6,1,32], index: 15, kind: input, shape index: {}]   ;;  %s2971_s16 = inlined_call_operand.vmem [shape: f32[2,8,32], index: 16, kind: output, shape index: {}]  }
   0x1   :  { %2978 = sst [smem:[#allocation21_spill]] %s2955_s0 }
   0x2   :  { %2979 = sst [smem:[#allocation22_spill]] %s2956_s1 }
   0x3   :  { %2980 = sst [smem:[#allocation23_spill]] %s2957_s2 }
   0x4   :  { %2981 = sst [smem:[#allocation24_spill]] %s2958_s3 }
   0x5   :  { %2982 = sst [smem:[#allocation25_spill]] %s2959_s4 }
   0x6   :  { %2983 = sst [smem:[#allocation26_spill]] %s2960_s5 }
   0x7   :  { %2984 = sst [smem:[#allocation27_spill]] %s2961_s6 }
   0x8   :  { %2985 = sst [smem:[#allocation28_spill]] %s2963_s8 }
   0x9   :  { %2986 = sst [smem:[#allocation29_spill]] %s2964_s9 }
   0xa   :  { %2987 = sst [smem:[#allocation30_spill]] %s2965_s10 }
   0xb   :  { %2988 = sst [smem:[#allocation31_spill]] %s2966_s11 }
   0xc   :  { %2989 = sst [smem:[#allocation32_spill]] %s2967_s12 }
   0xd   :  { %2990 = sst [smem:[#allocation33_spill]] %s2968_s13 }
   0xe   :  { %2991 = sst [smem:[#allocation34_spill]] %s2969_s14 }
   0xf   :  { %2992 = sst [smem:[#allocation35_spill]] %s2970_s15 }
  0x10   :  { %2993 = sst [smem:[#allocation36_spill]] %s2971_s16 }
  0x11   :  { %21 = vsyncpa [#allocation4], 0 }
  0x12   :  { %22 = vsyncpa [#allocation6], 0 }
  0x13   :  { %24 = vsyncpa [#allocation6 + $0x1], 0 }
  0x14   :  { %25 = vsyncpa [#allocation9], 0 }
  0x15   :  { %27 = vsyncpa [#allocation9 + $0x1], 0  ;;  %s2548_s21 = smov 0   ;;  %s2550_s22 = smov 0  }
  0x16   :  { %s2552_s23 = smov 0   ;;  %s2554_s24 = smov 0  }
  0x17   :  { %s2556_s25 = smov 0   ;;  %s2558_s26 = smov 0  }
  0x18   :  { %s2560_s27 = smov 0   ;;  %s2562_s28 = smov 0  }
  0x19 LB: > { %2994 = sst [smem:[#allocation14_spill]] %s2405_s22  ;;  %s42_s29 = sadd.s32 1, %s2421_s26  ;;  %s2429_s28 = sphi %s2562_s28, %s33_s28   ;;  %s2425_s27 = sphi %s2560_s27, %s3035_s27   ;;  %s2421_s26 = sphi %s2558_s26, %s3034_s26   ;;  %s2417_s25 = sphi %s2556_s25, %s3033_s25   ;;  %s2413_s24 = sphi %s2554_s24, %s3032_s24   ;;  %s2409_s23 = sphi %s2552_s23, %s3031_s23   ;;  %s2405_s22 = sphi %s2550_s22, %s3030_s22   ;;  %s2401_s21 = sphi %s2548_s21, %s3029_s21  }
  0x1a   : > { %2995 = sst [smem:[#allocation15_spill]] %s2409_s23  ;;  %s45_s30 = sadd.s32 1, %s2425_s27 }
  0x1b   : > { %2996 = sst [smem:[#allocation16_spill]] %s2421_s26  ;;  %p43_p0 = scmp.ge.s32.totalorder %s42_s29, 6 }
  0x1c   : > { %2997 = sst [smem:[#allocation17_spill]] %s2425_s27  ;;  %s271_s0 = sadd.s32 1, %s2409_s23 }
  0x1d   : > { %p278_p1 = scmp.ne.s32.totalorder %s2409_s23, %s2405_s22  ;;  %p279_p2 = scmp.eq.s32.totalorder %s2429_s28, 0 }
  0x1e   : > { %s3037_s29 = smov (%p43_p0, %s42_s29), 0  ;;  %s3039_s30 = smov (!%p43_p0, %s45_s30), %s2425_s27 }
  0x1f   : > { %2998 = sst [smem:[#allocation18_spill]] %s3037_s29  ;;  %s268_s17 = ssub.s32 %s2421_s26, %s3037_s29 }
  0x20   : > { %p2599_p3 = por %p279_p2, %p278_p1  ;;  %p47_p4 = scmp.ge.s32.totalorder %s3039_s30, 2 }
  0x21   : > { %p269_p5 = scmp.eq.s32.totalorder %s268_s17, 0  ;;  %p2057_p6 = scmp.lt.s32.totalorder %s2429_s28, 12 }
  0x22   : > { %s3041_s30 = smov (%p47_p4, %s3039_s30), 0  ;;  %s549_s20 = sand.u32 1, %s2429_s28  }
  0x23   : > { %3000 = sst [smem:[#allocation19_spill]] %s3041_s30  ;;  %s2611_s2 = sand.u32 1, %s2409_s23  }
  0x24   : > { %s2607_s19 = scalar_select %p269_p5, %s2409_s23, %s271_s0  }
  0x25   : > { %s3002_s9 = sld [smem:[#allocation29_spill]]  ;;  %s552_s27 = scalar_lea.vmem [#allocation5], %s2611_s2 }
  0x26   : > { %3001 = sst [smem:[#allocation20_spill]] %s2607_s19  ;;  %s559_s12 = sshll.u32 %s552_s27, 4  ;;  %s560_s12 = int_to_ptr.vmem [resolvable:$true] %s559_s12 }
  0x27   : > { %p2620_p7 = pnand %p2057_p6, %p2599_p3  ;;  %s3004_s14 = sld [smem:[#allocation34_spill]] }
  0x28   : > { %s2628_s27 = scalar_lea.sflag [#allocation6], %s549_s20  ;;  %s608_s30 = scalar_lea.vmem [#allocation8], %s2611_s2 }
  0x29   : > { %s615_s19 = sshll.u32 %s608_s30, 4  ;;  %s2634_s18 = scalar_lea.sflag [#allocation9], %s549_s20  ;;  %s616_s19 = int_to_ptr.vmem [resolvable:$true] %s615_s19 }
  0x2a   : > { %s2974_s1 = sadd.s32 4294967295, %s2429_s28   ;;  %p284_p8 = scmp.ne.s32.totalorder %s2405_s22, %s2401_s21 }
  0x2b   : > { %s555_s29 = scalar_lea.hbm %s3002_s9, %s2421_s26  ;;  %p2644_p9 = scmp.eq.s32.totalorder %s2974_s1, 0 }
  0x2c   : > { %s557_s17 = sshll.u32 %s555_s29, 4  ;;  %p1934_p10 = scmp.ge.s32.totalorder %s2429_s28, 1  ;;  %s558_s17 = int_to_ptr.hbm [resolvable:$true] %s557_s17 }
  0x2d   : > { %s611_s9 = scalar_lea.hbm %s3004_s14, %s2421_s26  ;;  %p477_p11 = scmp.lt.s32.totalorder %s2429_s28, 13 }
  0x2e   : > { %2046 = dma.hbm_to_vmem [thread:$0]  (!%p2620_p7), %s558_s17, 16, %s560_s12, %s2628_s27  }
  0x2f   : > { %s613_s29 = sshll.u32 %s611_s9, 4  ;;  %p2652_p12 = por %p2644_p9, %p284_p8  ;;  %s614_s29 = int_to_ptr.hbm [resolvable:$true] %s613_s29 }
  0x30   : > { %2052 = dma.hbm_to_vmem [thread:$0]  (!%p2620_p7), %s614_s29, 16, %s616_s19, %s2634_s18  }
  0x31   : > { %s3007_s3 = sld [smem:[#allocation24_spill]]  ;;  %p2659_p13 = pnand %p1934_p10, %p477_p11 }
  0x32   : > { %s2431_s20 = smov [#allocation3]   ;;  %s3009_s13 = sld [smem:[#allocation33_spill]] }
  0x33   : > { %p2039_p0 = pneg %p2659_p13  ;;  %s497_s17 = sshll.u32 %s2431_s20, 4  ;;  %s498_s17 = int_to_ptr.vmem [resolvable:$true] %s497_s17 }
  0x34   : > { %s3010_s15 = sld [smem:[#allocation35_spill]]  ;;  %s625_s8 = scalar_lea.vmem [#allocation10], %s2611_s2 }
  0x35   : > { %p2040_p1 = pnand %p2039_p0, %p2644_p9  ;;  %s632_s1 = sshll.u32 %s625_s8, 4  ;;  %s633_s1 = int_to_ptr.vmem [resolvable:$true] %s632_s1 }
  0x37   : > { %s495_s21 = sshll.u32 %s3007_s3, 4  ;;  %s591_s3 = scalar_lea.vmem [#allocation7], %s2611_s2  ;;  %s496_s21 = int_to_ptr.hbm [resolvable:$true] %s495_s21 }
  0x38   : > { %s594_s12 = scalar_lea.hbm %s3009_s13, %s2421_s26  ;;  %s598_s14 = sshll.u32 %s591_s3, 4  ;;  %s599_s14 = int_to_ptr.vmem [resolvable:$true] %s598_s14 }
  0x39   : > { %s596_s30 = sshll.u32 %s594_s12, 4  ;;  %s597_s30 = int_to_ptr.hbm [resolvable:$true] %s596_s30 }
  0x3a   : > { %2042 = dma.hbm_to_vmem [thread:$0]  (!%p2040_p1), %s496_s21, 16, %s498_s17, [#allocation4]  }
  0x3b   : > { %2049 = dma.hbm_to_vmem [thread:$0]  (!%p2620_p7), %s597_s30, 16, %s599_s14, %s2628_s27  }
  0x3c   : > { %s628_s20 = scalar_lea.hbm %s3010_s15, %s2421_s26  ;;  %641 = sbr.rel (%p2659_p13) target bundleno = 2322 (0x912), region = 84 }
  0x3d   : > { %s630_s10 = sshll.u32 %s628_s20, 4  ;;  %s631_s10 = int_to_ptr.hbm [resolvable:$true] %s630_s10 }
  0x3e   : > { %2055 = dma.hbm_to_vmem [thread:$0]  (!%p2620_p7), %s631_s10, 16, %s633_s1, %s2634_s18  }
  0x41   : > { %2388 = dma.done.wait (%p2644_p9), [#allocation4], 16  }
  0x42   : > { %2390 = vsyncadd (%p2644_p9), [#allocation4], 4294967280  ;;  %s3011_s3 = sadd.s32 4294967295, %s2429_s28   ;;  %s2692_s2 = sand.u32 1, %s2405_s22  }
  0x43   : > { %s648_s11 = sand.u32 1, %s3011_s3  }
  0x44   : > { %s649_s8 = scalar_lea.sflag [#allocation6], %s648_s11 }
  0x45   : > { %2392 = dma.done.wait (%p2652_p12), %s649_s8, 32  }
  0x46   : > { %2394 = vsyncadd (%p2652_p12), %s649_s8, 4294967264  ;;  %s667_s23 = scalar_lea.sflag [#allocation9], %s648_s11 }
  0x47   : > { %2396 = dma.done.wait (%p2652_p12), %s667_s23, 32  }
  0x48   : > { %2398 = vsyncadd (%p2652_p12), %s667_s23, 4294967264  ;;  %p774_p2 = scmp.lt.s32.totalorder %s2417_s25, 1  ;;  %p778_p3 = scmp.lt.s32.totalorder %s2413_s24, 5 }
  0x49   : > { %s3012_s21 = sld [smem:[#allocation21_spill]]  ;;  %s678_s9 = scalar_lea.vmem [#allocation10], %s2692_s2 }
  0x4a   : > { %s3043_s25 = smov (!%p774_p2, %s2417_s25), 1  ;;  %s3013_s4 = sld [smem:[#allocation25_spill]] }
  0x4b   : > { %s2709_s27 = scalar_select %p778_p3, %s2413_s24, 5 }
  0x4c   : > { %s1939_s18 = sshll.u32 %s3043_s25, 3  ;;  %s3014_s5 = sld [smem:[#allocation26_spill]] }
  0x4d   : > { %s2013_s17 = sshll.u32 %s2709_s27, 4  ;;  %s3015_s6 = sld [smem:[#allocation27_spill]] }
  0x4e   : > { %s3017_s12 = sld [smem:[#allocation30_spill]]  ;;  %s2016_s11 = sshll.u32 %s2709_s27, 5 }
  0x4f   : > { %s777_s19 = scalar_lea.vmem %s3012_s21, %s1939_s18  ;;  %s3016_s21 = sld [smem:[#allocation28_spill]] }
  0x50   : > { %s782_s30 = scalar_lea.vmem %s3013_s4, %s2013_s17  ;;  %s3019_s26 = sld [smem:[#allocation32_spill]] }
  0x51   : > { %s3020_s10 = sld [smem:[#allocation36_spill]]  ;;  %p1949_p4 = scmp.ne.s32.totalorder %s2413_s24, 0 }
  0x52   : > { %s785_s3 = scalar_lea.vmem %s3014_s5, %s2709_s27  ;;  %s3018_s5 = sld [smem:[#allocation31_spill]] }
  0x53   : > { %s2725_s23 = scalar_lea.vmem %s3015_s6, %s2013_s17 }
  0x54   : > { %s2738_s4 = scalar_lea.vmem %s3017_s12, %s2013_s17  ;;  %818 = sbr.rel (%p1949_p4) target bundleno = 95 (0x5f), region = 108 }
  0x55   : > { %s796_s14 = scalar_lea.vmem %s3016_s21, %s2709_s27  ;;  %s3021_s21 = sld [smem:[#allocation22_spill]] (!%p1949_p4) }
  0x56   : > { %s2748_s22 = scalar_lea.vmem %s3019_s26, %s2016_s11 }
  0x57   : > { %s2753_s16 = scalar_lea.vmem %s3020_s10, %s1939_s18 }
  0x58   : > { %s804_s15 = scalar_lea.vmem %s3018_s5, %s2709_s27 }
  0x59   : > { %v819_v0 = vld [vmem:[%s777_s19] sm:$0xff]  ;;  %vm822_vm0 = vcmask 261120  }
  0x5b   : > { %v820_v1 = vld [vmem:[%s3021_s21] sm:$0xff] }
  0x5c   : > { %v821_v2 = vadd.f32 %v820_v1, %v819_v0 }
  0x5e   : > { %823 = vst.msk [vmem:[#allocation2] sm:$0xff] %vm822_vm0, %v821_v2 }
  0x5f PF: > { %v2018_v3 = vld [vmem:[%s782_s30 + $0x8] sm:$0xff]  ;;  %v2017_v4 = vld [vmem:[%s782_s30] sm:$0xff]  ;;  %vm846_vm1 = vcmask 261120   ;;  %s2432_s5 = smov 96   ;;  %s2433_s6 = smov 116   ;;  %vm869_vm2 = vcmask 31744  }
  0x60   : > { %856 = vmatpush.bf16.msra.mxu0 %v2018_v3  ;;  %v2155_v7 = vld [vmem:[%s785_s3] ss:$0 sm:$0xff]  ;;  %s2434_s26 = smov 124   ;;  %s2435_s10 = smov 92   ;;  %vm920_vm3 = vcmask 1043456   ;;  %vm889_vm4 = vcmask 64512  }
  0x61   : > { %s2436_s18 = smov 88   ;;  %s2437_s19 = smov 84  }
  0x62   : > { %s2438_s30 = smov 76   ;;  %s2439_s3 = smov 108  }
  0x63   : > { %s2440_s29 = smov 120   ;;  %s2441_s12 = smov 80  }
  0x64   : > { %857 = vmatpush.bf16.msra.mxu0 %v2017_v4  ;;  %s2442_s20 = smov 112   ;;  %s2443_s1 = smov 68  }
  0x65   : > { %v2760_v5 = vld [vmem:[#allocation2] sm:$0xff]  ;;  %s2444_s11 = smov 100   ;;  %s2445_s8 = smov 104  }
  0x66   : > { %v829_v6 = vpack.c.bf16 %v2760_v5, %v2760_v5  ;;  %s2446_s0 = smov 72   ;;  %s2447_s25 = smov 64  }
  0x67   : > { %s2448_s13 = smov 44   ;;  %s2449_s17 = smov 60  }
  0x68   : > { %1958 = vmatmul.msk.bf16.vlgmr.msra.gmra.mxu0 %vm846_vm1, %v829_v6  ;;  %s2450_s21 = smov 52   ;;  %p2010_p5 = scmp.ne.s32.totalorder %s2413_s24, 5 }
  0xe5   : > { %v859_v8 = vpop.f32.mrf.mxu0 }
  0xe6   : > { %v860_v9 = vadd.f32 %v2155_v7, %v859_v8 }
  0xe8   : > { %v863_v10 = vmul.f32 0.5, %v860_v9  ;;  %v2765_v11 = vpack.c.bf16 %v860_v9, %v860_v9 }
  0xea   : > { %v864_v12 = vpack.c.bf16 %v863_v10, %v863_v10  ;;  %867 = vrot.lane.b32.xlu0 %v2765_v11, %s2432_s5  ;;  %s2451_s5 = smov 56  }
  0xec   : > { %1076 = vrot.lane.b32.xlu2 %v864_v12, %s2433_s6  ;;  %938 = vrot.lane.b32.xlu1 %v864_v12, %s2434_s26  ;;  %s2452_s6 = smov 48   ;;  %s2453_s26 = smov 36  }
  0xed   : > { %v861_v13 = vpop.f32.mrf.mxu0 }
  0xf2   : > { %940 = vrot.lane.b32.xlu0 %v2765_v11, %s2435_s10  ;;  %s2454_s10 = smov 40  }
  0xf4   : > { %1009 = vrot.lane.b32.xlu2 %v2765_v11, %s2436_s18  ;;  %1078 = vrot.lane.b32.xlu1 %v2765_v11, %s2437_s19  ;;  %s2455_s18 = smov 8   ;;  %s2456_s19 = smov 16  }
  0xfa   : > { %1216 = vrot.lane.b32.xlu0 %v2765_v11, %s2438_s30  ;;  %s2457_s30 = smov 4  }
  0xfc   : > { %1214 = vrot.lane.b32.xlu2 %v864_v12, %s2439_s3  ;;  %1007 = vrot.lane.b32.xlu1 %v864_v12, %s2440_s29  ;;  %s2458_s3 = smov 12   ;;  %s2459_s29 = smov 24  }
 0x102   : > { %1147 = vrot.lane.b32.xlu0 %v2765_v11, %s2441_s12  ;;  %s2460_s12 = smov 20  }
 0x104   : > { %1145 = vrot.lane.b32.xlu2 %v864_v12, %s2442_s20  ;;  %1354 = vrot.lane.b32.xlu1 %v2765_v11, %s2443_s1  ;;  %s2461_s20 = smov 28  }
 0x10a   : > { %1352 = vrot.lane.b32.xlu0 %v864_v12, %s2444_s11  ;;  %s3022_s11 = scalar_lea.vmem %s2962_s7, %s2709_s27 }
 0x10c   : > { %1283 = vrot.lane.b32.xlu2 %v864_v12, %s2445_s8  ;;  %1285 = vrot.lane.b32.xlu1 %v2765_v11, %s2446_s0 }
 0x112   : > { %915 = vrot.lane.b32.xlu0 %v2765_v11, %s2447_s25  ;;  %s3024_s25 = scalar_lea.vmem [#allocation5], %s2692_s2 }
 0x146   : > { %v1077_v14 = vpop.permute.xlu2 %1076 }
 0x14e   : > { %v1010_v15 = vpop.permute.xlu2 %1009 }
 0x14f   : > { %v1015_v16 = vsel %vm869_vm2, %v1010_v15, 0 }
 0x150   : > { %1024 = vmatpush.bf16.xpose.msrb.mxu0 %v1015_v16 }
 0x156   : > { %v1215_v27 = vpop.permute.xlu2 %1214 }
 0x15c   : > { %v868_v17 = vpop.permute.xlu0 %867 }
 0x15d   : > { %v874_v18 = vsel %vm869_vm2, %v868_v17, 0 }
 0x15e   : > { %883 = vmatpush.bf16.xpose.msra.mxu1 %v874_v18  ;;  %v939_v19 = vpop.permute.xlu1 %938  ;;  %v1146_v33 = vpop.permute.xlu2 %1145 }
 0x164   : > { %v941_v20 = vpop.permute.xlu0 %940 }
 0x165   : > { %1959 = vmatmul.msk.bf16.vlgmr.msra.gmra.mxu1 %vm869_vm2, %v864_v12  ;;  %v946_v21 = vsel %vm869_vm2, %v941_v20, 0 }
 0x166   : > { %955 = vmatpush.bf16.xpose.msra.mxu3 %v946_v21  ;;  %v1079_v22 = vpop.permute.xlu1 %1078  ;;  %v1284_v38 = vpop.permute.xlu2 %1283 }
 0x167   : > { %v1084_v23 = vsel %vm869_vm2, %v1079_v22, 0 }
 0x16c   : > { %v1217_v24 = vpop.permute.xlu0 %1216 }
 0x16d   : > { %v1222_v25 = vsel %vm869_vm2, %v1217_v24, 0  ;;  %1961 = vmatmul.msk.bf16.vlgmr.msra.gmra.mxu3 %vm869_vm2, %v939_v19 }
 0x16e   : > { %1093 = vmatpush.bf16.xpose.msrb.mxu3 %v1084_v23  ;;  %v1008_v26 = vpop.permute.xlu1 %1007 }
 0x16f   : > { %1963 = vmatmul.msk.bf16.vlgmr.msrb.gmra.mxu0 %vm869_vm2, %v1008_v26 }
 0x174   : > { %v1148_v28 = vpop.permute.xlu0 %1147 }
 0x175   : > { %v1153_v29 = vsel %vm869_vm2, %v1148_v28, 0 }
 0x176   : > { %1231 = vmatpush.bf16.xpose.msra.mxu3 %v1222_v25  ;;  %1162 = vmatpush.bf16.xpose.msra.mxu0 %v1153_v29  ;;  %v1355_v30 = vpop.permute.xlu1 %1354 }
 0x177   : > { %v1360_v32 = vsel %vm869_vm2, %v1355_v30, 0 }
 0x17c   : > { %v1353_v31 = vpop.permute.xlu0 %1352 }
 0x17d   : > { %1965 = vmatmul.msk.bf16.vlgmr.msrb.gmra.mxu3 %vm869_vm2, %v1077_v14 }
 0x17e   : > { %1369 = vmatpush.bf16.xpose.msrb.mxu3 %v1360_v32  ;;  %v1286_v34 = vpop.permute.xlu1 %1285 }
 0x17f   : > { %v1291_v35 = vsel %vm869_vm2, %v1286_v34, 0  ;;  %1967 = vmatmul.msk.bf16.vlgmr.msra.gmra.mxu0 %vm869_vm2, %v1146_v33 }
 0x180   : > { %1300 = vmatpush.bf16.xpose.msrb.mxu0 %v1291_v35 }
 0x184   : > { %v916_v36 = vpop.permute.xlu0 %915 }
 0x185   : > { %v922_v37 = vsel %vm920_vm3, %v916_v36, 0 }
 0x186   : > { %931 = vmatpush.bf16.msra.mxu2 %v922_v37 }
 0x18d   : > { %1969 = vmatmul.msk.bf16.vlgmr.msra.gmra.mxu3 %vm869_vm2, %v1215_v27 }
 0x18f   : > { %1971 = vmatmul.msk.bf16.vlgmr.msrb.gmra.mxu0 %vm869_vm2, %v1284_v38 }
 0x19d   : > { %1973 = vmatmul.msk.bf16.vlgmr.msrb.gmra.mxu3 %vm869_vm2, %v1353_v31 }
 0x1e2   : > { %v885_v39 = vpop.f32.mrf.mxu1 }
 0x1e3   : > { %v890_v40 = vsel %vm889_vm4, %v885_v39, -inf }
 0x1e4   : > { %891 = vmax.xlane.f32.xlu0 %v890_v40 }
 0x1ea   : > { %v887_v41 = vpop.f32.mrf.mxu1 }
 0x1ec   : > { %v1026_v42 = vpop.f32.mrf.mxu0 }
 0x1ed   : > { %v1030_v43 = vsel %vm889_vm4, %v1026_v42, -inf }
 0x1ee   : > { %1031 = vmax.xlane.f32.xlu2 %v1030_v43 }
 0x1f0   : > { %v957_v44 = vpop.f32.mrf.mxu3 }
 0x1f1   : > { %v961_v45 = vsel %vm889_vm4, %v957_v44, -inf }
 0x1f2   : > { %962 = vmax.xlane.f32.xlu1 %v961_v45 }
 0x1f4   : > { %v1028_v46 = vpop.f32.mrf.mxu0 }
 0x1f8   : > { %v959_v47 = vpop.f32.mrf.mxu3 }
 0x1fc   : > { %v1164_v48 = vpop.f32.mrf.mxu0 }
 0x1fd   : > { %v1168_v49 = vsel %vm889_vm4, %v1164_v48, -inf }
 0x1fe   : > { %1169 = vmax.xlane.f32.xlu2 %v1168_v49 }
 0x200   : > { %v1095_v50 = vpop.f32.mrf.mxu3 }
 0x201   : > { %v1099_v52 = vsel %vm889_vm4, %v1095_v50, -inf }
 0x204   : > { %v1166_v51 = vpop.f32.mrf.mxu0 }
 0x206   : > { %1100 = vmax.xlane.f32.xlu2 %v1099_v52 }
 0x208   : > { %v1097_v53 = vpop.f32.mrf.mxu3 }
 0x20b   : > { %1262 = vrot.lane.b32.xlu1 %v2765_v11, %s2448_s13 }
 0x20c   : > { %v1302_v54 = vpop.f32.mrf.mxu0 }
 0x20d   : > { %v1306_v55 = vsel %vm889_vm4, %v1302_v54, -inf }
 0x20e   : > { %1307 = vmax.xlane.f32.xlu2 %v1306_v55 }
 0x210   : > { %v2800_v56 = vpop.f32.mrf.mxu3 }
 0x211   : > { %v1237_v57 = vsel %vm889_vm4, %v2800_v56, -inf }
 0x212   : > { %1238 = vmax.xlane.f32.xlu0 %v1237_v57 }
 0x214   : > { %v1304_v58 = vpop.f32.mrf.mxu0 }
 0x218   : > { %v1235_v59 = vpop.f32.mrf.mxu3 }
 0x220   : > { %v2804_v60 = vpop.f32.mrf.mxu3 }
 0x221   : > { %v1375_v62 = vsel %vm889_vm4, %v2804_v60, -inf }
 0x226   : > { %986 = vrot.lane.b32.xlu2 %v2765_v11, %s2449_s17  ;;  %1124 = vrot.lane.b32.xlu0 %v2765_v11, %s2450_s21 }
 0x228   : > { %v1373_v61 = vpop.f32.mrf.mxu3 }
 0x250   : > { %1376 = vmax.xlane.f32.xlu0 %v1375_v62 }
 0x257   : > { %v892_v63 = vpop.xlane.xlu0 %891 }
 0x258   : > { %v893_v0 = vsub.f32 %v885_v39, %v892_v63 }
 0x25a   : > { %v894_v1 = vmul.f32 1.442695, %v893_v0 }
 0x25c   : > { %2163 = vpow2.f32 %v894_v1 }
 0x261   : > { %v1032_v2 = vpop.xlane.xlu2 %1031 }
 0x262   : > { %v2810_v3 = vpop.eup %2163  ;;  %v1033_v4 = vsub.f32 %v1026_v42, %v1032_v2 }
 0x263   : > { %v896_v6 = vsel %vm889_vm4, %v2810_v3, 0.0 }
 0x264   : > { %v1034_v7 = vmul.f32 1.442695, %v1033_v4  ;;  %1055 = vrot.lane.b32.xlu0 %v2765_v11, %s2451_s5  ;;  %897 = vadd.xlane.f32.xlu1 %v896_v6 }
 0x265   : > { %v963_v8 = vpop.xlane.xlu1 %962 }
 0x266   : > { %2165 = vpow2.f32 %v1034_v7  ;;  %v964_v9 = vsub.f32 %v957_v44, %v963_v8 }
 0x268   : > { %v965_v10 = vmul.f32 1.442695, %v964_v9 }
 0x26a   : > { %2167 = vpow2.f32 %v965_v10 }
 0x26c   : > { %v2815_v12 = vpop.eup %2165 }
 0x26d   : > { %v1036_v13 = vsel %vm889_vm4, %v2815_v12, 0.0 }
 0x26e   : > { %1037 = vadd.xlane.f32.xlu1 %v1036_v13 }
 0x270   : > { %v2819_v15 = vpop.eup %2167 }
 0x271   : > { %v1170_v14 = vpop.xlane.xlu2 %1169  ;;  %v967_v18 = vsel %vm889_vm4, %v2819_v15, 0.0 }
 0x272   : > { %v1171_v16 = vsub.f32 %v1164_v48, %v1170_v14 }
 0x274   : > { %v1172_v17 = vmul.f32 1.442695, %v1171_v16 }
 0x276   : > { %2169 = vpow2.f32 %v1172_v17  ;;  %968 = vadd.xlane.f32.xlu1 %v967_v18 }
 0x279   : > { %v1101_v19 = vpop.xlane.xlu2 %1100 }
 0x27a   : > { %v1102_v20 = vsub.f32 %v1095_v50, %v1101_v19 }
 0x27c   : > { %v2823_v21 = vpop.eup %2169  ;;  %v1103_v22 = vmul.f32 1.442695, %v1102_v20 }
 0x27d   : > { %v1174_v23 = vsel %vm889_vm4, %v2823_v21, 0.0  ;;  %v2845_v43 = vpop.permute.xlu1 %1262 }
 0x27e   : > { %2171 = vpow2.f32 %v1103_v22  ;;  %1175 = vadd.xlane.f32.xlu1 %v1174_v23 }
 0x281   : > { %v1308_v24 = vpop.xlane.xlu2 %1307 }
 0x282   : > { %v1309_v25 = vsub.f32 %v1302_v54, %v1308_v24 }
 0x284   : > { %v2827_v26 = vpop.eup %2171  ;;  %v1310_v27 = vmul.f32 1.442695, %v1309_v25 }
 0x285   : > { %v1105_v28 = vsel %vm889_vm4, %v2827_v26, 0.0  ;;  %v1239_v33 = vpop.xlane.xlu0 %1238 }
 0x286   : > { %2173 = vpow2.f32 %v1310_v27  ;;  %1106 = vadd.xlane.f32.xlu1 %v1105_v28  ;;  %v1240_v34 = vsub.f32 %v2800_v56, %v1239_v33 }
 0x288   : > { %v1241_v35 = vmul.f32 1.442695, %v1240_v34  ;;  %v1268_v34 = vsel %vm920_vm3, %v2845_v43, 0 }
 0x289   : > { %v987_v29 = vpop.permute.xlu2 %986 }
 0x28a   : > { %v992_v30 = vsel %vm920_vm3, %v987_v29, 0  ;;  %2175 = vpow2.f32 %v1241_v35 }
 0x28b   : > { %1001 = vmatpush.bf16.msrb.mxu2 %v992_v30 }
 0x28c   : > { %v2832_v31 = vpop.eup %2173 }
 0x28d   : > { %v1312_v32 = vsel %vm889_vm4, %v2832_v31, 0.0 }
 0x28e   : > { %1313 = vadd.xlane.f32.xlu0 %v1312_v32 }
 0x290   : > { %v2839_v39 = vpop.eup %2175 }
 0x291   : > { %v1243_v41 = vsel %vm889_vm4, %v2839_v39, 0.0 }
 0x298   : > { %v1125_v36 = vpop.permute.xlu0 %1124 }
 0x299   : > { %v1130_v1 = vsel %vm920_vm3, %v1125_v36, 0 }
 0x29f   : > { %1193 = vrot.lane.b32.xlu1 %v2765_v11, %s2452_s6 }
 0x2c3   : > { %v1377_v37 = vpop.xlane.xlu0 %1376 }
 0x2c4   : > { %v1378_v38 = vsub.f32 %v2804_v60, %v1377_v37 }
 0x2c6   : > { %v1379_v40 = vmul.f32 1.442695, %v1378_v38 }
 0x2c8   : > { %2177 = vpow2.f32 %v1379_v40 }
 0x2c9   : > { %1244 = vadd.xlane.f32.xlu1 %v1243_v41 }
 0x2ce   : > { %v2843_v42 = vpop.eup %2177 }
 0x2cf   : > { %v1381_v44 = vsel %vm889_vm4, %v2843_v42, 0.0 }
 0x2d0   : > { %1382 = vadd.xlane.f32.xlu2 %v1381_v44 }
 0x2d6   : > { %v1056_v45 = vpop.permute.xlu0 %1055 }
 0x2d7   : > { %v898_v46 = vpop.xlane.xlu1 %897  ;;  %v1061_v47 = vsel %vm920_vm3, %v1056_v45, 0 }
 0x2d8   : > { %2179 = vrcp.f32 %v898_v46  ;;  %1070 = vmatpush.bf16.msrb.mxu1 %v1061_v47  ;;  %v910_v52 = vand.u32 2147483648, %v898_v46  ;;  %v908_v54 = vand.u32 2147483647, %v898_v46  ;;  %vm904_vm6 = vweird.f32 %v898_v46 }
 0x2da   : > { %v911_v56 = vor.u32 1.1754944e-38, %v910_v52  ;;  %vm909_vm8 = vcmp.eq.f32.partialorder %v908_v54, 8.507059e+37 }
 0x2de   : > { %v2180_v48 = vpop.eup %2179 }
 0x2df   : > { %v900_v49 = vmul.f32 %v2180_v48, %v898_v46  ;;  %vm905_vm5 = vweird.f32 %v2180_v48 }
 0x2e0   : > { %vm906_vm7 = vmor %vm904_vm6, %vm905_vm5 }
 0x2e1   : > { %v901_v50 = vsub.f32 1.0, %v900_v49  ;;  %v1038_v51 = vpop.xlane.xlu1 %1037 }
 0x2e2   : > { %2181 = vrcp.f32 %v1038_v51  ;;  %1400 = vrot.lane.b32.xlu1 %v2765_v11, %s2453_s26  ;;  %v1050_v4 = vand.u32 2147483648, %v1038_v51  ;;  %v1048_v6 = vand.u32 2147483647, %v1038_v51  ;;  %vm1044_vm10 = vweird.f32 %v1038_v51 }
 0x2e3   : > { %v902_v53 = vmul.f32 %v2180_v48, %v901_v50 }
 0x2e4   : > { %v1051_v8 = vor.u32 1.1754944e-38, %v1050_v4  ;;  %vm1049_vm12 = vcmp.eq.f32.partialorder %v1048_v6, 8.507059e+37 }
 0x2e5   : > { %v903_v55 = vadd.f32 %v2180_v48, %v902_v53 }
 0x2e7   : > { %v907_v57 = vsel %vm906_vm7, %v2180_v48, %v903_v55 }
 0x2e8   : > { %v2182_v58 = vpop.eup %2181  ;;  %1331 = vrot.lane.b32.xlu2 %v2765_v11, %s2454_s10  ;;  %v912_v59 = vsel %vm909_vm8, %v911_v56, %v907_v57 }
 0x2e9   : > { %v1040_v60 = vmul.f32 %v2182_v58, %v1038_v51  ;;  %v969_v61 = vpop.xlane.xlu1 %968  ;;  %v913_v62 = vmul.f32 %v2810_v3, %v912_v59  ;;  %vm1045_vm9 = vweird.f32 %v2182_v58 }
 0x2ea   : > { %2183 = vrcp.f32 %v969_v61  ;;  %vm1046_vm11 = vmor %vm1044_vm10, %vm1045_vm9  ;;  %v981_v18 = vand.u32 2147483648, %v969_v61  ;;  %v979_v19 = vand.u32 2147483647, %v969_v61  ;;  %vm975_vm14 = vweird.f32 %v969_v61 }
 0x2eb   : > { %v1041_v63 = vsub.f32 1.0, %v1040_v60  ;;  %v914_v0 = vpack.c.bf16 %v913_v62, %v913_v62 }
 0x2ec   : > { %v982_v24 = vor.u32 1.1754944e-38, %v981_v18  ;;  %vm980_vm0 = vcmp.eq.f32.partialorder %v979_v19, 8.507059e+37 }
 0x2ed   : > { %v1042_v2 = vmul.f32 %v2182_v58, %v1041_v63  ;;  %1960 = vmatmul.msk.bf16.vlgmr.msra.gmra.mxu2 %vm889_vm4, %v914_v0 }
 0x2ee   : > { %1139 = vmatpush.bf16.msra.mxu2 %v1130_v1 }
 0x2ef   : > { %v1043_v7 = vadd.f32 %v2182_v58, %v1042_v2 }
 0x2f0   : > { %v2184_v11 = vpop.eup %2183 }
 0x2f1   : > { %v971_v9 = vmul.f32 %v2184_v11, %v969_v61  ;;  %v1176_v10 = vpop.xlane.xlu1 %1175  ;;  %v1047_v3 = vsel %vm1046_vm11, %v2182_v58, %v1043_v7  ;;  %vm976_vm13 = vweird.f32 %v2184_v11 }
 0x2f2   : > { %2185 = vrcp.f32 %v1176_v10  ;;  %v1052_v14 = vsel %vm1049_vm12, %v1051_v8, %v1047_v3  ;;  %vm977_vm15 = vmor %vm975_vm14, %vm976_vm13  ;;  %v1188_v45 = vand.u32 2147483648, %v1176_v10  ;;  %vm1182_vm8 = vweird.f32 %v1176_v10 }
 0x2f3   : > { %v972_v13 = vsub.f32 1.0, %v971_v9  ;;  %v1053_v16 = vmul.f32 %v2815_v12, %v1052_v14  ;;  %v1186_v46 = vand.u32 2147483647, %v1176_v10 }
 0x2f4   : > { %v1189_v50 = vor.u32 1.1754944e-38, %v1188_v45 }
 0x2f5   : > { %v973_v17 = vmul.f32 %v2184_v11, %v972_v13  ;;  %v1054_v20 = vpack.c.bf16 %v1053_v16, %v1053_v16  ;;  %vm1187_vm12 = vcmp.eq.f32.partialorder %v1186_v46, 8.507059e+37 }
 0x2f7   : > { %v974_v22 = vadd.f32 %v2184_v11, %v973_v17  ;;  %1964 = vmatmul.msk.bf16.vlgmr.msrb.gmra.mxu1 %vm889_vm4, %v1054_v20 }
 0x2f8   : > { %v2186_v23 = vpop.eup %2185 }
 0x2f9   : > { %v1107_v25 = vpop.xlane.xlu1 %1106  ;;  %v978_v27 = vsel %vm977_vm15, %v2184_v11, %v974_v22  ;;  %v1178_v28 = vmul.f32 %v2186_v23, %v1176_v10  ;;  %vm1183_vm6 = vweird.f32 %v2186_v23 }
 0x2fa   : > { %2187 = vrcp.f32 %v1107_v25  ;;  %v983_v29 = vsel %vm980_vm0, %v982_v24, %v978_v27  ;;  %v1119_v38 = vand.u32 2147483648, %v1107_v25  ;;  %v1117_v41 = vand.u32 2147483647, %v1107_v25  ;;  %vm1184_vm10 = vmor %vm1182_vm8, %vm1183_vm6 }
 0x2fb   : > { %v984_v12 = vmul.f32 %v2819_v15, %v983_v29  ;;  %v1179_v30 = vsub.f32 1.0, %v1178_v28  ;;  %vm1113_vm7 = vweird.f32 %v1107_v25 }
 0x2fc   : > { %v1120_v47 = vor.u32 1.1754944e-38, %v1119_v38  ;;  %vm1118_vm11 = vcmp.eq.f32.partialorder %v1117_v41, 8.507059e+37 }
 0x2fd   : > { %v985_v32 = vpack.c.bf16 %v984_v12, %v984_v12  ;;  %v1180_v36 = vmul.f32 %v2186_v23, %v1179_v30 }
 0x2ff   : > { %1962 = vmatmul.msk.bf16.vlgmr.msrb.gmra.mxu2 %vm889_vm4, %v985_v32  ;;  %v1181_v44 = vadd.f32 %v2186_v23, %v1180_v36 }
 0x300   : > { %v2188_v33 = vpop.eup %2187  ;;  %1277 = vmatpush.bf16.msrb.mxu2 %v1268_v34 }
 0x301   : > { %v1109_v35 = vmul.f32 %v2188_v33, %v1107_v25  ;;  %vm1114_vm5 = vweird.f32 %v2188_v33  ;;  %v1185_v48 = vsel %vm1184_vm10, %v2186_v23, %v1181_v44  ;;  %v1314_v58 = vpop.xlane.xlu0 %1313 }
 0x302   : > { %vm1115_vm9 = vmor %vm1113_vm7, %vm1114_vm5  ;;  %v1190_v52 = vsel %vm1187_vm12, %v1189_v50, %v1185_v48  ;;  %2189 = vrcp.f32 %v1314_v58  ;;  %vm1320_vm14 = vweird.f32 %v1314_v58  ;;  %v1324_v0 = vand.u32 2147483647, %v1314_v58 }
 0x303   : > { %v1110_v37 = vsub.f32 1.0, %v1109_v35  ;;  %v1191_v54 = vmul.f32 %v2823_v21, %v1190_v52  ;;  %v1326_v21 = vand.u32 2147483648, %v1314_v58 }
 0x304   : > { %vm1325_vm0 = vcmp.eq.f32.partialorder %v1324_v0, 8.507059e+37 }
 0x305   : > { %v1111_v40 = vmul.f32 %v2188_v33, %v1110_v37  ;;  %v1192_v57 = vpack.c.bf16 %v1191_v54, %v1191_v54  ;;  %v1327_v7 = vor.u32 1.1754944e-38, %v1326_v21  ;;  %v2020_v54 = vld [vmem:[%s2725_s23 + $0x8] sm:$0xff] }
 0x306   : > { %1491 = vmatpush.bf16.msra.mxu0 %v2020_v54 }
 0x307   : > { %v1112_v15 = vadd.f32 %v2188_v33, %v1111_v40 }
 0x308   : > { %v2190_v59 = vpop.eup %2189 }
 0x309   : > { %v1116_v43 = vsel %vm1115_vm9, %v2188_v33, %v1112_v15  ;;  %v1316_v60 = vmul.f32 %v2190_v59, %v1314_v58  ;;  %vm1321_vm13 = vweird.f32 %v2190_v59 }
 0x30a   : > { %v1121_v49 = vsel %vm1118_vm11, %v1120_v47, %v1116_v43  ;;  %vm1322_vm15 = vmor %vm1320_vm14, %vm1321_vm13  ;;  %vm1453_vm13 = vcmask 130048   ;;  %vm1455_vm14 = vcmask 162816  }
 0x30b   : > { %v1122_v51 = vmul.f32 %v2827_v26, %v1121_v49  ;;  %v1317_v61 = vsub.f32 1.0, %v1316_v60 }
 0x30d   : > { %v1123_v53 = vpack.c.bf16 %v1122_v51, %v1122_v51  ;;  %v1318_v26 = vmul.f32 %v2190_v59, %v1317_v61 }
 0x30f   : > { %1966 = vmatmul.msk.bf16.vlgmr.msra.gmra.mxu2 %vm889_vm4, %v1123_v53  ;;  %v1319_v63 = vadd.f32 %v2190_v59, %v1318_v26 }
 0x311   : > { %v1194_v55 = vpop.permute.xlu1 %1193  ;;  %v1323_v4 = vsel %vm1322_vm15, %v2190_v59, %v1319_v63  ;;  %vm1457_vm15 = vcmask 195584  }
 0x312   : > { %v1199_v56 = vsel %vm920_vm3, %v1194_v55, 0  ;;  %v1328_v8 = vsel %vm1325_vm0, %v1327_v7, %v1323_v4  ;;  %vm1459_vm0 = vcmask 228352   ;;  %v2156_v7 = vld [vmem:[%s3022_s11] ss:$0 sm:$0xff] }
 0x313   : > { %1208 = vmatpush.bf16.msra.mxu1 %v1199_v56  ;;  %v1329_v14 = vmul.f32 %v2832_v31, %v1328_v8  ;;  %v2019_v56 = vld [vmem:[%s2725_s23] sm:$0xff] }
 0x314   : > { %1492 = vmatpush.bf16.msra.mxu0 %v2019_v56 }
 0x315   : > { %v1330_v27 = vpack.c.bf16 %v1329_v14, %v1329_v14 }
 0x316   : > { %1968 = vmatmul.msk.bf16.vlgmr.msra.gmra.mxu1 %vm889_vm4, %v1192_v57 }
 0x33c   : > { %v1245_v62 = vpop.xlane.xlu1 %1244 }
 0x33d   : > { %2191 = vrcp.f32 %v1245_v62  ;;  %v1257_v9 = vand.u32 2147483648, %v1245_v62  ;;  %v1255_v3 = vand.u32 2147483647, %v1245_v62  ;;  %vm1251_vm6 = vweird.f32 %v1245_v62 }
 0x33f   : > { %v1258_v17 = vor.u32 1.1754944e-38, %v1257_v9  ;;  %vm1256_vm8 = vcmp.eq.f32.partialorder %v1255_v3, 8.507059e+37 }
 0x343   : > { %v2192_v1 = vpop.eup %2191  ;;  %v1383_v2 = vpop.xlane.xlu2 %1382 }
 0x344   : > { %v1247_v6 = vmul.f32 %v2192_v1, %v1245_v62  ;;  %2193 = vrcp.f32 %v1383_v2  ;;  %vm1252_vm5 = vweird.f32 %v2192_v1  ;;  %v1395_v12 = vand.u32 2147483648, %v1383_v2 }
 0x345   : > { %vm1253_vm7 = vmor %vm1251_vm6, %vm1252_vm5  ;;  %vm1389_vm10 = vweird.f32 %v1383_v2  ;;  %v1393_v30 = vand.u32 2147483647, %v1383_v2 }
 0x346   : > { %v1248_v11 = vsub.f32 1.0, %v1247_v6  ;;  %v1396_v35 = vor.u32 1.1754944e-38, %v1395_v12 }
 0x347   : > { %vm1394_vm12 = vcmp.eq.f32.partialorder %v1393_v30, 8.507059e+37  ;;  %v2025_v30 = vld [vmem:[%s2748_s22 + $0x10] sm:$0xff] }
 0x348   : > { %v1249_v10 = vmul.f32 %v2192_v1, %v1248_v11 }
 0x34a   : > { %v2194_v13 = vpop.eup %2193  ;;  %v1250_v16 = vadd.f32 %v2192_v1, %v1249_v10 }
 0x34b   : > { %v1385_v18 = vmul.f32 %v2194_v13, %v1383_v2  ;;  %v1332_v19 = vpop.permute.xlu2 %1331  ;;  %vm1390_vm9 = vweird.f32 %v2194_v13 }
 0x34c   : > { %v1254_v20 = vsel %vm1253_vm7, %v2192_v1, %v1250_v16  ;;  %v1337_v22 = vsel %vm920_vm3, %v1332_v19, 0  ;;  %vm1391_vm11 = vmor %vm1389_vm10, %vm1390_vm9  ;;  %vm1613_vm7 = vcmask 523264  }
 0x34d   : > { %v1259_v23 = vsel %vm1256_vm8, %v1258_v17, %v1254_v20  ;;  %v1386_v24 = vsub.f32 1.0, %v1385_v18  ;;  %1346 = vmatpush.bf16.msrb.mxu1 %v1337_v22 }
 0x34e   : > { %v1260_v25 = vmul.f32 %v2839_v39, %v1259_v23 }
 0x34f   : > { %v1387_v28 = vmul.f32 %v2194_v13, %v1386_v24 }
 0x350   : > { %1972 = vmatmul.msk.bf16.vlgmr.msrb.gmra.mxu1 %vm889_vm4, %v1330_v27  ;;  %v1261_v31 = vpack.c.bf16 %v1260_v25, %v1260_v25  ;;  %v2022_v27 = vld [vmem:[%s2738_s4 + $0x8] sm:$0xff] }
 0x351   : > { %v1388_v29 = vadd.f32 %v2194_v13, %v1387_v28  ;;  %1568 = vmatpush.bf16.msra.mxu1 %v2022_v27  ;;  %v2021_v28 = vld [vmem:[%s2738_s4] sm:$0xff] }
 0x352   : > { %1970 = vmatmul.msk.bf16.vlgmr.msrb.gmra.mxu2 %vm889_vm4, %v1261_v31  ;;  %v2026_v31 = vld [vmem:[%s2748_s22 + $0x18] sm:$0xff] }
 0x353   : > { %v1392_v34 = vsel %vm1391_vm11, %v2194_v13, %v1388_v29  ;;  %v2462_v13 = vmov 32.0   ;;  %1621 = vmatpush.bf16.msra.mxu3 %v2026_v31 }
 0x354   : > { %v1401_v32 = vpop.permute.xlu1 %1400  ;;  %v1397_v39 = vsel %vm1394_vm12, %v1396_v35, %v1392_v34  ;;  %2195 = vrcp.f32 %v2462_v13 }
 0x355   : > { %v1406_v33 = vsel %vm920_vm3, %v1401_v32, 0  ;;  %v1398_v36 = vmul.f32 %v2843_v42, %v1397_v39  ;;  %vm1451_vm3 = vcmask 97280   ;;  %1569 = vmatpush.bf16.msra.mxu1 %v2021_v28 }
 0x356   : > { %1415 = vmatpush.bf16.msra.mxu2 %v1406_v33 }
 0x357   : > { %v1399_v37 = vpack.c.bf16 %v1398_v36, %v1398_v36  ;;  %1622 = vmatpush.bf16.msra.mxu3 %v2025_v30 }
 0x35a   : > { %v2196_v14 = vpop.eup %2195 }
 0x35b   : > { %v1505_v16 = vmul.f32 32.0, %v2196_v14 }
 0x35d   : > { %v1506_v17 = vsub.f32 1.0, %v1505_v16 }
 0x35f   : > { %v1507_v18 = vmul.f32 %v2196_v14, %v1506_v17 }
 0x361   : > { %v1508_v19 = vadd.f32 %v2196_v14, %v1507_v18 }
 0x362   : > { %1974 = vmatmul.msk.bf16.vlgmr.msra.gmra.mxu2 %vm889_vm4, %v1399_v37 }
 0x370   : > { %v933_v38 = vpop.f32.mrf.mxu2 }
 0x374   : > { %v1072_v40 = vpop.f32.mrf.mxu1 }
 0x375   : > { %1426 = vrot.lane.b32.xlu0 %v1072_v40, %s2455_s18 }
 0x378   : > { %v935_v41 = vpop.f32.mrf.mxu2 }
 0x379   : > { %v2158_v41 = vld [vmem:[%s3024_s25] ss:$0 sm:$0xff] }
 0x37c   : > { %v1074_v44 = vpop.f32.mrf.mxu1 }
 0x382   : > { %v1003_v45 = vpop.f32.mrf.mxu2 }
 0x38a   : > { %v1005_v15 = vpop.f32.mrf.mxu2 }
 0x392   : > { %v1141_v46 = vpop.f32.mrf.mxu2 }
 0x393   : > { %v1210_v47 = vpop.f32.mrf.mxu1 }
 0x394   : > { %1434 = vrot.lane.b32.xlu1 %v1210_v47, %s2456_s19  ;;  %v2024_v47 = vld [vmem:[%s2748_s22 + $0x8] sm:$0xff] }
 0x395   : > { %1623 = vmatpush.bf16.msra.mxu3 %v2024_v47 }
 0x39a   : > { %v1143_v43 = vpop.f32.mrf.mxu2 }
 0x39b   : > { %v1212_v48 = vpop.f32.mrf.mxu1  ;;  %v2023_v43 = vld [vmem:[%s2748_s22] sm:$0xff] }
 0x39c   : > { %1422 = vrot.lane.b32.xlu1 %v1003_v45, %s2457_s30  ;;  %1624 = vmatpush.bf16.msra.mxu3 %v2023_v43  ;;  %v2159_v48 = vld [vmem:[%s804_s15] ss:$0 sm:$0xff]  ;;  %s3027_s15 = scalar_lea.vmem [#allocation8], %s2692_s2 }
 0x3a4   : > { %1430 = vrot.lane.b32.xlu1 %v1141_v46, %s2458_s3 }
 0x3cd   : > { %v1348_v42 = vpop.f32.mrf.mxu1 }
 0x3ce   : > { %1442 = vrot.lane.b32.xlu1 %v1348_v42, %s2459_s29 }
 0x3d5   : > { %v1279_v49 = vpop.f32.mrf.mxu2  ;;  %v1350_v50 = vpop.f32.mrf.mxu1 }
 0x3d6   : > { %1438 = vrot.lane.b32.xlu2 %v1279_v49, %s2460_s12 }
 0x3dd   : > { %v1281_v51 = vpop.f32.mrf.mxu2 }
 0x3e5   : > { %v1417_v52 = vpop.f32.mrf.mxu2 }
 0x3e6   : > { %1446 = vrot.lane.b32.xlu0 %v1417_v52, %s2461_s20 }
 0x3e7   : > { %v1427_v60 = vpop.permute.xlu0 %1426 }
 0x3ed   : > { %v1419_v53 = vpop.f32.mrf.mxu2 }
 0x406   : > { %v1435_v55 = vpop.permute.xlu1 %1434 }
 0x40e   : > { %v1423_v57 = vpop.permute.xlu1 %1422 }
 0x40f   : > { %v1449_v59 = vsel %vm869_vm2, %v933_v38, %v1423_v57  ;;  %vm1509_vm2 = vweird.f32 %v2196_v14  ;;  %v2157_v38 = vld [vmem:[%s796_s14] ss:$0 sm:$0xff]  ;;  %s3026_s14 = scalar_lea.vmem [#allocation7], %s2692_s2  ;;  %s3028_s2 = sld [smem:[#allocation23_spill]] (!%p2010_p5) }
 0x410   : > { %v1450_v61 = vsel %vm889_vm4, %v1449_v59, %v1427_v60  ;;  %v2886_v20 = vsel %vm1509_vm2, %v2196_v14, %v1508_v19  ;;  %v2160_v53 = vld [vmem:[%s3026_s14] ss:$0 sm:$0xff] }
 0x416   : > { %v1431_v58 = vpop.permute.xlu1 %1430 }
 0x417   : > { %v1452_v26 = vsel %vm1451_vm3, %v1450_v61, %v1431_v58 }
 0x418   : > { %v1454_v21 = vsel %vm1453_vm13, %v1452_v26, %v1435_v55 }
 0x430   : > { %v1439_v62 = vpop.permute.xlu2 %1438 }
 0x431   : > { %v1456_v0 = vsel %vm1455_vm14, %v1454_v21, %v1439_v62 }
 0x440   : > { %v1443_v63 = vpop.permute.xlu1 %1442 }
 0x441   : > { %v1458_v1 = vsel %vm1457_vm15, %v1456_v0, %v1443_v63 }
 0x458   : > { %v1447_v2 = vpop.permute.xlu0 %1446 }
 0x459   : > { %v1460_v4 = vsel %vm1459_vm0, %v1458_v1, %v1447_v2 }
 0x45a   : > { %v1465_v6 = vpack.c.bf16 %v1460_v4, %v1460_v4 }
 0x45c   : > { %1983 = vmatmul.msk.bf16.vlgmr.msra.gmra.mxu0 %vm846_vm1, %v1465_v6 }
 0x4d9   : > { %v1494_v11 = vpop.f32.mrf.mxu0 }
 0x4da   : > { %v1495_v8 = vadd.f32 %v2156_v7, %v1494_v11 }
 0x4dc   : > { %v1498_v9 = vadd.f32 %v1495_v8, %v2760_v5  ;;  %v2161_v8 = vld [vmem:[%s3027_s15] ss:$0 sm:$0xff] }
 0x4de   : > { %v1501_v10 = vsel %vm846_vm1, %v1498_v9, 0.0 }
 0x4df   : > { %1502 = vadd.xlane.f32.xlu2 %v1501_v10  ;;  %v2162_v10 = vld [vmem:[%s678_s9] ss:$0 sm:$0xff] }
 0x4e1   : > { %v1496_v3 = vpop.f32.mrf.mxu0 }
 0x552   : > { %v1503_v22 = vpop.xlane.xlu2 %1502 }
 0x553   : > { %v1511_v5 = vmul.f32 %v2886_v20, %v1503_v22 }
 0x555   : > { %v1512_v23 = vsub.f32 %v1498_v9, %v1511_v5 }
 0x557   : > { %v1513_v24 = vmul.f32 %v1512_v23, %v1512_v23 }
 0x559   : > { %v1514_v25 = vsel %vm846_vm1, %v1513_v24, 0.0 }
 0x55a   : > { %1515 = vadd.xlane.f32.xlu1 %v1514_v25 }
 0x5cd   : > { %v1516_v29 = vpop.xlane.xlu1 %1515 }
 0x5ce   : > { %v1517_v12 = vmul.f32 %v1516_v29, %v2886_v20 }
 0x5d0   : > { %v1518_v32 = vadd.f32 1e-05, %v1517_v12 }
 0x5d2   : > { %2197 = vrsqrt.f32 %v1518_v32  ;;  %vm1525_vm5 = vweird.f32 %v1518_v32 }
 0x5d8   : > { %v2198_v33 = vpop.eup %2197 }
 0x5d9   : > { %v1520_v34 = vmul.f32 %v2198_v33, %v1518_v32  ;;  %vm1526_vm4 = vweird.f32 %v2198_v33 }
 0x5da   : > { %vm1527_vm6 = vmor %vm1525_vm5, %vm1526_vm4 }
 0x5db   : > { %v1521_v35 = vmul.f32 %v2198_v33, %v1520_v34 }
 0x5dd   : > { %v1522_v39 = vmul.f32 0.5, %v1521_v35 }
 0x5df   : > { %v1523_v36 = vsub.f32 1.5, %v1522_v39 }
 0x5e1   : > { %v1524_v37 = vmul.f32 %v2198_v33, %v1523_v36 }
 0x5e3   : > { %v1528_v40 = vsel %vm1527_vm6, %v2198_v33, %v1524_v37 }
 0x5e4   : > { %v1529_v44 = vmul.f32 %v1528_v40, %v1512_v23 }
 0x5e6   : > { %v1533_v45 = vmul.f32 %v2157_v38, %v1529_v44 }
 0x5e8   : > { %v1537_v15 = vadd.f32 %v2158_v41, %v1533_v45 }
 0x5ea   : > { %v1542_v46 = vpack.c.bf16 %v1537_v15, %v1537_v15 }
 0x5ec   : > { %1992 = vmatmul.msk.bf16.vlgmr.msra.gmra.mxu1 %vm846_vm1, %v1542_v46 }
 0x669   : > { %v1571_v42 = vpop.f32.mrf.mxu1 }
 0x66a   : > { %v1572_v49 = vadd.f32 %v2159_v48, %v1571_v42 }
 0x66c   : > { %v1575_v50 = vmax.f32 %v1572_v49, 0.0 }
 0x66e   : > { %v1584_v51 = vpack.c.bf16 %v1575_v50, %v1575_v50 }
 0x670   : > { %2009 = vmatmul.msk.bf16.vlgmr.msra.gmra.mxu3 %vm1613_vm7, %v1584_v51 }
 0x671   : > { %v1573_v52 = vpop.f32.mrf.mxu1 }
 0x6f3   : > { %v1626_v54 = vpop.f32.mrf.mxu3 }
 0x6f4   : > { %v1627_v55 = vadd.f32 %v2160_v53, %v1626_v54 }
 0x6f6   : > { %v1630_v56 = vadd.f32 %v1627_v55, %v1537_v15 }
 0x6f8   : > { %v1633_v57 = vsel %vm846_vm1, %v1630_v56, 0.0 }
 0x6f9   : > { %1634 = vadd.xlane.f32.xlu0 %v1633_v57 }
 0x6fb   : > { %v1628_v58 = vpop.f32.mrf.mxu3 }
 0x76c   : > { %v1635_v59 = vpop.xlane.xlu0 %1634 }
 0x76d   : > { %v1636_v60 = vmul.f32 %v1635_v59, %v2886_v20 }
 0x76f   : > { %v1637_v61 = vsub.f32 %v1630_v56, %v1636_v60 }
 0x771   : > { %v1638_v26 = vmul.f32 %v1637_v61, %v1637_v61 }
 0x773   : > { %v1639_v62 = vsel %vm846_vm1, %v1638_v26, 0.0 }
 0x774   : > { %1640 = vadd.xlane.f32.xlu2 %v1639_v62 }
 0x7e7   : > { %v1641_v63 = vpop.xlane.xlu2 %1640 }
 0x7e8   : > { %v1642_v21 = vmul.f32 %v1641_v63, %v2886_v20 }
 0x7ea   : > { %v1643_v0 = vadd.f32 1e-05, %v1642_v21 }
 0x7ec   : > { %2199 = vrsqrt.f32 %v1643_v0  ;;  %vm1650_vm9 = vweird.f32 %v1643_v0 }
 0x7f2   : > { %v2200_v1 = vpop.eup %2199 }
 0x7f3   : > { %v1645_v2 = vmul.f32 %v2200_v1, %v1643_v0  ;;  %vm1651_vm8 = vweird.f32 %v2200_v1 }
 0x7f4   : > { %vm1652_vm10 = vmor %vm1650_vm9, %vm1651_vm8 }
 0x7f5   : > { %v1646_v4 = vmul.f32 %v2200_v1, %v1645_v2 }
 0x7f7   : > { %v1647_v6 = vmul.f32 0.5, %v1646_v4 }
 0x7f9   : > { %v1648_v7 = vsub.f32 1.5, %v1647_v6 }
 0x7fb   : > { %v1649_v11 = vmul.f32 %v2200_v1, %v1648_v7 }
 0x7fd   : > { %v1653_v9 = vsel %vm1652_vm10, %v2200_v1, %v1649_v11 }
 0x7fe   : > { %v1654_v3 = vmul.f32 %v1653_v9, %v1637_v61 }
 0x800   : > { %v1658_v13 = vmul.f32 %v2161_v8, %v1654_v3  ;;  %1667 = sbr.rel (%p2010_p5) target bundleno = 2322 (0x912), region = 112 }
 0x802   : > { %v1662_v14 = vadd.f32 %v2162_v10, %v1658_v13 }
 0x804   : > { %1663 = vst.msk [vmem:[#allocation2] sm:$0xff] %vm846_vm1, %v1662_v14 }
 0x805   : > { %v1670_v16 = vsel %vm846_vm1, %v1662_v14, 0.0  ;;  %v2201_v32 = vld [vmem:[%s3028_s2] ss:$0 sm:$0xff]  ;;  %v2202_v35 = vld [vmem:[#allocation3] ss:$0 sm:$0xff] }
 0x806   : > { %1671 = vadd.xlane.f32.xlu0 %v1670_v16 }
 0x879   : > { %v1672_v17 = vpop.xlane.xlu0 %1671 }
 0x87a   : > { %v1673_v18 = vmul.f32 %v1672_v17, %v2886_v20 }
 0x87c   : > { %v1674_v19 = vsub.f32 %v1662_v14, %v1673_v18 }
 0x87e   : > { %v1675_v22 = vmul.f32 %v1674_v19, %v1674_v19 }
 0x880   : > { %v1676_v5 = vsel %vm846_vm1, %v1675_v22, 0.0 }
 0x881   : > { %1677 = vadd.xlane.f32.xlu0 %v1676_v5 }
 0x8f4   : > { %v1678_v23 = vpop.xlane.xlu0 %1677 }
 0x8f5   : > { %v1679_v24 = vmul.f32 %v1678_v23, %v2886_v20 }
 0x8f7   : > { %v1680_v25 = vadd.f32 1e-05, %v1679_v24 }
 0x8f9   : > { %2203 = vrsqrt.f32 %v1680_v25  ;;  %vm1687_vm12 = vweird.f32 %v1680_v25 }
 0x8ff   : > { %v2204_v27 = vpop.eup %2203 }
 0x900   : > { %v1682_v28 = vmul.f32 %v2204_v27, %v1680_v25  ;;  %vm1688_vm11 = vweird.f32 %v2204_v27 }
 0x901   : > { %vm1689_vm3 = vmor %vm1687_vm12, %vm1688_vm11 }
 0x902   : > { %v1683_v31 = vmul.f32 %v2204_v27, %v1682_v28 }
 0x904   : > { %v1684_v29 = vmul.f32 0.5, %v1683_v31 }
 0x906   : > { %v1685_v12 = vsub.f32 1.5, %v1684_v29 }
 0x908   : > { %v1686_v30 = vmul.f32 %v2204_v27, %v1685_v12 }
 0x90a   : > { %v1690_v33 = vsel %vm1689_vm3, %v2204_v27, %v1686_v30 }
 0x90b   : > { %v1691_v34 = vmul.f32 %v1690_v33, %v1674_v19 }
 0x90d   : > { %v1695_v20 = vmul.f32 %v2201_v32, %v1691_v34 }
 0x90f   : > { %v1699_v39 = vadd.f32 %v2202_v35, %v1695_v20 }
 0x911   : > { %1700 = vst.msk [vmem:[%s2753_s16] sm:$0xff] %vm846_vm1, %v1699_v39 }
 0x912 PF: > { %s33_s28 = sadd.s32 1, %s2429_s28   ;;  %s3029_s21 = sld [smem:[#allocation14_spill]] }
 0x913   : > { %p30_p6 = scmp.ge.s32.totalorder %s33_s28, 14   ;;  %s3030_s22 = sld [smem:[#allocation15_spill]] }
 0x914   : > { %s3031_s23 = sld [smem:[#allocation20_spill]] }
 0x915   : > { %s3032_s24 = sld [smem:[#allocation16_spill]]  ;;  %32 = sbr.rel (!%p30_p6) target bundleno = 25 (0x19), region = 199 }
 0x916   : > { %s3033_s25 = sld [smem:[#allocation17_spill]] }
 0x917   : > { %s3034_s26 = sld [smem:[#allocation18_spill]] }
 0x918   : > { %s3035_s27 = sld [smem:[#allocation19_spill]] }
 0x91a   :  { %1720 = vsyncpa [#allocation4], 1 }
 0x91b   :  { %1722 = vsyncpa [#allocation4 + $0x1], 1 }
 0x91c   :  { %1723 = vsyncpa [#allocation6], 1 }
 0x91d   :  { %1725 = vsyncpa [#allocation6 + $0x1], 1 }
 0x91e   :  { %1726 = vsyncpa [#allocation9], 1 }
 0x91f   :  { %1728 = vsyncpa [#allocation9 + $0x1], 1 }

// kernel: value_net_forward.3
= control target key start
LH: loop header
LB: loop body
LE: loop exit
PB: predicated region body
PF: predicated region fallthrough
CT: control target
= control target key end

     0   :  { %s4251_s0 = inlined_call_operand.vmem [shape: f32[2,8,32], index: 0, kind: input, shape index: {}]   ;;  %s4252_s1 = inlined_call_operand.vmem [shape: f32[1,32], index: 1, kind: input, shape index: {}]   ;;  %s4253_s2 = inlined_call_operand.vmem [shape: f32[1,32], index: 2, kind: input, shape index: {}]   ;;  %s4254_s3 = inlined_call_operand.vmem [shape: bf16[32,16], index: 3, kind: input, shape index: {}]   ;;  %s4255_s4 = inlined_call_operand.hbm [shape: f32[1,16], index: 4, kind: input, shape index: {}]   ;;  %s4256_s5 = inlined_call_operand.hbm [shape: f32[1,16], index: 5, kind: input, shape index: {}]   ;;  %s4257_s6 = inlined_call_operand.<no memory space> [shape: f32[1,1], index: 6, kind: input, shape index: {}]   ;;  %s4258_s7 = inlined_call_operand.vmem [shape: bf16[6,32,32], index: 7, kind: input, shape index: {}]   ;;  %s4259_s8 = inlined_call_operand.vmem [shape: f32[6,1,32], index: 8, kind: input, shape index: {}]   ;;  %s4260_s9 = inlined_call_operand.vmem [shape: bf16[6,32,32], index: 9, kind: input, shape index: {}]   ;;  %s4261_s10 = inlined_call_operand.vmem [shape: f32[6,1,32], index: 10, kind: input, shape index: {}]   ;;  %s4262_s11 = inlined_call_operand.vmem [shape: f32[6,1,32], index: 11, kind: input, shape index: {}]   ;;  %s4263_s12 = inlined_call_operand.vmem [shape: f32[6,1,32], index: 12, kind: input, shape index: {}]   ;;  %s4264_s13 = inlined_call_operand.vmem [shape: bf16[6,32,32], index: 13, kind: input, shape index: {}]   ;;  %s4265_s14 = inlined_call_operand.hbm [shape: f32[6,1,32], index: 14, kind: input, shape index: {}]   ;;  %s4266_s15 = inlined_call_operand.vmem [shape: bf16[6,32,64], index: 15, kind: input, shape index: {}]   ;;  %s4267_s16 = inlined_call_operand.hbm [shape: f32[6,1,64], index: 16, kind: input, shape index: {}]   ;;  %s4268_s17 = inlined_call_operand.vmem [shape: bf16[6,32,32], index: 17, kind: input, shape index: {}]   ;;  %s4269_s18 = inlined_call_operand.hbm [shape: f32[6,1,32], index: 18, kind: input, shape index: {}]   ;;  %s4270_s19 = inlined_call_operand.hbm [shape: f32[6,1,32], index: 19, kind: input, shape index: {}]   ;;  %s4271_s20 = inlined_call_operand.hbm [shape: f32[6,1,32], index: 20, kind: input, shape index: {}]   ;;  %s4272_s21 = inlined_call_operand.hbm [shape: bf16[6,32,64], index: 21, kind: input, shape index: {}]   ;;  %s4273_s22 = inlined_call_operand.hbm [shape: f32[6,1,64], index: 22, kind: input, shape index: {}]   ;;  %s4274_s23 = inlined_call_operand.vmem [shape: bf16[6,64,32], index: 23, kind: input, shape index: {}]   ;;  %s4275_s24 = inlined_call_operand.hbm [shape: f32[6,1,32], index: 24, kind: input, shape index: {}]   ;;  %s4276_s25 = inlined_call_operand.hbm [shape: f32[6,1,32], index: 25, kind: input, shape index: {}]   ;;  %s4277_s26 = inlined_call_operand.hbm [shape: f32[6,1,32], index: 26, kind: input, shape index: {}]   ;;  %s4278_s27 = inlined_call_operand.vmem [shape: f32[2,1,1], index: 27, kind: output, shape index: {}]  }
   0x1   :  { %4286 = sst [smem:[#allocation28_spill]] %s4251_s0 }
   0x2   :  { %4287 = sst [smem:[#allocation29_spill]] %s4252_s1 }
   0x3   :  { %4288 = sst [smem:[#allocation30_spill]] %s4253_s2 }
   0x4   :  { %4289 = sst [smem:[#allocation31_spill]] %s4254_s3 }
   0x5   :  { %4290 = sst [smem:[#allocation32_spill]] %s4255_s4 }
   0x6   :  { %4291 = sst [smem:[#allocation33_spill]] %s4256_s5 }
   0x7   :  { %4292 = sst [smem:[#allocation34_spill]] %s4257_s6 }
   0x8   :  { %4293 = sst [smem:[#allocation35_spill]] %s4258_s7 }
   0x9   :  { %4294 = sst [smem:[#allocation36_spill]] %s4259_s8 }
   0xa   :  { %4295 = sst [smem:[#allocation37_spill]] %s4260_s9 }
   0xb   :  { %4296 = sst [smem:[#allocation38_spill]] %s4261_s10 }
   0xc   :  { %4297 = sst [smem:[#allocation39_spill]] %s4262_s11 }
   0xd   :  { %4298 = sst [smem:[#allocation40_spill]] %s4263_s12 }
   0xe   :  { %4299 = sst [smem:[#allocation41_spill]] %s4264_s13 }
   0xf   :  { %4300 = sst [smem:[#allocation42_spill]] %s4265_s14 }
  0x10   :  { %4301 = sst [smem:[#allocation43_spill]] %s4266_s15 }
  0x11   :  { %4302 = sst [smem:[#allocation44_spill]] %s4267_s16 }
  0x12   :  { %4303 = sst [smem:[#allocation45_spill]] %s4268_s17 }
  0x13   :  { %4304 = sst [smem:[#allocation46_spill]] %s4269_s18 }
  0x14   :  { %4305 = sst [smem:[#allocation47_spill]] %s4270_s19 }
  0x15   :  { %4306 = sst [smem:[#allocation48_spill]] %s4271_s20 }
  0x16   :  { %4307 = sst [smem:[#allocation49_spill]] %s4272_s21 }
  0x17   :  { %4308 = sst [smem:[#allocation50_spill]] %s4273_s22 }
  0x18   :  { %4309 = sst [smem:[#allocation51_spill]] %s4274_s23 }
  0x19   :  { %4310 = sst [smem:[#allocation52_spill]] %s4275_s24 }
  0x1a   :  { %4311 = sst [smem:[#allocation53_spill]] %s4276_s25 }
  0x1b   :  { %4312 = sst [smem:[#allocation54_spill]] %s4277_s26 }
  0x1c   :  { %4313 = sst [smem:[#allocation55_spill]] %s4278_s27 }
  0x1d   :  { %s4314_s8 = sld [smem:[#allocation34_spill]] }
  0x23   :  { %v32_v0 = vstv %s4314_s8 }
  0x24   :  { %33 = vst [vmem:[#allocation3] sm:$0x1] %v32_v0 }
  0x25   :  { %34 = vsyncpa [#allocation5], 0 }
  0x26   :  { %35 = vsyncpa [#allocation7], 0  ;;  %s3707_s30 = smov 0   ;;  %s3709_s9 = smov 0  }
  0x27   :  { %s3711_s5 = smov 0   ;;  %s3713_s28 = smov 0  }
  0x28   :  { %s3715_s0 = smov 0   ;;  %s3717_s10 = smov 0  }
  0x29   :  { %s3719_s29 = smov 0   ;;  %s3721_s1 = smov 0  }
  0x2a LB: > { %4315 = sst [smem:[#allocation21_spill]] %s3514_s5  ;;  %s4282_s6 = sadd.s32 4294967295, %s3534_s1   ;;  %s3534_s1 = sphi %s3721_s1, %s41_s1   ;;  %s3530_s29 = sphi %s3719_s29, %s4374_s29   ;;  %s3526_s10 = sphi %s3717_s10, %s4373_s10   ;;  %s3522_s0 = sphi %s3715_s0, %s4372_s0   ;;  %s3518_s28 = sphi %s3713_s28, %s4371_s28   ;;  %s3514_s5 = sphi %s3711_s5, %s4370_s5   ;;  %s3510_s9 = sphi %s3709_s9, %s4376_s9   ;;  %s3506_s30 = sphi %s3707_s30, %s4375_s30  }
  0x2b   : > { %4316 = sst [smem:[#allocation22_spill]] %s3518_s28  ;;  %s50_s11 = sadd.s32 1, %s3526_s10 }
  0x2c   : > { %4317 = sst [smem:[#allocation23_spill]] %s3526_s10  ;;  %p51_p0 = scmp.ge.s32.totalorder %s50_s11, 6 }
  0x2d   : > { %4318 = sst [smem:[#allocation24_spill]] %s3530_s29  ;;  %s53_s2 = sadd.s32 1, %s3530_s29 }
  0x2e   : > { %s394_s3 = sadd.s32 1, %s3514_s5  ;;  %p401_p1 = scmp.ne.s32.totalorder %s3514_s5, %s3510_s9 }
  0x2f   : > { %s4378_s11 = smov (%p51_p0, %s50_s11), 0  ;;  %s4380_s2 = smov (!%p51_p0, %s53_s2), %s3530_s29 }
  0x30   : > { %4319 = sst [smem:[#allocation25_spill]] %s4378_s11  ;;  %s391_s7 = ssub.s32 %s3526_s10, %s4378_s11 }
  0x31   : > { %p402_p2 = scmp.eq.s32.totalorder %s3534_s1, 0  ;;  %p55_p3 = scmp.ge.s32.totalorder %s4380_s2, 2 }
  0x32   : > { %p392_p4 = scmp.eq.s32.totalorder %s391_s7, 0  ;;  %p407_p6 = scmp.ne.s32.totalorder %s3510_s9, %s3506_s30 }
  0x33   : > { %p3757_p5 = por %p402_p2, %p401_p1  ;;  %s4382_s2 = smov (%p55_p3, %s4380_s2), 0 }
  0x34   : > { %4321 = sst [smem:[#allocation26_spill]] %s4382_s2  ;;  %p3769_p7 = scmp.eq.s32.totalorder %s4282_s6, 0 }
  0x35   : > { %s3765_s8 = scalar_select %p392_p4, %s3514_s5, %s394_s3  }
  0x36   : > { %p2745_p8 = scmp.ge.s32.totalorder %s3534_s1, 1  ;;  %p756_p9 = scmp.lt.s32.totalorder %s3534_s1, 13 }
  0x37   : > { %4322 = sst [smem:[#allocation27_spill]] %s3765_s8  ;;  %p3777_p10 = por %p3769_p7, %p407_p6 }
  0x38   : > { %s4325_s3 = sld [smem:[#allocation32_spill]]  ;;  %p3784_p11 = pnand %p2745_p8, %p756_p9 }
  0x39   : > { %s3536_s6 = smov [#allocation4]   ;;  %p2962_p13 = scmp.lt.s32.totalorder %s3534_s1, 12 }
  0x3a   : > { %p2922_p12 = pneg %p3784_p11  ;;  %s779_s23 = sshll.u32 %s3536_s6, 4  ;;  %s780_s23 = int_to_ptr.vmem [resolvable:$true] %s779_s23 }
  0x3b   : > { %s3798_s2 = sand.u32 1, %s3514_s5   ;;  %p3802_p1 = pnand %p2962_p13, %p3757_p5 }
  0x3c   : > { %p3793_p0 = pnand %p2922_p12, %p3769_p7  ;;  %s860_s6 = sand.u32 1, %s3534_s1  }
  0x3d   : > { %s4329_s14 = sld [smem:[#allocation42_spill]]  ;;  %s863_s5 = scalar_lea.vmem [#allocation8], %s3798_s2 }
  0x3e   : > { %s777_s11 = sshll.u32 %s4325_s3, 4  ;;  %s870_s12 = sshll.u32 %s863_s5, 4  ;;  %s778_s11 = int_to_ptr.hbm [resolvable:$true] %s777_s11  ;;  %s871_s12 = int_to_ptr.vmem [resolvable:$true] %s870_s12 }
  0x3f   : > { %2925 = dma.hbm_to_vmem [thread:$0]  (!%p3793_p0), %s778_s11, 16, %s780_s23, [#allocation5]  }
  0x40   : > { %s3814_s27 = scalar_lea.sflag [#allocation5], %s860_s6  ;;  %s4330_s16 = sld [smem:[#allocation44_spill]] }
  0x41   : > { %s888_s3 = scalar_lea.vmem [#allocation9], %s3798_s2  ;;  %s4331_s18 = sld [smem:[#allocation46_spill]] }
  0x42   : > { %s4332_s19 = sld [smem:[#allocation47_spill]]  ;;  %s2749_s11 = sshll.u32 %s3798_s2, 4 }
  0x43   : > { %s866_s13 = scalar_lea.hbm %s4329_s14, %s3526_s10  ;;  %s895_s14 = sshll.u32 %s888_s3, 4  ;;  %s896_s14 = int_to_ptr.vmem [resolvable:$true] %s895_s14 }
  0x44   : > { %s868_s4 = sshll.u32 %s866_s13, 4  ;;  %s930_s3 = scalar_lea.vmem [#allocation11], %s3798_s2  ;;  %s869_s4 = int_to_ptr.hbm [resolvable:$true] %s868_s4 }
  0x45   : > { %2932 = dma.hbm_to_vmem [thread:$0]  (!%p3802_p1), %s869_s4, 16, %s871_s12, %s3814_s27  }
  0x46   : > { %s891_s15 = scalar_lea.hbm %s4330_s16, %s3526_s10  ;;  %s913_s4 = scalar_lea.vmem [#allocation10], %s3798_s2 }
  0x47   : > { %s893_s5 = sshll.u32 %s891_s15, 4  ;;  %s916_s12 = scalar_lea.hbm %s4331_s18, %s3526_s10  ;;  %s894_s5 = int_to_ptr.hbm [resolvable:$true] %s893_s5 }
  0x48   : > { %2935 = dma.hbm_to_vmem [thread:$0]  (!%p3802_p1), %s894_s5, 16, %s896_s14, %s3814_s27  }
  0x49   : > { %s920_s28 = sshll.u32 %s913_s4, 4  ;;  %s918_s23 = sshll.u32 %s916_s12, 4  ;;  %s921_s28 = int_to_ptr.vmem [resolvable:$true] %s920_s28  ;;  %s919_s23 = int_to_ptr.hbm [resolvable:$true] %s918_s23 }
  0x4a   : > { %2938 = dma.hbm_to_vmem [thread:$0]  (!%p3802_p1), %s919_s23, 16, %s921_s28, %s3814_s27  }
  0x4b   : > { %s933_s14 = scalar_lea.hbm %s4332_s19, %s3526_s10  ;;  %s937_s5 = sshll.u32 %s930_s3, 4  ;;  %s938_s5 = int_to_ptr.vmem [resolvable:$true] %s937_s5 }
  0x4c   : > { %s935_s13 = sshll.u32 %s933_s14, 4  ;;  %s4333_s20 = sld [smem:[#allocation48_spill]]  ;;  %s936_s13 = int_to_ptr.hbm [resolvable:$true] %s935_s13 }
  0x4d   : > { %2941 = dma.hbm_to_vmem [thread:$0]  (!%p3802_p1), %s936_s13, 16, %s938_s5, %s3814_s27  }
  0x4e   : > { %s947_s16 = scalar_lea.vmem [#allocation12], %s3798_s2  ;;  %s2869_s15 = sshll.u32 %s3526_s10, 4 }
  0x4f   : > { %s954_s28 = sshll.u32 %s947_s16, 4  ;;  %s4334_s21 = sld [smem:[#allocation49_spill]]  ;;  %s955_s28 = int_to_ptr.vmem [resolvable:$true] %s954_s28 }
  0x50   : > { %s965_s13 = scalar_lea.vmem [#allocation13], %s2749_s11  ;;  %s3537_s12 = smov 64  }
  0x51   : > { %s973_s6 = sshll.u32 %s965_s13, 4  ;;  %s4335_s22 = sld [smem:[#allocation50_spill]]  ;;  %s974_s6 = int_to_ptr.vmem [resolvable:$true] %s973_s6 }
  0x52   : > { %s950_s4 = scalar_lea.hbm %s4333_s20, %s3526_s10  ;;  %s4336_s24 = sld [smem:[#allocation52_spill]] }
  0x53   : > { %s952_s23 = sshll.u32 %s950_s4, 4  ;;  %s3538_s4 = smov 4   ;;  %s953_s23 = int_to_ptr.hbm [resolvable:$true] %s952_s23 }
  0x54   : > { %2944 = dma.hbm_to_vmem [thread:$0]  (!%p3802_p1), %s953_s23, 16, %s955_s28, %s3814_s27  }
  0x55   : > { %s970_s5 = scalar_lea.hbm %s4334_s21, %s2869_s15  ;;  %s986_s15 = scalar_lea.vmem [#allocation14], %s3798_s2 }
  0x56   : > { %s971_s16 = sshll.u32 %s970_s5, 4  ;;  %s993_s3 = sshll.u32 %s986_s15, 4  ;;  %s972_s16 = int_to_ptr.hbm [resolvable:$true] %s971_s16  ;;  %s994_s3 = int_to_ptr.vmem [resolvable:$true] %s993_s3 }
  0x57   : > { %2947 = dma.hbm_to_vmem [thread:$0]  (!%p3802_p1), %s972_s16, 256, %s974_s6, %s3814_s27, %s3537_s12, %s3537_s12, %s3538_s4  }
  0x58   : > { %s989_s14 = scalar_lea.hbm %s4335_s22, %s3526_s10  ;;  %s1014_s18 = scalar_lea.hbm %s4336_s24, %s3526_s10 }
  0x59   : > { %s991_s11 = sshll.u32 %s989_s14, 4  ;;  %s1011_s19 = scalar_lea.vmem [#allocation15], %s3798_s2  ;;  %s992_s11 = int_to_ptr.hbm [resolvable:$true] %s991_s11 }
  0x5a   : > { %2950 = dma.hbm_to_vmem [thread:$0]  (!%p3802_p1), %s992_s11, 16, %s994_s3, %s3814_s27  }
  0x5b   : > { %s1018_s6 = sshll.u32 %s1011_s19, 4  ;;  %s1016_s16 = sshll.u32 %s1014_s18, 4  ;;  %s1019_s6 = int_to_ptr.vmem [resolvable:$true] %s1018_s6  ;;  %s1017_s16 = int_to_ptr.hbm [resolvable:$true] %s1016_s16 }
  0x5c   : > { %2953 = dma.hbm_to_vmem [thread:$0]  (!%p3802_p1), %s1017_s16, 16, %s1019_s6, %s3814_s27  }
  0x5d   : > { %s4337_s25 = sld [smem:[#allocation53_spill]]  ;;  %s1028_s23 = scalar_lea.vmem [#allocation16], %s3798_s2 }
  0x5e   : > { %s1035_s14 = sshll.u32 %s1028_s23, 4  ;;  %s4338_s3 = sld [smem:[#allocation33_spill]]  ;;  %s1036_s14 = int_to_ptr.vmem [resolvable:$true] %s1035_s14 }
  0x5f   : > { %s3539_s5 = smov [#allocation6]   ;;  %s4339_s26 = sld [smem:[#allocation54_spill]] }
  0x60   : > { %s791_s13 = sshll.u32 %s3539_s5, 4  ;;  %s792_s13 = int_to_ptr.vmem [resolvable:$true] %s791_s13 }
  0x63   : > { %s1031_s28 = scalar_lea.hbm %s4337_s25, %s3526_s10 }
  0x64   : > { %s1033_s15 = sshll.u32 %s1031_s28, 4  ;;  %s789_s11 = sshll.u32 %s4338_s3, 4  ;;  %s1034_s15 = int_to_ptr.hbm [resolvable:$true] %s1033_s15  ;;  %s790_s11 = int_to_ptr.hbm [resolvable:$true] %s789_s11 }
  0x65   : > { %2956 = dma.hbm_to_vmem [thread:$0]  (!%p3802_p1), %s1034_s15, 16, %s1036_s14, %s3814_s27  }
  0x66   : > { %s1048_s12 = scalar_lea.hbm %s4339_s26, %s3526_s10  ;;  %s1045_s28 = scalar_lea.vmem [#allocation17], %s3798_s2 }
  0x67   : > { %2928 = dma.hbm_to_vmem [thread:$0]  (!%p3793_p0), %s790_s11, 16, %s792_s13, [#allocation7]  }
  0x68   : > { %s1050_s4 = sshll.u32 %s1048_s12, 4  ;;  %s1052_s23 = sshll.u32 %s1045_s28, 4  ;;  %s1051_s4 = int_to_ptr.hbm [resolvable:$true] %s1050_s4  ;;  %s1053_s23 = int_to_ptr.vmem [resolvable:$true] %s1052_s23 }
  0x69   : > { %2959 = dma.hbm_to_vmem [thread:$0]  (!%p3802_p1), %s1051_s4, 16, %s1053_s23, %s3814_s27  }
  0x6a   : > { %1061 = sbr.rel (%p3784_p11) target bundleno = 3141 (0xc45), region = 128 }
  0x6f   : > { %3493 = dma.done.wait (%p3769_p7), [#allocation5], 16  }
  0x70   : > { %3495 = vsyncadd (%p3769_p7), [#allocation5], 4294967280 }
  0x71   : > { %3497 = dma.done.wait (%p3769_p7), [#allocation7], 16  }
  0x72   : > { %3499 = vsyncadd (%p3769_p7), [#allocation7], 4294967280  ;;  %s4340_s17 = sadd.s32 4294967295, %s3534_s1   ;;  %s3909_s2 = sand.u32 1, %s3510_s9  }
  0x73   : > { %s1073_s27 = sand.u32 1, %s4340_s17  }
  0x74   : > { %s1074_s8 = scalar_lea.sflag [#allocation5], %s1073_s27 }
  0x75   : > { %3501 = dma.done.wait (%p3777_p10), %s1074_s8, 400  }
  0x76   : > { %3503 = vsyncadd (%p3777_p10), %s1074_s8, 4294966896  ;;  %s4341_s14 = sld [smem:[#allocation22_spill]]  ;;  %s2755_s29 = sshll.u32 %s3909_s2, 4 }
  0x77   : > { %p1310_p2 = scmp.lt.s32.totalorder %s3522_s0, 1  ;;  %s4343_s6 = sld [smem:[#allocation28_spill]] }
  0x78   : > { %s4344_s23 = sld [smem:[#allocation35_spill]]  ;;  %s1085_s8 = scalar_lea.vmem [#allocation9], %s3909_s2 }
  0x79   : > { %s4384_s0 = smov (!%p1310_p2, %s3522_s0), 1  ;;  %s4346_s3 = sld [smem:[#allocation37_spill]] }
  0x7a   : > { %s2756_s30 = sshll.u32 %s4384_s0, 3  ;;  %s4350_s19 = sld [smem:[#allocation41_spill]] }
  0x7b   : > { %s4351_s26 = sld [smem:[#allocation43_spill]]  ;;  %s1094_s20 = scalar_lea.vmem [#allocation10], %s3909_s2 }
  0x7c   : > { %p1314_p3 = scmp.lt.s32.totalorder %s4341_s14, 5  ;;  %s1103_s24 = scalar_lea.vmem [#allocation11], %s3909_s2 }
  0x7d   : > { %s3933_s16 = scalar_lea.vmem %s4343_s6, %s2756_s30  ;;  %s4352_s6 = sld [smem:[#allocation45_spill]] }
  0x7e   : > { %s3923_s15 = scalar_select %p1314_p3, %s4341_s14, 5 }
  0x7f   : > { %s3985_s7 = scalar_lea.vmem [#allocation13], %s2755_s29  ;;  %s1131_s25 = scalar_lea.vmem [#allocation14], %s3909_s2 }
  0x80   : > { %s2870_s12 = sshll.u32 %s3923_s15, 4  ;;  %s2875_s22 = sshll.u32 %s3923_s15, 5 }
  0x81   : > { %s1318_s17 = scalar_lea.vmem %s4344_s23, %s2870_s12  ;;  %s3946_s11 = scalar_lea.vmem %s4346_s3, %s2870_s12 }
  0x82   : > { %s3963_s18 = scalar_lea.vmem %s4350_s19, %s2870_s12  ;;  %s3968_s5 = scalar_lea.vmem %s4351_s26, %s2870_s12 }
  0x83   : > { %s3973_s21 = scalar_lea.vmem %s4352_s6, %s2870_s12  ;;  %s4353_s23 = sld [smem:[#allocation51_spill]] }
  0x84   : > { %s1112_s19 = scalar_lea.vmem [#allocation12], %s3909_s2  ;;  %s1140_s26 = scalar_lea.vmem [#allocation15], %s3909_s2 }
  0x85   : > { %s1149_s3 = scalar_lea.vmem [#allocation16], %s3909_s2  ;;  %s1158_s10 = scalar_lea.vmem [#allocation17], %s3909_s2 }
  0x86   : > { %p2769_p4 = scmp.ne.s32.totalorder %s4341_s14, 0 }
  0x88   : > { %1363 = sbr.rel (%p2769_p4) target bundleno = 143 (0x8f), region = 180 }
  0x89   : > { %s3979_s27 = scalar_lea.vmem %s4353_s23, %s2875_s22 }
  0x8d   : > { %vm1364_vm0 = vcmask 253952   ;;  %v3540_v1 = vmov 1.0  }
  0x8e   : > { %1365 = vst.msk [vmem:[#allocation2] sm:$0x1] %vm1364_vm0, %v3540_v1 }
  0x8f PF: > { %v2877_v2 = vld [vmem:[%s1318_s17 + $0x8] sm:$0xff]  ;;  %v2876_v4 = vld [vmem:[%s1318_s17] sm:$0xff]  ;;  %vm1386_vm1 = vcmask 261120   ;;  %s4354_s12 = sld [smem:[#allocation36_spill]]  ;;  %vm1440_vm2 = vcmask 253952   ;;  %v3541_v19 = vmov 32.0  }
  0x90   : > { %v2879_v3 = vld [vmem:[%s3946_s11 + $0x8] sm:$0xff]  ;;  %1396 = vmatpush.bf16.msra.mxu0 %v2877_v2  ;;  %v2878_v7 = vld [vmem:[%s3946_s11] sm:$0xff]  ;;  %s4356_s30 = sld [smem:[#allocation38_spill]]  ;;  %3058 = vrcp.f32 %v3541_v19  ;;  %vm1546_vm4 = vcmask 31744   ;;  %s3542_s11 = smov 124   ;;  %vm1566_vm8 = vcmask 57344  }
  0x91   : > { %1430 = vmatpush.bf16.msra.mxu1 %v2879_v3  ;;  %v2883_v20 = vld [vmem:[%s3968_s5 + $0x8] sm:$0xff]  ;;  %v2882_v21 = vld [vmem:[%s3968_s5] sm:$0xff]  ;;  %s4358_s4 = sld [smem:[#allocation39_spill]]  ;;  %s3545_s17 = smov 100   ;;  %vm1599_vm11 = vcmask 1043456   ;;  %vm1595_vm14 = vcmask 64512  }
  0x92   : > { %1537 = vmatpush.bf16.msra.mxu3 %v2883_v20  ;;  %v1367_v22 = vld [vmem:[%s3933_s16] sm:$0xff]  ;;  %v2881_v35 = vld [vmem:[%s3963_s18 + $0x8] sm:$0xff]  ;;  %s3543_s16 = smov 120   ;;  %s4360_s29 = sld [smem:[#allocation40_spill]] }
  0x93   : > { %v1511_v24 = vpack.c.bf16 %v1367_v22, %v1367_v22  ;;  %1499 = vmatpush.bf16.msra.mxu2 %v2881_v35  ;;  %v2880_v36 = vld [vmem:[%s3963_s18] sm:$0xff]  ;;  %s3544_s18 = smov 116   ;;  %s3547_s28 = smov 112  }
  0x94   : > { %1397 = vmatpush.bf16.msra.mxu0 %v2876_v4  ;;  %v3057_v37 = vld [vmem:[%s1085_s8] ss:$0 sm:$0xff]  ;;  %s3553_s5 = smov 80   ;;  %s3554_s22 = smov 88  }
  0x95   : > { %v1366_v5 = vld [vmem:[#allocation2] sm:$0x1]  ;;  %1431 = vmatpush.bf16.msra.mxu1 %v2878_v7  ;;  %s4355_s6 = scalar_lea.vmem %s4354_s12, %s3923_s15  ;;  %s3557_s8 = smov 8  }
  0x96   : > { %v1372_v6 = vpack.c.bf16 %v1366_v5, %v1366_v5  ;;  %v1373_v8 = vld [vmem:[%s4355_s6] sm:$0x1]  ;;  %s4357_s13 = scalar_lea.vmem %s4356_s30, %s3923_s15  ;;  %v3059_v23 = vpop.eup %3058  ;;  %1538 = vmatpush.bf16.msra.mxu3 %v2882_v21  ;;  %s4362_s6 = scalar_lea.vmem [#allocation8], %s3909_s2 }
  0x97   : > { %v1408_v13 = vld [vmem:[%s4357_s13] sm:$0x1]  ;;  %v1445_v25 = vmul.f32 32.0, %v3059_v23  ;;  %vm1449_vm3 = vweird.f32 %v3059_v23  ;;  %1500 = vmatpush.bf16.msra.mxu2 %v2880_v36  ;;  %s4359_s23 = scalar_lea.vmem %s4358_s4, %s3923_s15  ;;  %s3548_s30 = smov 104  }
  0x98   : > { %2778 = vmatmul.msk.bf16.vlgmr.msra.gmra.mxu0 %vm1386_vm1, %v1372_v6  ;;  %v1438_v53 = vld [vmem:[%s4359_s23] sm:$0x1]  ;;  %s4361_s12 = scalar_lea.vmem %s4360_s29, %s3923_s15  ;;  %s3546_s15 = smov 108  }
  0x99   : > { %2805 = vmatmul.msk.bf16.vlgmr.msra.gmra.mxu3 %vm1386_vm1, %v1511_v24  ;;  %v1446_v26 = vsub.f32 1.0, %v1445_v25  ;;  %v1439_v55 = vld [vmem:[%s4361_s12] sm:$0x1]  ;;  %s3549_s13 = smov 84   ;;  %s3555_s4 = smov 72  }
  0x9a   : > { %v1477_v59 = vld [vmem:[%s4362_s6] sm:$0x1]  ;;  %s3556_s23 = smov 68   ;;  %s3558_s14 = smov 4  }
  0x9b   : > { %v1447_v27 = vmul.f32 %v3059_v23, %v1446_v26  ;;  %s3559_s29 = smov 12   ;;  %s3560_s12 = smov 16  }
  0x9c   : > { %s3561_s6 = smov 24  }
  0x9d   : > { %v1448_v28 = vadd.f32 %v3059_v23, %v1447_v27 }
  0x9f   : > { %v4011_v29 = vsel %vm1449_vm3, %v3059_v23, %v1448_v28 }
 0x115   : > { %v1399_v9 = vpop.f32.mrf.mxu0 }
 0x116   : > { %v1400_v10 = vadd.f32 %v1399_v9, %v1373_v8 }
 0x118   : > { %v1407_v11 = vpack.c.bf16 %v1400_v10, %v1400_v10 }
 0x11a   : > { %2787 = vmatmul.msk.bf16.vlgmr.msra.gmra.mxu1 %vm1386_vm1, %v1407_v11 }
 0x11c   : > { %v1540_v38 = vpop.f32.mrf.mxu3 }
 0x11d   : > { %v1401_v12 = vpop.f32.mrf.mxu0  ;;  %v1541_v41 = vadd.f32 %v3057_v37, %v1540_v38 }
 0x11f   : > { %v4020_v43 = vpack.c.bf16 %v1541_v41, %v1541_v41 }
 0x121   : > { %1619 = vrot.lane.b32.xlu1 %v4020_v43, %s3542_s11  ;;  %v1551_v44 = vsel %vm1546_vm4, %v4020_v43, 0  ;;  %1757 = vrot.lane.b32.xlu2 %v4020_v43, %s3544_s18 }
 0x122   : > { %1560 = vmatpush.bf16.xpose.msrb.mxu0 %v1551_v44 }
 0x124   : > { %v1542_v45 = vpop.f32.mrf.mxu3 }
 0x17b   : > { %v1758_v2 = vpop.permute.xlu2 %1757 }
 0x17c   : > { %v1763_v4 = vsel %vm1546_vm4, %v1758_v2, 0 }
 0x193   : > { %v1620_v1 = vpop.permute.xlu1 %1619 }
 0x194   : > { %v1625_v3 = vsel %vm1546_vm4, %v1620_v1, 0 }
 0x195   : > { %1634 = vmatpush.bf16.xpose.msrb.mxu2 %v1625_v3 }
 0x197   : > { %v1433_v14 = vpop.f32.mrf.mxu1 }
 0x198   : > { %v1434_v15 = vadd.f32 %v1433_v14, %v1408_v13 }
 0x19a   : > { %v1437_v16 = vadd.f32 %v1434_v15, %v1366_v5 }
 0x19c   : > { %v1441_v17 = vsel %vm1440_vm2, %v1437_v16, 0.0 }
 0x19d   : > { %1442 = vadd.xlane.f32.xlu0 %v1441_v17 }
 0x19f   : > { %v1435_v18 = vpop.f32.mrf.mxu1 }
 0x210   : > { %v1443_v30 = vpop.xlane.xlu0 %1442 }
 0x211   : > { %v1451_v31 = vmul.f32 %v4011_v29, %v1443_v30 }
 0x213   : > { %v1452_v32 = vsub.f32 %v1437_v16, %v1451_v31 }
 0x215   : > { %v1453_v33 = vmul.f32 %v1452_v32, %v1452_v32 }
 0x217   : > { %v1454_v34 = vsel %vm1440_vm2, %v1453_v33, 0.0 }
 0x218   : > { %1455 = vadd.xlane.f32.xlu0 %v1454_v34 }
 0x22c   : > { %1688 = vrot.lane.b32.xlu0 %v4020_v43, %s3543_s16 }
 0x28b   : > { %v1456_v39 = vpop.xlane.xlu0 %1455 }
 0x28c   : > { %v1457_v40 = vmul.f32 %v1456_v39, %v4011_v29 }
 0x28e   : > { %v1458_v42 = vadd.f32 1e-05, %v1457_v40 }
 0x290   : > { %3060 = vrsqrt.f32 %v1458_v42  ;;  %vm1465_vm6 = vweird.f32 %v1458_v42 }
 0x296   : > { %v3061_v46 = vpop.eup %3060 }
 0x297   : > { %v1460_v47 = vmul.f32 %v3061_v46, %v1458_v42  ;;  %vm1466_vm5 = vweird.f32 %v3061_v46 }
 0x298   : > { %vm1467_vm7 = vmor %vm1465_vm6, %vm1466_vm5 }
 0x299   : > { %v1461_v48 = vmul.f32 %v3061_v46, %v1460_v47 }
 0x29b   : > { %v1462_v49 = vmul.f32 0.5, %v1461_v48 }
 0x29d   : > { %v1463_v50 = vsub.f32 1.5, %v1462_v49 }
 0x29e   : > { %v1689_v5 = vpop.permute.xlu0 %1688 }
 0x29f   : > { %v1464_v51 = vmul.f32 %v3061_v46, %v1463_v50  ;;  %v1694_v6 = vsel %vm1546_vm4, %v1689_v5, 0 }
 0x2a0   : > { %1703 = vmatpush.bf16.xpose.msra.mxu0 %v1694_v6 }
 0x2a1   : > { %v1468_v52 = vsel %vm1467_vm7, %v3061_v46, %v1464_v51 }
 0x2a2   : > { %v1469_v54 = vmul.f32 %v1468_v52, %v1452_v32 }
 0x2a4   : > { %v1470_v56 = vmul.f32 %v1469_v54, %v1438_v53 }
 0x2a6   : > { %v4039_v57 = vadd.f32 %v1470_v56, %v1439_v55 }
 0x2a8   : > { %v1476_v58 = vpack.c.bf16 %v4039_v57, %v4039_v57 }
 0x2aa   : > { %2796 = vmatmul.msk.bf16.vlgmr.msra.gmra.mxu2 %vm1386_vm1, %v1476_v58 }
 0x2ab   : > { %1772 = vmatpush.bf16.xpose.msra.mxu2 %v1763_v4 }
 0x32d   : > { %v1502_v60 = vpop.f32.mrf.mxu2 }
 0x32e   : > { %v1503_v61 = vadd.f32 %v1502_v60, %v1477_v59 }
 0x330   : > { %v1506_v62 = vmul.f32 0.5, %v1503_v61 }
 0x332   : > { %v1544_v63 = vpack.c.bf16 %v1506_v62, %v1506_v62 }
 0x334   : > { %2031 = vrot.lane.b32.xlu0 %v1544_v63, %s3545_s17  ;;  %1755 = vrot.lane.b32.xlu2 %v1544_v63, %s3544_s18  ;;  %s3552_s18 = smov 76  }
 0x335   : > { %1617 = vrot.lane.b32.xlu1 %v1544_v63, %s3542_s11  ;;  %2806 = vmatmul.msk.bf16.vlgmr.msrb.gmra.mxu0 %vm1546_vm4, %v1544_v63  ;;  %v1504_v0 = vpop.f32.mrf.mxu2  ;;  %s3550_s11 = smov 96  }
 0x33c   : > { %1686 = vrot.lane.b32.xlu2 %v1544_v63, %s3543_s16  ;;  %s3551_s16 = smov 92  }
 0x33d   : > { %1895 = vrot.lane.b32.xlu1 %v4020_v43, %s3546_s15 }
 0x344   : > { %1826 = vrot.lane.b32.xlu2 %v4020_v43, %s3547_s28 }
 0x345   : > { %1893 = vrot.lane.b32.xlu1 %v1544_v63, %s3546_s15  ;;  %s3563_s15 = smov 28  }
 0x34c   : > { %1824 = vrot.lane.b32.xlu2 %v1544_v63, %s3547_s28 }
 0x34d   : > { %2033 = vrot.lane.b32.xlu1 %v4020_v43, %s3545_s17  ;;  %s3562_s17 = smov 20  }
 0x354   : > { %1962 = vrot.lane.b32.xlu2 %v1544_v63, %s3548_s30 }
 0x355   : > { %1964 = vrot.lane.b32.xlu1 %v4020_v43, %s3548_s30 }
 0x38e   : > { %v1756_v7 = vpop.permute.xlu2 %1755 }
 0x396   : > { %v1687_v8 = vpop.permute.xlu2 %1686 }
 0x397   : > { %2810 = vmatmul.msk.bf16.vlgmr.msra.gmra.mxu0 %vm1546_vm4, %v1687_v8 }
 0x39e   : > { %v1827_v9 = vpop.permute.xlu2 %1826 }
 0x39f   : > { %v1832_v10 = vsel %vm1546_vm4, %v1827_v9, 0 }
 0x3a0   : > { %1841 = vmatpush.bf16.xpose.msrb.mxu0 %v1832_v10 }
 0x3a6   : > { %v1825_v11 = vpop.permute.xlu2 %1824  ;;  %v2032_v24 = vpop.permute.xlu0 %2031 }
 0x3a7   : > { %v1618_v12 = vpop.permute.xlu1 %1617  ;;  %2814 = vmatmul.msk.bf16.vlgmr.msrb.gmra.mxu0 %vm1546_vm4, %v1825_v11 }
 0x3a8   : > { %2808 = vmatmul.msk.bf16.vlgmr.msrb.gmra.mxu2 %vm1546_vm4, %v1618_v12 }
 0x3ae   : > { %v1963_v23 = vpop.permute.xlu2 %1962 }
 0x3af   : > { %v1896_v13 = vpop.permute.xlu1 %1895 }
 0x3b0   : > { %v1901_v14 = vsel %vm1546_vm4, %v1896_v13, 0 }
 0x3b1   : > { %1910 = vmatpush.bf16.xpose.msrb.mxu2 %v1901_v14 }
 0x3b2   : > { %v1562_v15 = vpop.f32.mrf.mxu0 }
 0x3b3   : > { %v1567_v16 = vsel %vm1566_vm8, %v1562_v15, -inf }
 0x3b4   : > { %1568 = vmax.xlane.f32.xlu1 %v1567_v16 }
 0x3b7   : > { %v1894_v17 = vpop.permute.xlu1 %1893 }
 0x3b8   : > { %2812 = vmatmul.msk.bf16.vlgmr.msra.gmra.mxu2 %vm1546_vm4, %v1756_v7 }
 0x3ba   : > { %v1564_v18 = vpop.f32.mrf.mxu0 }
 0x3bf   : > { %v2034_v19 = vpop.permute.xlu1 %2033 }
 0x3c0   : > { %v2039_v20 = vsel %vm1546_vm4, %v2034_v19, 0 }
 0x3c1   : > { %2048 = vmatpush.bf16.xpose.msra.mxu2 %v2039_v20 }
 0x3c7   : > { %v1965_v21 = vpop.permute.xlu1 %1964 }
 0x3c8   : > { %v1970_v22 = vsel %vm1546_vm4, %v1965_v21, 0  ;;  %2816 = vmatmul.msk.bf16.vlgmr.msrb.gmra.mxu2 %vm1546_vm4, %v1894_v17 }
 0x3c9   : > { %1979 = vmatpush.bf16.xpose.msra.mxu0 %v1970_v22 }
 0x3d0   : > { %2818 = vmatmul.msk.bf16.vlgmr.msra.gmra.mxu0 %vm1546_vm4, %v1963_v23 }
 0x3d8   : > { %2820 = vmatmul.msk.bf16.vlgmr.msra.gmra.mxu2 %vm1546_vm4, %v2032_v24 }
 0x414   : > { %v1705_v25 = vpop.f32.mrf.mxu0 }
 0x415   : > { %v1709_v26 = vsel %vm1566_vm8, %v1705_v25, -inf }
 0x416   : > { %1710 = vmax.xlane.f32.xlu0 %v1709_v26 }
 0x41c   : > { %v1707_v27 = vpop.f32.mrf.mxu0 }
 0x424   : > { %v1843_v28 = vpop.f32.mrf.mxu0 }
 0x425   : > { %v1847_v30 = vsel %vm1566_vm8, %v1843_v28, -inf }
 0x426   : > { %1848 = vmax.xlane.f32.xlu1 %v1847_v30 }
 0x427   : > { %v1569_v31 = vpop.xlane.xlu1 %1568 }
 0x428   : > { %v1570_v32 = vsub.f32 %v1562_v15, %v1569_v31 }
 0x42a   : > { %v1571_v33 = vmul.f32 1.442695, %v1570_v32 }
 0x42b   : > { %v1636_v34 = vpop.f32.mrf.mxu2 }
 0x42c   : > { %3062 = vpow2.f32 %v1571_v33  ;;  %v1640_v35 = vsel %vm1566_vm8, %v1636_v34, -inf  ;;  %v1845_v36 = vpop.f32.mrf.mxu0 }
 0x42d   : > { %1641 = vmax.xlane.f32.xlu0 %v1640_v35 }
 0x432   : > { %v4071_v37 = vpop.eup %3062 }
 0x433   : > { %v1638_v38 = vpop.f32.mrf.mxu2  ;;  %v1573_v39 = vsel %vm1566_vm8, %v4071_v37, 0.0 }
 0x435   : > { %1574 = vadd.xlane.f32.xlu0 %v1573_v39 }
 0x43b   : > { %v1774_v40 = vpop.f32.mrf.mxu2 }
 0x43c   : > { %v1778_v41 = vsel %vm1566_vm8, %v1774_v40, -inf }
 0x43d   : > { %1779 = vmax.xlane.f32.xlu2 %v1778_v41 }
 0x443   : > { %v1776_v42 = vpop.f32.mrf.mxu2 }
 0x449   : > { %1803 = vrot.lane.b32.xlu0 %v4020_v43, %s3549_s13 }
 0x44b   : > { %v4077_v44 = vpop.f32.mrf.mxu2 }
 0x44c   : > { %v1916_v52 = vsel %vm1566_vm8, %v4077_v44, -inf }
 0x44d   : > { %v4079_v45 = vpop.f32.mrf.mxu0 }
 0x44e   : > { %v1985_v46 = vsel %vm1566_vm8, %v4079_v45, -inf }
 0x44f   : > { %1986 = vmax.xlane.f32.xlu1 %v1985_v46 }
 0x453   : > { %v1914_v47 = vpop.f32.mrf.mxu2 }
 0x455   : > { %1593 = vrot.lane.b32.xlu2 %v4020_v43, %s3550_s11  ;;  %v1983_v48 = vpop.f32.mrf.mxu0 }
 0x45b   : > { %v4084_v49 = vpop.f32.mrf.mxu2 }
 0x45c   : > { %v2054_v51 = vsel %vm1566_vm8, %v4084_v49, -inf }
 0x463   : > { %v2052_v50 = vpop.f32.mrf.mxu2 }
 0x468   : > { %1665 = vrot.lane.b32.xlu1 %v4020_v43, %s3551_s16 }
 0x473   : > { %2055 = vmax.xlane.f32.xlu0 %v2054_v51 }
 0x47e   : > { %1917 = vmax.xlane.f32.xlu2 %v1916_v52 }
 0x489   : > { %v1711_v53 = vpop.xlane.xlu0 %1710 }
 0x48a   : > { %v1712_v54 = vsub.f32 %v1705_v25, %v1711_v53 }
 0x48c   : > { %v1713_v55 = vmul.f32 1.442695, %v1712_v54 }
 0x48e   : > { %3064 = vpow2.f32 %v1713_v55 }
 0x494   : > { %v4091_v56 = vpop.eup %3064 }
 0x495   : > { %v1715_v58 = vsel %vm1566_vm8, %v4091_v56, 0.0 }
 0x496   : > { %1716 = vadd.xlane.f32.xlu0 %v1715_v58 }
 0x499   : > { %v1849_v59 = vpop.xlane.xlu1 %1848 }
 0x49a   : > { %v1850_v60 = vsub.f32 %v1843_v28, %v1849_v59 }
 0x49c   : > { %v1851_v61 = vmul.f32 1.442695, %v1850_v60 }
 0x49e   : > { %3066 = vpow2.f32 %v1851_v61 }
 0x4a0   : > { %v1642_v62 = vpop.xlane.xlu0 %1641 }
 0x4a1   : > { %v1643_v63 = vsub.f32 %v1636_v34, %v1642_v62 }
 0x4a3   : > { %v1644_v0 = vmul.f32 1.442695, %v1643_v63 }
 0x4a4   : > { %v4095_v1 = vpop.eup %3066 }
 0x4a5   : > { %3068 = vpow2.f32 %v1644_v0  ;;  %v1853_v2 = vsel %vm1566_vm8, %v4095_v1, 0.0 }
 0x4a6   : > { %1854 = vadd.xlane.f32.xlu1 %v1853_v2 }
 0x4a8   : > { %v1575_v3 = vpop.xlane.xlu0 %1574 }
 0x4a9   : > { %3070 = vrcp.f32 %v1575_v3  ;;  %v1587_v11 = vand.u32 2147483648, %v1575_v3  ;;  %v1585_v14 = vand.u32 2147483647, %v1575_v3  ;;  %vm1581_vm10 = vweird.f32 %v1575_v3 }
 0x4aa   : > { %1941 = vrot.lane.b32.xlu0 %v4020_v43, %s3552_s18 }
 0x4ab   : > { %v4100_v4 = vpop.eup %3068  ;;  %v1588_v16 = vor.u32 1.1754944e-38, %v1587_v11  ;;  %vm1586_vm13 = vcmp.eq.f32.partialorder %v1585_v14, 8.507059e+37 }
 0x4ac   : > { %v1646_v5 = vsel %vm1566_vm8, %v4100_v4, 0.0 }
 0x4ad   : > { %1647 = vadd.xlane.f32.xlu2 %v1646_v5 }
 0x4af   : > { %v3071_v6 = vpop.eup %3070 }
 0x4b0   : > { %v1577_v7 = vmul.f32 %v3071_v6, %v1575_v3  ;;  %v1780_v8 = vpop.xlane.xlu2 %1779  ;;  %vm1582_vm9 = vweird.f32 %v3071_v6 }
 0x4b1   : > { %v1781_v9 = vsub.f32 %v1774_v40, %v1780_v8  ;;  %vm1583_vm12 = vmor %vm1581_vm10, %vm1582_vm9 }
 0x4b2   : > { %v1578_v10 = vsub.f32 1.0, %v1577_v7 }
 0x4b3   : > { %v1782_v12 = vmul.f32 1.442695, %v1781_v9 }
 0x4b4   : > { %v1579_v13 = vmul.f32 %v3071_v6, %v1578_v10 }
 0x4b5   : > { %3072 = vpow2.f32 %v1782_v12 }
 0x4b6   : > { %v1580_v15 = vadd.f32 %v3071_v6, %v1579_v13 }
 0x4b8   : > { %v1594_v17 = vpop.permute.xlu2 %1593  ;;  %v1584_v18 = vsel %vm1583_vm12, %v3071_v6, %v1580_v15 }
 0x4b9   : > { %v1601_v19 = vsel %vm1599_vm11, %v1594_v17, 0  ;;  %v1589_v20 = vsel %vm1586_vm13, %v1588_v16, %v1584_v18 }
 0x4ba   : > { %1610 = vmatpush.bf16.msrb.mxu1 %v1601_v19  ;;  %v1590_v21 = vmul.f32 %v4071_v37, %v1589_v20 }
 0x4bb   : > { %v4106_v22 = vpop.eup %3072  ;;  %v1804_v31 = vpop.permute.xlu0 %1803 }
 0x4bc   : > { %v1784_v23 = vsel %vm1566_vm8, %v4106_v22, 0.0  ;;  %v1591_v24 = vpack.c.bf16 %v1590_v21, %v1590_v21  ;;  %v1809_v34 = vsel %vm1599_vm11, %v1804_v31, 0 }
 0x4bd   : > { %1785 = vadd.xlane.f32.xlu2 %v1784_v23 }
 0x4be   : > { %2807 = vmatmul.msk.bf16.vlgmr.msrb.gmra.mxu1 %vm1595_vm14, %v1591_v24 }
 0x4bf   : > { %1872 = vrot.lane.b32.xlu1 %v4020_v43, %s3553_s5 }
 0x4c2   : > { %v1987_v25 = vpop.xlane.xlu1 %1986 }
 0x4c3   : > { %v1988_v26 = vsub.f32 %v4079_v45, %v1987_v25 }
 0x4c5   : > { %v1989_v27 = vmul.f32 1.442695, %v1988_v26 }
 0x4c7   : > { %3074 = vpow2.f32 %v1989_v27 }
 0x4cd   : > { %v4113_v28 = vpop.eup %3074 }
 0x4ce   : > { %v1991_v30 = vsel %vm1566_vm8, %v4113_v28, 0.0 }
 0x4d4   : > { %1992 = vadd.xlane.f32.xlu0 %v1991_v30 }
 0x4d5   : > { %1734 = vrot.lane.b32.xlu2 %v4020_v43, %s3554_s22 }
 0x4da   : > { %v1666_v32 = vpop.permute.xlu1 %1665 }
 0x4db   : > { %v1671_v33 = vsel %vm1599_vm11, %v1666_v32, 0 }
 0x4dc   : > { %1680 = vmatpush.bf16.msrb.mxu3 %v1671_v33 }
 0x4e0   : > { %1818 = vmatpush.bf16.msra.mxu3 %v1809_v34 }
 0x4e6   : > { %v2056_v35 = vpop.xlane.xlu0 %2055 }
 0x4e7   : > { %v2057_v36 = vsub.f32 %v4084_v49, %v2056_v35 }
 0x4e9   : > { %v2058_v37 = vmul.f32 1.442695, %v2057_v36 }
 0x4eb   : > { %3076 = vpow2.f32 %v2058_v37 }
 0x4f1   : > { %v1918_v38 = vpop.xlane.xlu2 %1917  ;;  %v4122_v41 = vpop.eup %3076 }
 0x4f2   : > { %v1919_v39 = vsub.f32 %v4077_v44, %v1918_v38  ;;  %v2060_v46 = vsel %vm1566_vm8, %v4122_v41, 0.0 }
 0x4f4   : > { %v1920_v40 = vmul.f32 1.442695, %v1919_v39 }
 0x4f6   : > { %3078 = vpow2.f32 %v1920_v40 }
 0x4fc   : > { %v4124_v42 = vpop.eup %3078 }
 0x4fd   : > { %v1922_v45 = vsel %vm1566_vm8, %v4124_v42, 0.0 }
 0x4fe   : > { %1923 = vadd.xlane.f32.xlu0 %v1922_v45  ;;  %2061 = vadd.xlane.f32.xlu2 %v2060_v46 }
 0x509   : > { %v1717_v47 = vpop.xlane.xlu0 %1716 }
 0x50a   : > { %3080 = vrcp.f32 %v1717_v47  ;;  %v1729_v62 = vand.u32 2147483648, %v1717_v47  ;;  %vm1723_vm5 = vweird.f32 %v1717_v47  ;;  %v1727_v0 = vand.u32 2147483647, %v1717_v47 }
 0x50c   : > { %v1730_v8 = vor.u32 1.1754944e-38, %v1729_v62  ;;  %vm1728_vm9 = vcmp.eq.f32.partialorder %v1727_v0, 8.507059e+37 }
 0x510   : > { %v3081_v44 = vpop.eup %3080 }
 0x511   : > { %v1719_v49 = vmul.f32 %v3081_v44, %v1717_v47  ;;  %vm1724_vm0 = vweird.f32 %v3081_v44 }
 0x512   : > { %2010 = vrot.lane.b32.xlu0 %v4020_v43, %s3555_s4  ;;  %vm1725_vm7 = vmor %vm1723_vm5, %vm1724_vm0 }
 0x513   : > { %v1720_v50 = vsub.f32 1.0, %v1719_v49 }
 0x515   : > { %v1721_v54 = vmul.f32 %v3081_v44, %v1720_v50 }
 0x516   : > { %2079 = vrot.lane.b32.xlu2 %v4020_v43, %s3556_s23 }
 0x517   : > { %v1722_v60 = vadd.f32 %v3081_v44, %v1721_v54 }
 0x519   : > { %v4132_v51 = vpop.xlane.xlu1 %1854  ;;  %v1726_v6 = vsel %vm1725_vm7, %v3081_v44, %v1722_v60 }
 0x51a   : > { %v1731_v11 = vsel %vm1728_vm9, %v1730_v8, %v1726_v6  ;;  %v1867_v32 = vand.u32 2147483648, %v4132_v51  ;;  %v1865_v34 = vand.u32 2147483647, %v4132_v51 }
 0x51b   : > { %v1732_v16 = vmul.f32 %v4091_v56, %v1731_v11 }
 0x51c   : > { %v1942_v12 = vpop.permute.xlu0 %1941  ;;  %v1868_v39 = vor.u32 1.1754944e-38, %v1867_v32 }
 0x51d   : > { %v1947_v17 = vsel %vm1599_vm11, %v1942_v12, 0  ;;  %v1733_v56 = vpack.c.bf16 %v1732_v16, %v1732_v16 }
 0x520   : > { %v1648_v48 = vpop.xlane.xlu2 %1647 }
 0x521   : > { %3082 = vrcp.f32 %v1648_v48  ;;  %v1660_v59 = vand.u32 2147483648, %v1648_v48  ;;  %v1658_v43 = vand.u32 2147483647, %v1648_v48  ;;  %vm1654_vm3 = vweird.f32 %v1648_v48 }
 0x522   : > { %3084 = vrcp.f32 %v4132_v51 }
 0x523   : > { %v1661_v2 = vor.u32 1.1754944e-38, %v1660_v59  ;;  %vm1659_vm8 = vcmp.eq.f32.partialorder %v1658_v43, 8.507059e+37 }
 0x527   : > { %v3083_v52 = vpop.eup %3082 }
 0x528   : > { %v1650_v53 = vmul.f32 %v3083_v52, %v1648_v48  ;;  %vm1655_vm15 = vweird.f32 %v3083_v52  ;;  %v4135_v61 = vpop.eup %3084 }
 0x529   : > { %vm1656_vm6 = vmor %vm1654_vm3, %vm1655_vm15  ;;  %v1857_v7 = vmul.f32 %v4135_v61, %v4132_v51  ;;  %vm1862_vm12 = vweird.f32 %v4135_v61  ;;  %vm1861_vm15 = vweird.f32 %v4132_v51 }
 0x52a   : > { %v1651_v55 = vsub.f32 1.0, %v1650_v53  ;;  %vm1863_vm3 = vmor %vm1861_vm15, %vm1862_vm12 }
 0x52b   : > { %v1858_v13 = vsub.f32 1.0, %v1857_v7 }
 0x52c   : > { %v1652_v58 = vmul.f32 %v3083_v52, %v1651_v55 }
 0x52d   : > { %v1859_v21 = vmul.f32 %v4135_v61, %v1858_v13 }
 0x52e   : > { %v1653_v63 = vadd.f32 %v3083_v52, %v1652_v58 }
 0x52f   : > { %v1860_v31 = vadd.f32 %v4135_v61, %v1859_v21 }
 0x530   : > { %v1786_v3 = vpop.xlane.xlu2 %1785  ;;  %v1657_v5 = vsel %vm1656_vm6, %v3083_v52, %v1653_v63  ;;  %vm1866_vm6 = vcmp.eq.f32.partialorder %v1865_v34, 8.507059e+37 }
 0x531   : > { %3086 = vrcp.f32 %v1786_v3  ;;  %v1662_v9 = vsel %vm1659_vm8, %v1661_v2, %v1657_v5  ;;  %v1873_v18 = vpop.permute.xlu1 %1872  ;;  %v1798_v25 = vand.u32 2147483648, %v1786_v3  ;;  %v1796_v30 = vand.u32 2147483647, %v1786_v3 }
 0x532   : > { %v1663_v10 = vmul.f32 %v4100_v4, %v1662_v9  ;;  %v1878_v24 = vsel %vm1599_vm11, %v1873_v18, 0  ;;  %vm1792_vm13 = vweird.f32 %v1786_v3  ;;  %v1864_v37 = vsel %vm1863_vm3, %v4135_v61, %v1860_v31 }
 0x533   : > { %v1799_v35 = vor.u32 1.1754944e-38, %v1798_v25  ;;  %vm1797_vm5 = vcmp.eq.f32.partialorder %v1796_v30, 8.507059e+37  ;;  %v1869_v46 = vsel %vm1866_vm6, %v1868_v39, %v1864_v37 }
 0x534   : > { %v1664_v14 = vpack.c.bf16 %v1663_v10, %v1663_v10  ;;  %v1870_v44 = vmul.f32 %v4095_v1, %v1869_v46  ;;  %v2885_v46 = vld [vmem:[%s3973_s21 + $0x8] sm:$0xff] }
 0x535   : > { %2167 = vmatpush.bf16.msrb.mxu0 %v2885_v46 }
 0x536   : > { %2809 = vmatmul.msk.bf16.vlgmr.msrb.gmra.mxu3 %vm1595_vm14, %v1664_v14  ;;  %v1871_v48 = vpack.c.bf16 %v1870_v44, %v1870_v44 }
 0x537   : > { %v3087_v15 = vpop.eup %3086  ;;  %1956 = vmatpush.bf16.msrb.mxu3 %v1947_v17 }
 0x538   : > { %v1788_v19 = vmul.f32 %v3087_v15, %v1786_v3  ;;  %v1735_v20 = vpop.permute.xlu2 %1734  ;;  %vm1793_vm10 = vweird.f32 %v3087_v15 }
 0x539   : > { %v1740_v23 = vsel %vm1599_vm11, %v1735_v20, 0  ;;  %vm1794_vm0 = vmor %vm1792_vm13, %vm1793_vm10 }
 0x53a   : > { %v1789_v4 = vsub.f32 1.0, %v1788_v19  ;;  %1749 = vmatpush.bf16.msra.mxu1 %v1740_v23 }
 0x53b   : > { %v4146_v26 = vpop.f32.mrf.mxu1 }
 0x53c   : > { %v1790_v27 = vmul.f32 %v3087_v15, %v1789_v4 }
 0x53d   : > { %2811 = vmatmul.msk.bf16.vlgmr.msra.gmra.mxu1 %vm1595_vm14, %v1733_v56 }
 0x53e   : > { %1887 = vmatpush.bf16.msrb.mxu1 %v1878_v24  ;;  %v1791_v33 = vadd.f32 %v3087_v15, %v1790_v27 }
 0x540   : > { %v1795_v36 = vsel %vm1794_vm0, %v3087_v15, %v1791_v33 }
 0x541   : > { %v1800_v38 = vsel %vm1797_vm5, %v1799_v35, %v1795_v36 }
 0x542   : > { %v1801_v40 = vmul.f32 %v4106_v22, %v1800_v38 }
 0x543   : > { %v1614_v45 = vpop.f32.mrf.mxu1 }
 0x544   : > { %v1802_v47 = vpack.c.bf16 %v1801_v40, %v1801_v40 }
 0x546   : > { %2813 = vmatmul.msk.bf16.vlgmr.msra.gmra.mxu3 %vm1595_vm14, %v1802_v47  ;;  %v2884_v47 = vld [vmem:[%s3973_s21] sm:$0xff] }
 0x547   : > { %v1993_v49 = vpop.xlane.xlu0 %1992  ;;  %2168 = vmatpush.bf16.msrb.mxu0 %v2884_v47 }
 0x548   : > { %3088 = vrcp.f32 %v1993_v49  ;;  %v2005_v60 = vand.u32 2147483648, %v1993_v49  ;;  %vm1999_vm8 = vweird.f32 %v1993_v49  ;;  %v2003_v62 = vand.u32 2147483647, %v1993_v49 }
 0x54a   : > { %v2006_v5 = vor.u32 1.1754944e-38, %v2005_v60  ;;  %vm2004_vm12 = vcmp.eq.f32.partialorder %v2003_v62, 8.507059e+37 }
 0x54d   : > { %2815 = vmatmul.msk.bf16.vlgmr.msrb.gmra.mxu1 %vm1595_vm14, %v1871_v48 }
 0x54e   : > { %v3089_v50 = vpop.eup %3088 }
 0x54f   : > { %v1995_v51 = vmul.f32 %v3089_v50, %v1993_v49  ;;  %vm2000_vm7 = vweird.f32 %v3089_v50 }
 0x550   : > { %vm2001_vm9 = vmor %vm1999_vm8, %vm2000_vm7  ;;  %vm2132_vm8 = vcmask 130048  }
 0x551   : > { %v1996_v52 = vsub.f32 1.0, %v1995_v51 }
 0x553   : > { %v1997_v22 = vmul.f32 %v3089_v50, %v1996_v52 }
 0x555   : > { %v1998_v59 = vadd.f32 %v3089_v50, %v1997_v22 }
 0x557   : > { %v2002_v2 = vsel %vm2001_vm9, %v3089_v50, %v1998_v59  ;;  %vm2134_vm9 = vcmask 162816  }
 0x558   : > { %v2007_v8 = vsel %vm2004_vm12, %v2006_v5, %v2002_v2  ;;  %vm2138_vm12 = vcmask 228352  }
 0x559   : > { %v2008_v13 = vmul.f32 %v4113_v28, %v2007_v8 }
 0x55b   : > { %v2009_v20 = vpack.c.bf16 %v2008_v13, %v2008_v13  ;;  %v2890_v13 = vld [vmem:[%s3979_s27 + $0x10] sm:$0xff] }
 0x571   : > { %v2062_v53 = vpop.xlane.xlu2 %2061  ;;  %v1924_v54 = vpop.xlane.xlu0 %1923 }
 0x572   : > { %3090 = vrcp.f32 %v2062_v53  ;;  %v1936_v3 = vand.u32 2147483648, %v1924_v54  ;;  %v1934_v7 = vand.u32 2147483647, %v1924_v54  ;;  %vm1930_vm13 = vweird.f32 %v1924_v54 }
 0x573   : > { %3092 = vrcp.f32 %v1924_v54  ;;  %v2074_v23 = vand.u32 2147483648, %v2062_v53  ;;  %vm2068_vm5 = vweird.f32 %v2062_v53  ;;  %v2072_v4 = vand.u32 2147483647, %v2062_v53 }
 0x574   : > { %v1937_v11 = vor.u32 1.1754944e-38, %v1936_v3  ;;  %vm1935_vm0 = vcmp.eq.f32.partialorder %v1934_v7, 8.507059e+37 }
 0x575   : > { %v2075_v24 = vor.u32 1.1754944e-38, %v2074_v23  ;;  %vm2073_vm7 = vcmp.eq.f32.partialorder %v2072_v4, 8.507059e+37  ;;  %v2175_v23 = vld [vmem:[%s1103_s24] sm:$0x1] }
 0x578   : > { %v3091_v55 = vpop.eup %3090 }
 0x579   : > { %v3093_v58 = vpop.eup %3092  ;;  %v2080_v1 = vpop.permute.xlu2 %2079  ;;  %v2064_v63 = vmul.f32 %v3091_v55, %v2062_v53  ;;  %vm2069_vm3 = vweird.f32 %v3091_v55 }
 0x57a   : > { %v1926_v43 = vmul.f32 %v3093_v58, %v1924_v54  ;;  %v2085_v61 = vsel %vm1599_vm11, %v2080_v1, 0  ;;  %vm1931_vm10 = vweird.f32 %v3093_v58  ;;  %vm2070_vm6 = vmor %vm2068_vm5, %vm2069_vm3 }
 0x57b   : > { %2094 = vmatpush.bf16.msra.mxu3 %v2085_v61  ;;  %v2065_v9 = vsub.f32 1.0, %v2064_v63  ;;  %vm1932_vm15 = vmor %vm1930_vm13, %vm1931_vm10  ;;  %vm2136_vm10 = vcmask 195584  }
 0x57c   : > { %v1927_v0 = vsub.f32 1.0, %v1926_v43  ;;  %v2145_v43 = vld [vmem:[%s1094_s20] sm:$0x1] }
 0x57d   : > { %v2066_v15 = vmul.f32 %v3091_v55, %v2065_v9  ;;  %v2887_v9 = vld [vmem:[%s3985_s7 + $0x8] sm:$0xff] }
 0x57e   : > { %v1928_v6 = vmul.f32 %v3093_v58, %v1927_v0 }
 0x57f   : > { %v2067_v21 = vadd.f32 %v3091_v55, %v2066_v15  ;;  %v2889_v15 = vld [vmem:[%s3979_s27 + $0x8] sm:$0xff] }
 0x580   : > { %v1929_v10 = vadd.f32 %v3093_v58, %v1928_v6 }
 0x581   : > { %v2071_v28 = vsel %vm2070_vm6, %v3091_v55, %v2067_v21 }
 0x582   : > { %v1933_v12 = vsel %vm1932_vm15, %v3093_v58, %v1929_v10  ;;  %v2886_v10 = vld [vmem:[%s3985_s7] sm:$0xff]  ;;  %vm2270_vm15 = vcmask 523264   ;;  %s4363_s7 = sld [smem:[#allocation22_spill]] }
 0x583   : > { %v1938_v14 = vsel %vm1935_vm0, %v1937_v11, %v1933_v12  ;;  %v2891_v11 = vld [vmem:[%s3979_s27 + $0x18] sm:$0xff] }
 0x584   : > { %v1939_v16 = vmul.f32 %v4124_v42, %v1938_v14  ;;  %v2011_v17 = vpop.permute.xlu0 %2010  ;;  %v2076_v42 = vsel %vm2073_vm7, %v2075_v24, %v2071_v28  ;;  %2278 = vmatpush.bf16.msrb.mxu2 %v2891_v11  ;;  %v2176_v24 = vld [vmem:[%s1112_s19] sm:$0x1] }
 0x585   : > { %v2016_v18 = vsel %vm1599_vm11, %v2011_v17, 0  ;;  %v2077_v25 = vmul.f32 %v4122_v41, %v2076_v42  ;;  %vm2130_vm11 = vcmask 97280  }
 0x586   : > { %2025 = vmatpush.bf16.msra.mxu1 %v2016_v18  ;;  %v1940_v19 = vpack.c.bf16 %v1939_v16, %v1939_v16 }
 0x587   : > { %v2078_v56 = vpack.c.bf16 %v2077_v25, %v2077_v25 }
 0x588   : > { %2817 = vmatmul.msk.bf16.vlgmr.msrb.gmra.mxu3 %vm1595_vm14, %v1940_v19  ;;  %2279 = vmatpush.bf16.msrb.mxu2 %v2890_v13  ;;  %p2857_p5 = scmp.ne.s32.totalorder %s4363_s7, 5 }
 0x589   : > { %2819 = vmatmul.msk.bf16.vlgmr.msra.gmra.mxu1 %vm1595_vm14, %v2009_v20  ;;  %s4364_s21 = sld [smem:[#allocation31_spill]] (!%p2857_p5) }
 0x58a   : > { %2228 = vmatpush.bf16.msrb.mxu1 %v2887_v9  ;;  %s4366_s28 = sld [smem:[#allocation30_spill]] (!%p2857_p5) }
 0x58b   : > { %s4367_s11 = sld [smem:[#allocation55_spill]] (!%p2857_p5) }
 0x58c   : > { %2280 = vmatpush.bf16.msrb.mxu2 %v2889_v15 }
 0x58e   : > { %2229 = vmatpush.bf16.msrb.mxu1 %v2886_v10 }
 0x591   : > { %s4368_s16 = scalar_lea.vmem (!%p2857_p5), %s4367_s11, %s4384_s0 }
 0x598   : > { %2821 = vmatmul.msk.bf16.vlgmr.msra.gmra.mxu3 %vm1595_vm14, %v2078_v56 }
 0x5b9   : > { %v1682_v27 = vpop.f32.mrf.mxu3 }
 0x5ba   : > { %v1751_v30 = vpop.f32.mrf.mxu1 }
 0x5bb   : > { %2105 = vrot.lane.b32.xlu1 %v1751_v30, %s3557_s8  ;;  %v2206_v30 = vld [vmem:[%s1131_s25] sm:$0x1]  ;;  %s4365_s25 = sld [smem:[#allocation29_spill]] (!%p2857_p5) }
 0x5c1   : > { %v1684_v31 = vpop.f32.mrf.mxu3 }
 0x5c2   : > { %v1753_v32 = vpop.f32.mrf.mxu1 }
 0x5c3   : > { %2101 = vrot.lane.b32.xlu1 %v1682_v27, %s3558_s14  ;;  %v2888_v27 = vld [vmem:[%s3979_s27] sm:$0xff] }
 0x5c4   : > { %2281 = vmatpush.bf16.msrb.mxu2 %v2888_v27 }
 0x5c9   : > { %v1820_v33 = vpop.f32.mrf.mxu3 }
 0x5ca   : > { %v1889_v34 = vpop.f32.mrf.mxu1  ;;  %2109 = vrot.lane.b32.xlu2 %v1820_v33, %s3559_s29 }
 0x5cb   : > { %2113 = vrot.lane.b32.xlu1 %v1889_v34, %s3560_s12 }
 0x5d1   : > { %v1822_v35 = vpop.f32.mrf.mxu3 }
 0x5d2   : > { %v1891_v41 = vpop.f32.mrf.mxu1 }
 0x5d3   : > { %v2245_v41 = vld [vmem:[%s1140_s26] sm:$0x1] }
 0x606   : > { %v2027_v36 = vpop.f32.mrf.mxu1 }
 0x607   : > { %2121 = vrot.lane.b32.xlu2 %v2027_v36, %s3561_s6 }
 0x60b   : > { %v1958_v37 = vpop.f32.mrf.mxu3 }
 0x60c   : > { %2117 = vrot.lane.b32.xlu0 %v1958_v37, %s3562_s17 }
 0x60e   : > { %v2029_v38 = vpop.f32.mrf.mxu1 }
 0x613   : > { %v1960_v39 = vpop.f32.mrf.mxu3 }
 0x61b   : > { %v2096_v40 = vpop.f32.mrf.mxu3 }
 0x61c   : > { %2125 = vrot.lane.b32.xlu1 %v2096_v40, %s3563_s15 }
 0x623   : > { %v2098_v45 = vpop.f32.mrf.mxu3 }
 0x624   : > { %v2110_v50 = vpop.permute.xlu2 %2109 }
 0x62d   : > { %v2106_v44 = vpop.permute.xlu1 %2105 }
 0x635   : > { %v2102_v48 = vpop.permute.xlu1 %2101 }
 0x636   : > { %v2128_v49 = vsel %vm1546_vm4, %v4146_v26, %v2102_v48 }
 0x637   : > { %v2129_v51 = vsel %vm1595_vm14, %v2128_v49, %v2106_v44 }
 0x638   : > { %v2131_v54 = vsel %vm2130_vm11, %v2129_v51, %v2110_v50 }
 0x63d   : > { %v2114_v52 = vpop.permute.xlu1 %2113 }
 0x63e   : > { %v2133_v22 = vsel %vm2132_vm8, %v2131_v54, %v2114_v52 }
 0x661   : > { %v2122_v58 = vpop.permute.xlu2 %2121 }
 0x67e   : > { %v2118_v53 = vpop.permute.xlu0 %2117 }
 0x67f   : > { %v2135_v55 = vsel %vm2134_vm9, %v2133_v22, %v2118_v53 }
 0x680   : > { %v2137_v1 = vsel %vm2136_vm10, %v2135_v55, %v2122_v58 }
 0x68e   : > { %v2126_v59 = vpop.permute.xlu1 %2125 }
 0x68f   : > { %v2139_v60 = vsel %vm2138_vm12, %v2137_v1, %v2126_v59  ;;  %v2288_v59 = vld [vmem:[%s1149_s3] sm:$0x1] }
 0x690   : > { %v2144_v26 = vpack.c.bf16 %v2139_v60, %v2139_v60 }
 0x692   : > { %2830 = vmatmul.msk.bf16.vlgmr.msrb.gmra.mxu0 %vm1386_vm1, %v2144_v26  ;;  %v2289_v26 = vld [vmem:[%s1158_s10] sm:$0x1] }
 0x70f   : > { %v2170_v61 = vpop.f32.mrf.mxu0 }
 0x710   : > { %v2171_v62 = vadd.f32 %v2170_v61, %v2145_v43 }
 0x712   : > { %v2174_v63 = vadd.f32 %v2171_v62, %v4039_v57 }
 0x714   : > { %v2177_v0 = vsel %vm1440_vm2, %v2174_v63, 0.0 }
 0x715   : > { %2178 = vadd.xlane.f32.xlu0 %v2177_v0 }
 0x717   : > { %v2172_v2 = vpop.f32.mrf.mxu0 }
 0x788   : > { %v2179_v3 = vpop.xlane.xlu0 %2178 }
 0x789   : > { %v2180_v5 = vmul.f32 %v2179_v3, %v4011_v29 }
 0x78b   : > { %v2181_v6 = vsub.f32 %v2174_v63, %v2180_v5 }
 0x78d   : > { %v2182_v7 = vmul.f32 %v2181_v6, %v2181_v6 }
 0x78f   : > { %v2183_v8 = vsel %vm1440_vm2, %v2182_v7, 0.0 }
 0x790   : > { %2184 = vadd.xlane.f32.xlu2 %v2183_v8 }
 0x803   : > { %v2185_v57 = vpop.xlane.xlu2 %2184 }
 0x804   : > { %v2186_v12 = vmul.f32 %v2185_v57, %v4011_v29 }
 0x806   : > { %v2187_v14 = vadd.f32 1e-05, %v2186_v12 }
 0x808   : > { %3094 = vrsqrt.f32 %v2187_v14  ;;  %vm2194_vm14 = vweird.f32 %v2187_v14 }
 0x80e   : > { %v3095_v16 = vpop.eup %3094 }
 0x80f   : > { %v2189_v17 = vmul.f32 %v3095_v16, %v2187_v14  ;;  %vm2195_vm4 = vweird.f32 %v3095_v16 }
 0x810   : > { %vm2196_vm13 = vmor %vm2194_vm14, %vm2195_vm4 }
 0x811   : > { %v2190_v18 = vmul.f32 %v3095_v16, %v2189_v17 }
 0x813   : > { %v2191_v19 = vmul.f32 0.5, %v2190_v18 }
 0x815   : > { %v2192_v20 = vsub.f32 1.5, %v2191_v19 }
 0x817   : > { %v2193_v21 = vmul.f32 %v3095_v16, %v2192_v20 }
 0x819   : > { %v2197_v4 = vsel %vm2196_vm13, %v3095_v16, %v2193_v21 }
 0x81a   : > { %v2198_v28 = vmul.f32 %v2197_v4, %v2181_v6 }
 0x81c   : > { %v2199_v42 = vmul.f32 %v2198_v28, %v2175_v23 }
 0x81e   : > { %v2200_v25 = vadd.f32 %v2199_v42, %v2176_v24 }
 0x820   : > { %v2205_v56 = vpack.c.bf16 %v2200_v25, %v2200_v25 }
 0x822   : > { %2839 = vmatmul.msk.bf16.vlgmr.msrb.gmra.mxu1 %vm1386_vm1, %v2205_v56 }
 0x89f   : > { %v2231_v31 = vpop.f32.mrf.mxu1 }
 0x8a0   : > { %v2232_v32 = vadd.f32 %v2231_v31, %v2206_v30 }
 0x8a2   : > { %v2235_v33 = vmax.f32 %v2232_v32, 0.0 }
 0x8a4   : > { %v2244_v34 = vpack.c.bf16 %v2235_v33, %v2235_v33 }
 0x8a6   : > { %2856 = vmatmul.msk.bf16.vlgmr.msrb.gmra.mxu2 %vm2270_vm15, %v2244_v34 }
 0x8a7   : > { %v2233_v35 = vpop.f32.mrf.mxu1 }
 0x929   : > { %v2283_v36 = vpop.f32.mrf.mxu2 }
 0x92a   : > { %v2284_v37 = vadd.f32 %v2283_v36, %v2245_v41 }
 0x92c   : > { %v2287_v38 = vadd.f32 %v2284_v37, %v2200_v25 }
 0x92e   : > { %v2290_v39 = vsel %vm1440_vm2, %v2287_v38, 0.0 }
 0x92f   : > { %2291 = vadd.xlane.f32.xlu1 %v2290_v39 }
 0x931   : > { %v2285_v40 = vpop.f32.mrf.mxu2 }
 0x9a2   : > { %v2292_v45 = vpop.xlane.xlu1 %2291 }
 0x9a3   : > { %v2293_v46 = vmul.f32 %v2292_v45, %v4011_v29 }
 0x9a5   : > { %v2294_v47 = vsub.f32 %v2287_v38, %v2293_v46 }
 0x9a7   : > { %v2295_v44 = vmul.f32 %v2294_v47, %v2294_v47 }
 0x9a9   : > { %v2296_v48 = vsel %vm1440_vm2, %v2295_v44, 0.0 }
 0x9aa   : > { %2297 = vadd.xlane.f32.xlu0 %v2296_v48 }
 0xa1d   : > { %v2298_v49 = vpop.xlane.xlu0 %2297 }
 0xa1e   : > { %v2299_v50 = vmul.f32 %v2298_v49, %v4011_v29 }
 0xa20   : > { %v2300_v51 = vadd.f32 1e-05, %v2299_v50 }
 0xa22   : > { %3096 = vrsqrt.f32 %v2300_v51  ;;  %vm2307_vm3 = vweird.f32 %v2300_v51 }
 0xa28   : > { %v3097_v52 = vpop.eup %3096 }
 0xa29   : > { %v2302_v53 = vmul.f32 %v3097_v52, %v2300_v51  ;;  %vm2308_vm0 = vweird.f32 %v3097_v52 }
 0xa2a   : > { %vm2309_vm5 = vmor %vm2307_vm3, %vm2308_vm0 }
 0xa2b   : > { %v2303_v54 = vmul.f32 %v3097_v52, %v2302_v53 }
 0xa2d   : > { %v2304_v22 = vmul.f32 0.5, %v2303_v54 }
 0xa2f   : > { %v2305_v55 = vsub.f32 1.5, %v2304_v22 }
 0xa31   : > { %v2306_v58 = vmul.f32 %v3097_v52, %v2305_v55 }
 0xa33   : > { %v2310_v1 = vsel %vm2309_vm5, %v3097_v52, %v2306_v58 }
 0xa34   : > { %v2311_v60 = vmul.f32 %v2310_v1, %v2294_v47 }
 0xa36   : > { %v2312_v43 = vmul.f32 %v2311_v60, %v2288_v59  ;;  %2318 = sbr.rel (%p2857_p5) target bundleno = 3141 (0xc45), region = 184 }
 0xa38   : > { %v2313_v61 = vadd.f32 %v2312_v43, %v2289_v26 }
 0xa3a   : > { %2314 = vst.msk [vmem:[#allocation2] sm:$0x1] %vm1440_vm2, %v2313_v61 }
 0xa3b   : > { %v2321_v62 = vsel %vm1440_vm2, %v2313_v61, 0.0  ;;  %v2893_v6 = vld [vmem:[%s4364_s21 + $0x8] sm:$0xff]  ;;  %v2892_v7 = vld [vmem:[%s4364_s21] sm:$0xff]  ;;  %vm2382_vm11 = vcmask 122880   ;;  %vm2388_vm8 = vcmask 0  }
 0xa3c   : > { %2322 = vadd.xlane.f32.xlu0 %v2321_v62  ;;  %2372 = vmatpush.bf16.msra.mxu0 %v2893_v6  ;;  %v2319_v16 = vld [vmem:[%s4365_s25] sm:$0x1]  ;;  %v2350_v23 = vld [vmem:[#allocation4] sm:$0x1]  ;;  %v2380_v24 = vld [vmem:[#allocation6] sm:$0x1] }
 0xa3d   : > { %v2386_v30 = vld [vmem:[#allocation3] sm:$0x1] }
 0xa40   : > { %2373 = vmatpush.bf16.msra.mxu0 %v2892_v7 }
 0xaaf   : > { %v2323_v63 = vpop.xlane.xlu0 %2322 }
 0xab0   : > { %v2324_v0 = vmul.f32 %v2323_v63, %v4011_v29 }
 0xab2   : > { %v2325_v2 = vsub.f32 %v2313_v61, %v2324_v0 }
 0xab4   : > { %v2326_v3 = vmul.f32 %v2325_v2, %v2325_v2 }
 0xab6   : > { %v2327_v5 = vsel %vm1440_vm2, %v2326_v3, 0.0 }
 0xab7   : > { %2328 = vadd.xlane.f32.xlu0 %v2327_v5 }
 0xb2a   : > { %v2329_v8 = vpop.xlane.xlu0 %2328 }
 0xb2b   : > { %v2330_v9 = vmul.f32 %v2329_v8, %v4011_v29  ;;  %v2320_v29 = vld [vmem:[%s4366_s28] sm:$0x1] }
 0xb2d   : > { %v2331_v10 = vadd.f32 1e-05, %v2330_v9 }
 0xb2f   : > { %3098 = vrsqrt.f32 %v2331_v10  ;;  %vm2338_vm6 = vweird.f32 %v2331_v10 }
 0xb35   : > { %v3099_v11 = vpop.eup %3098 }
 0xb36   : > { %v2333_v57 = vmul.f32 %v3099_v11, %v2331_v10  ;;  %vm2339_vm2 = vweird.f32 %v3099_v11 }
 0xb37   : > { %vm2340_vm7 = vmor %vm2338_vm6, %vm2339_vm2 }
 0xb38   : > { %v2334_v12 = vmul.f32 %v3099_v11, %v2333_v57 }
 0xb3a   : > { %v2335_v13 = vmul.f32 0.5, %v2334_v12 }
 0xb3c   : > { %v2336_v14 = vsub.f32 1.5, %v2335_v13 }
 0xb3e   : > { %v2337_v15 = vmul.f32 %v3099_v11, %v2336_v14 }
 0xb40   : > { %v2341_v17 = vsel %vm2340_vm7, %v3099_v11, %v2337_v15 }
 0xb41   : > { %v2342_v18 = vmul.f32 %v2341_v17, %v2325_v2 }
 0xb43   : > { %v2343_v19 = vmul.f32 %v2342_v18, %v2319_v16 }
 0xb45   : > { %v2344_v20 = vadd.f32 %v2343_v19, %v2320_v29 }
 0xb47   : > { %v2349_v21 = vpack.c.bf16 %v2344_v20, %v2344_v20 }
 0xb49   : > { %2866 = vmatmul.msk.bf16.vlgmr.msra.gmra.mxu0 %vm1386_vm1, %v2349_v21 }
 0xbc6   : > { %v2375_v4 = vpop.f32.mrf.mxu0 }
 0xbc7   : > { %v2376_v28 = vadd.f32 %v2375_v4, %v2350_v23 }
 0xbc9   : > { %v2379_v42 = vmax.f32 %v2376_v28, 0.0 }
 0xbcb   : > { %v2381_v25 = vmul.f32 %v2380_v24, %v2379_v42 }
 0xbcd   : > { %v2383_v56 = vsel %vm2382_vm11, %v2381_v25, 0.0 }
 0xbce   : > { %v2377_v27 = vpop.f32.mrf.mxu0  ;;  %2384 = vadd.xlane.f32.xlu1 %v2383_v56 }
 0xc41   : > { %v2385_v31 = vpop.xlane.xlu1 %2384 }
 0xc42   : > { %v2387_v32 = vadd.f32 %v2386_v30, %v2385_v31 }
 0xc44   : > { %2389 = vst.msk [vmem:[%s4368_s16] sm:$0x1] %vm2388_vm8, %v2387_v32 }
 0xc45 PF: > { %s41_s1 = sadd.s32 1, %s3534_s1   ;;  %s4369_s18 = sld [smem:[#allocation21_spill]] }
 0xc46   : > { %p38_p6 = scmp.ge.s32.totalorder %s41_s1, 14   ;;  %s4370_s5 = sld [smem:[#allocation27_spill]] }
 0xc47   : > { %s4371_s28 = sld [smem:[#allocation23_spill]]  ;;  %s4375_s30 = smov %s3510_s9 }
 0xc48   : > { %s4372_s0 = sld [smem:[#allocation24_spill]]  ;;  %40 = sbr.rel (!%p38_p6) target bundleno = 42 (0x2a), region = 315 }
 0xc49   : > { %s4373_s10 = sld [smem:[#allocation25_spill]] }
 0xc4a   : > { %s4374_s29 = sld [smem:[#allocation26_spill]] }
 0xc4b   : > { %s4376_s9 = smov %s4369_s18 }
 0xc4d   :  { %2407 = vsyncpa [#allocation5], 1 }
 0xc4e   :  { %2409 = vsyncpa [#allocation5 + $0x1], 1 }
 0xc4f   :  { %2410 = vsyncpa [#allocation7], 1 }

</bundles_post_ra>
